<compile_context>
chip_gen: v7x
topology: tpu7x:2x2x1
jax: 0.10.0
libtpu: 0.0.40
codegen_flags: <defaults>
</compile_context>

<pallas_src>
import functools
import math

import jax
import jax.numpy as jnp
import numpy as np
from jax.experimental import pallas as pl
from jax.experimental.pallas import tpu as pltpu

LN_EPS = 1e-5  # PyTorch nn.LayerNorm default


def _layer_norm(x, gamma, beta):
    mean = jnp.mean(x, axis=-1, keepdims=True)
    var = jnp.mean((x - mean) ** 2, axis=-1, keepdims=True)
    return (x - mean) * jax.lax.rsqrt(var + LN_EPS) * gamma + beta


def _gelu_exact(x):
    # PyTorch nn.GELU() default is the exact erf formulation.
    return 0.5 * x * (1.0 + jax.lax.erf(x * (1.0 / math.sqrt(2.0))))


def attention_block_kernel(num_heads,
                           x_ref, ln1_g_ref, ln1_b_ref,
                           wqkv_ref, bqkv_ref, wo_ref, bo_ref,
                           ln2_g_ref, ln2_b_ref,
                           w1_ref, b1_ref, w2_ref, b2_ref,
                           o_ref):
    Bb, S, E = x_ref.shape
    nh = num_heads
    dh = E // nh
    M = Bb * S

    # ---- fold batch into the matmul M dimension (free collapse: S%8, E%128) ----
    x = x_ref[...].reshape(M, E)                              # (M, E) f32

    # ---- LayerNorm 1 (f32 statistics) ----
    xn = _layer_norm(x, ln1_g_ref[...], ln1_b_ref[...])

    # ---- Fused QKV projection, M = Bb*S rows.  bf16 operands on the MXU,
    #      f32 accumulation.  1/sqrt(dh) is pre-folded into the Q weight/bias.
    qkv = jnp.dot(xn.astype(jnp.bfloat16), wqkv_ref[...],
                  preferred_element_type=jnp.float32) + bqkv_ref[...]
    qkv = qkv.astype(jnp.bfloat16)                            # single cast for q/k/v

    # ---- Head split: (M, 3E) -> three (nh*Bb, S, dh) stacks.  Lane slices +
    #      one stack per slab (Mosaic-safe ops); all attention math below is
    #      batched over (head, batch) -> two big batched MXU einsums.
    def heads(t):
        slab = qkv[:, t * E:(t + 1) * E].reshape(Bb, S, E)    # free leading split
        stk = jnp.stack([slab[:, :, h * dh:(h + 1) * dh] for h in range(nh)],
                        axis=0)                               # (nh, Bb, S, dh)
        return stk.reshape(nh * Bb, S, dh)                    # free leading collapse

    qh, kh, vh = heads(0), heads(1), heads(2)

    # ---- Scaled dot-product attention, batched over nh*Bb ----
    s = jnp.einsum("nqd,nkd->nqk", qh, kh,
                   preferred_element_type=jnp.float32)        # (nh*Bb, S, S)
    s = s - jnp.max(s, axis=-1, keepdims=True)
    p = jnp.exp(s)
    p = (p * pl.reciprocal(jnp.sum(p, axis=-1, keepdims=True), approx=True)
         ).astype(jnp.bfloat16)
    ah = jnp.einsum("nqk,nkd->nqd", p, vh,
                    preferred_element_type=jnp.float32)       # (nh*Bb, S, dh)
    ah = ah.astype(jnp.bfloat16)

    # ---- Head merge folded into the output projection: no lane concat.
    #      attn = sum_h  ah_h (M, dh) @ W_o[h*dh:(h+1)*dh, :] (dh, E)
    wo = wo_ref[...]
    attn = jnp.dot(ah[0:Bb].reshape(M, dh), wo[0:dh, :],
                   preferred_element_type=jnp.float32)
    for h in range(1, nh):
        attn = attn + jnp.dot(ah[h * Bb:(h + 1) * Bb].reshape(M, dh),
                              wo[h * dh:(h + 1) * dh, :],
                              preferred_element_type=jnp.float32)
    attn = attn + bo_ref[...]

    x1 = x + attn                                             # residual 1 (f32)

    # ---- LayerNorm 2 + MLP with exact GELU (Dropout p=0.0 -> identity) ----
    x2n = _layer_norm(x1, ln2_g_ref[...], ln2_b_ref[...])
    h1 = jnp.dot(x2n.astype(jnp.bfloat16), w1_ref[...],
                 preferred_element_type=jnp.float32) + b1_ref[...]
    h1 = _gelu_exact(h1)
    h2 = jnp.dot(h1.astype(jnp.bfloat16), w2_ref[...],
                 preferred_element_type=jnp.float32) + b2_ref[...]

    o_ref[...] = (x1 + h2).reshape(Bb, S, E)                  # residual 2 (f32)


def _vmem_limit_bytes():
    """Generation-aware VMEM limit: ~5/8 of physical capacity
    (40 MiB on v7x's 64 MiB, 80 MiB on v5e/v6e's 128 MiB)."""
    cap = 64 * 1024 * 1024  # conservative default (v7x) if the query fails
    try:
        cap = int(pltpu.get_tpu_info().vmem_capacity_bytes)
    except Exception:
        pass
    return cap * 5 // 8


def _const_spec(shape, mode=None):
    """Whole-array block with a constant index map (resident across the grid)."""
    imap = lambda b, _shape=shape: (0,) * len(_shape)
    if mode is None:
        return pl.BlockSpec(shape, imap)
    return pl.BlockSpec(shape, imap, pipeline_mode=mode)


def _attention_block_call(x_bse, kparams, num_heads, weight_mode):
    B, S, E = x_bse.shape
    H = kparams["w1_t"].shape[1]
    # Two parallel batch halves so both v7x TensorCores get work (one step is
    # enough on v5e/v6e's single TC, but two steps are harmless there).
    n_steps = 2 if (B % 2 == 0 and B >= 2) else 1
    b_blk = B // n_steps
    kernel = functools.partial(attention_block_kernel, num_heads)

    x_spec = pl.BlockSpec((b_blk, S, E), lambda b: (b, 0, 0))
    in_specs = [
        x_spec,
        _const_spec((1, E)), _const_spec((1, E)),                     # ln1
        _const_spec((E, 3 * E), weight_mode), _const_spec((1, 3 * E)),  # qkv proj
        _const_spec((E, E), weight_mode), _const_spec((1, E)),        # out proj
        _const_spec((1, E)), _const_spec((1, E)),                     # ln2
        _const_spec((E, H), weight_mode), _const_spec((1, H)),        # fc1
        _const_spec((H, E), weight_mode), _const_spec((1, E)),        # fc2
    ]

    return pl.pallas_call(
        kernel,
        out_shape=jax.ShapeDtypeStruct((B, S, E), jnp.float32),
        grid=(n_steps,),
        in_specs=in_specs,
        out_specs=pl.BlockSpec((b_blk, S, E), lambda b: (b, 0, 0)),
        compiler_params=pltpu.CompilerParams(
            dimension_semantics=("parallel",),
            vmem_limit_bytes=_vmem_limit_bytes(),
        ),
    )(x_bse,
      kparams["ln1_g"], kparams["ln1_b"],
      kparams["wqkv_t"], kparams["bqkv"],
      kparams["wo_t"], kparams["bo"],
      kparams["ln2_g"], kparams["ln2_b"],
      kparams["w1_t"], kparams["b1"],
      kparams["w2_t"], kparams["b2"])


def attention_block(x_sbe, kparams, num_heads):
    """x_sbe: (S, B, E) float32 -- PyTorch's seq-first MultiheadAttention layout."""
    # One cheap XLA transpose on each side so the kernel sees contiguous
    # (B_blk, S, E) slabs and every in-kernel reshape is a free tile-aligned
    # collapse (batch folds straight into the matmul M dimension).
    x_bse = jnp.transpose(x_sbe, (1, 0, 2))
    try:
        # Constant-index weight blocks single-buffered (halves weight VMEM on v7x).
        out = _attention_block_call(x_bse, kparams, num_heads, pl.Buffered(1))
    except Exception:
        # Fallback: default double buffering if single-buffering is unsupported.
        out = _attention_block_call(x_bse, kparams, num_heads, None)
    return jnp.transpose(out, (1, 0, 2))


def init_torch_params(key, embed_dim, hidden_dim):
    """Deterministic synthetic parameters with the nn.Module's native shapes (f32)."""
    E, H = embed_dim, hidden_dim
    ks = jax.random.split(key, 12)
    sc = 0.05
    return {
        "ln1_g": 1.0 + sc * jax.random.normal(ks[0], (E,), jnp.float32),
        "ln1_b": sc * jax.random.normal(ks[1], (E,), jnp.float32),
        "in_proj_w": sc * jax.random.normal(ks[2], (3 * E, E), jnp.float32),
        "in_proj_b": sc * jax.random.normal(ks[3], (3 * E,), jnp.float32),
        "out_proj_w": sc * jax.random.normal(ks[4], (E, E), jnp.float32),
        "out_proj_b": sc * jax.random.normal(ks[5], (E,), jnp.float32),
        "ln2_g": 1.0 + sc * jax.random.normal(ks[6], (E,), jnp.float32),
        "ln2_b": sc * jax.random.normal(ks[7], (E,), jnp.float32),
        "fc1_w": sc * jax.random.normal(ks[8], (H, E), jnp.float32),
        "fc1_b": sc * jax.random.normal(ks[9], (H,), jnp.float32),
        "fc2_w": sc * jax.random.normal(ks[10], (E, H), jnp.float32),
        "fc2_b": sc * jax.random.normal(ks[11], (E,), jnp.float32),
    }


def prepare_kernel_params(tp, num_heads):
    """Pre-transpose weights, fold the 1/sqrt(dh) attention scale into the Q
    columns of the QKV projection, and cast matmul weights to bf16
    (biases and LayerNorm parameters stay f32)."""
    E = tp["in_proj_w"].shape[1]
    H = tp["fc1_w"].shape[0]
    dh = E // num_heads
    scale = 1.0 / math.sqrt(dh)
    qkv_scale = jnp.concatenate(
        [jnp.full((E,), scale, jnp.float32), jnp.ones((2 * E,), jnp.float32)])
    return {
        "ln1_g": tp["ln1_g"].reshape(1, E),
        "ln1_b": tp["ln1_b"].reshape(1, E),
        "wqkv_t": (tp["in_proj_w"].T * qkv_scale[None, :]).astype(jnp.bfloat16),
        "bqkv": (tp["in_proj_b"] * qkv_scale).reshape(1, 3 * E),
        "wo_t": tp["out_proj_w"].T.astype(jnp.bfloat16),
        "bo": tp["out_proj_b"].reshape(1, E),
        "ln2_g": tp["ln2_g"].reshape(1, E),
        "ln2_b": tp["ln2_b"].reshape(1, E),
        "w1_t": tp["fc1_w"].T.astype(jnp.bfloat16),
        "b1": tp["fc1_b"].reshape(1, H),
        "w2_t": tp["fc2_w"].T.astype(jnp.bfloat16),
        "b2": tp["fc2_b"].reshape(1, E),
    }


def reference(x_sbe, tp, num_heads):
    """Pure-JAX f32 reference of the PyTorch forward, for verification."""
    S, B, E = x_sbe.shape
    dh = E // num_heads
    x = jnp.transpose(x_sbe, (1, 0, 2))

    def ln(v, g, b):
        m = v.mean(-1, keepdims=True)
        var = ((v - m) ** 2).mean(-1, keepdims=True)
        return (v - m) / jnp.sqrt(var + LN_EPS) * g + b

    xn = ln(x, tp["ln1_g"], tp["ln1_b"])
    qkv = xn @ tp["in_proj_w"].T + tp["in_proj_b"]
    q, k, v = jnp.split(qkv, 3, axis=-1)
    qh = q.reshape(B, S, num_heads, dh).transpose(0, 2, 1, 3)
    kh = k.reshape(B, S, num_heads, dh).transpose(0, 2, 1, 3)
    vh = v.reshape(B, S, num_heads, dh).transpose(0, 2, 1, 3)
    s = jnp.einsum("bhqd,bhkd->bhqk", qh, kh) / math.sqrt(dh)
    p = jax.nn.softmax(s, axis=-1)
    a = jnp.einsum("bhqk,bhkd->bhqd", p, vh).transpose(0, 2, 1, 3).reshape(B, S, E)
    a = a @ tp["out_proj_w"].T + tp["out_proj_b"]
    x1 = x + a
    x2n = ln(x1, tp["ln2_g"], tp["ln2_b"])
    h1 = x2n @ tp["fc1_w"].T + tp["fc1_b"]
    h1 = 0.5 * h1 * (1.0 + jax.lax.erf(h1 * (1.0 / math.sqrt(2.0))))
    h2 = h1 @ tp["fc2_w"].T + tp["fc2_b"]
    return jnp.transpose(x1 + h2, (1, 0, 2))


if __name__ == "__main__":
    # Small but tile-aligned config: S % 8 == 0, E multiple of 128, even B so
    # the grid has two parallel batch halves (both v7x TensorCores busy).
    S, B, E, H, NUM_HEADS = 32, 4, 128, 256, 4

    key = jax.random.PRNGKey(0)
    k_x, k_p = jax.random.split(key)
    x = jax.random.normal(k_x, (S, B, E), jnp.float32)   # (seq, batch, embed)

    tparams = init_torch_params(k_p, E, H)
    kparams = prepare_kernel_params(tparams, NUM_HEADS)

    out = jax.block_until_ready(attention_block(x, kparams, NUM_HEADS))
    ref = jax.block_until_ready(reference(x, tparams, NUM_HEADS))

    # bf16 MXU operands + approx reciprocal in the kernel vs. f32 reference.
    np.testing.assert_allclose(np.asarray(out), np.asarray(ref), rtol=2e-2, atol=2e-2)

    print("KERNEL_OK")
</pallas_src>

<mosaic_0001>
module attributes {stable_mosaic.version = 11 : i64} {
  func.func @attention_block_kernel(%arg0: i32, %arg1: memref<2x32x128xf32, #tpu.memory_space<vmem>>, %arg2: memref<1x128xf32, #tpu.memory_space<vmem>>, %arg3: memref<1x128xf32, #tpu.memory_space<vmem>>, %arg4: memref<128x384xbf16, #tpu.memory_space<vmem>>, %arg5: memref<1x384xf32, #tpu.memory_space<vmem>>, %arg6: memref<128x128xbf16, #tpu.memory_space<vmem>>, %arg7: memref<1x128xf32, #tpu.memory_space<vmem>>, %arg8: memref<1x128xf32, #tpu.memory_space<vmem>>, %arg9: memref<1x128xf32, #tpu.memory_space<vmem>>, %arg10: memref<128x256xbf16, #tpu.memory_space<vmem>>, %arg11: memref<1x256xf32, #tpu.memory_space<vmem>>, %arg12: memref<256x128xbf16, #tpu.memory_space<vmem>>, %arg13: memref<1x128xf32, #tpu.memory_space<vmem>>, %arg14: memref<2x32x128xf32, #tpu.memory_space<vmem>>) attributes {dimension_semantics = [#tpu.dimension_semantics<parallel>], iteration_bounds = array<i64: 2>, scalar_prefetch = 0 : i64, scratch_operands = 0 : i64, tpu.core_type = #tpu.core_type<tc>, window_params = [{transform_indices = @transform_0, window_bounds = array<i64: 2, 32, 128>}, {pipeline_mode = #tpu.pipeline_mode<synchronous>, transform_indices = @transform_1, window_bounds = array<i64: 1, 128>}, {pipeline_mode = #tpu.pipeline_mode<synchronous>, transform_indices = @transform_2, window_bounds = array<i64: 1, 128>}, {pipeline_mode = #tpu.pipeline_mode<synchronous>, transform_indices = @transform_3, window_bounds = array<i64: 128, 384>}, {pipeline_mode = #tpu.pipeline_mode<synchronous>, transform_indices = @transform_4, window_bounds = array<i64: 1, 384>}, {pipeline_mode = #tpu.pipeline_mode<synchronous>, transform_indices = @transform_5, window_bounds = array<i64: 128, 128>}, {pipeline_mode = #tpu.pipeline_mode<synchronous>, transform_indices = @transform_6, window_bounds = array<i64: 1, 128>}, {pipeline_mode = #tpu.pipeline_mode<synchronous>, transform_indices = @transform_7, window_bounds = array<i64: 1, 128>}, {pipeline_mode = #tpu.pipeline_mode<synchronous>, transform_indices = @transform_8, window_bounds = array<i64: 1, 128>}, {pipeline_mode = #tpu.pipeline_mode<synchronous>, transform_indices = @transform_9, window_bounds = array<i64: 128, 256>}, {pipeline_mode = #tpu.pipeline_mode<synchronous>, transform_indices = @transform_10, window_bounds = array<i64: 1, 256>}, {pipeline_mode = #tpu.pipeline_mode<synchronous>, transform_indices = @transform_11, window_bounds = array<i64: 256, 128>}, {pipeline_mode = #tpu.pipeline_mode<synchronous>, transform_indices = @transform_12, window_bounds = array<i64: 1, 128>}, {transform_indices = @transform_13, window_bounds = array<i64: 2, 32, 128>}]} {
    %c0 = arith.constant 0 : index
    %c0_0 = arith.constant 0 : index
    %c0_1 = arith.constant 0 : index
    %0 = vector.load %arg1[%c0, %c0_0, %c0_1] : memref<2x32x128xf32, #tpu.memory_space<vmem>>, vector<2x32x128xf32>
    %1 = vector.shape_cast %0 : vector<2x32x128xf32> to vector<64x128xf32>
    %c0_2 = arith.constant 0 : index
    %c0_3 = arith.constant 0 : index
    %2 = vector.load %arg2[%c0_2, %c0_3] : memref<1x128xf32, #tpu.memory_space<vmem>>, vector<1x128xf32>
    %c0_4 = arith.constant 0 : index
    %c0_5 = arith.constant 0 : index
    %3 = vector.load %arg3[%c0_4, %c0_5] : memref<1x128xf32, #tpu.memory_space<vmem>>, vector<1x128xf32>
    %cst = arith.constant dense<0.000000e+00> : vector<64xf32>
    %4 = vector.multi_reduction <add>, %1, %cst [1] : vector<64x128xf32> to vector<64xf32>
    %5 = vector.shape_cast %4 : vector<64xf32> to vector<64x1xf32>
    %cst_6 = arith.constant 1.280000e+02 : f32
    %6 = vector.broadcast %cst_6 : f32 to vector<64x1xf32>
    %7 = arith.divf %5, %6 : vector<64x1xf32>
    %8 = vector.broadcast %7 : vector<64x1xf32> to vector<64x128xf32>
    %9 = arith.subf %1, %8 : vector<64x128xf32>
    %10 = arith.mulf %9, %9 : vector<64x128xf32>
    %cst_7 = arith.constant dense<0.000000e+00> : vector<64xf32>
    %11 = vector.multi_reduction <add>, %10, %cst_7 [1] : vector<64x128xf32> to vector<64xf32>
    %12 = vector.shape_cast %11 : vector<64xf32> to vector<64x1xf32>
    %cst_8 = arith.constant 1.280000e+02 : f32
    %13 = vector.broadcast %cst_8 : f32 to vector<64x1xf32>
    %14 = arith.divf %12, %13 : vector<64x1xf32>
    %15 = vector.broadcast %7 : vector<64x1xf32> to vector<64x128xf32>
    %16 = arith.subf %1, %15 : vector<64x128xf32>
    %cst_9 = arith.constant 9.99999974E-6 : f32
    %17 = vector.broadcast %cst_9 : f32 to vector<64x1xf32>
    %18 = arith.addf %14, %17 : vector<64x1xf32>
    %19 = math.rsqrt %18 : vector<64x1xf32>
    %20 = vector.broadcast %19 : vector<64x1xf32> to vector<64x128xf32>
    %21 = arith.mulf %16, %20 : vector<64x128xf32>
    %22 = vector.broadcast %2 : vector<1x128xf32> to vector<64x128xf32>
    %23 = arith.mulf %21, %22 : vector<64x128xf32>
    %24 = vector.broadcast %3 : vector<1x128xf32> to vector<64x128xf32>
    %25 = arith.addf %23, %24 : vector<64x128xf32>
    %26 = arith.truncf %25 : vector<64x128xf32> to vector<64x128xbf16>
    %c0_10 = arith.constant 0 : index
    %c0_11 = arith.constant 0 : index
    %27 = vector.load %arg4[%c0_10, %c0_11] : memref<128x384xbf16, #tpu.memory_space<vmem>>, vector<128x384xbf16>
    %cst_12 = arith.constant dense<0.000000e+00> : vector<64x384xf32>
    %28 = tpu.matmul %26, %27, %cst_12 {dimension_numbers = #tpu.dot_dimension_numbers<[1], [0], [0], [1], [0, 0, 1, 1], [], []>} : vector<64x128xbf16>, vector<128x384xbf16>, vector<64x384xf32> -> vector<64x384xf32>
    %c0_13 = arith.constant 0 : index
    %c0_14 = arith.constant 0 : index
    %29 = vector.load %arg5[%c0_13, %c0_14] : memref<1x384xf32, #tpu.memory_space<vmem>>, vector<1x384xf32>
    %30 = vector.broadcast %29 : vector<1x384xf32> to vector<64x384xf32>
    %31 = arith.addf %28, %30 : vector<64x384xf32>
    %32 = arith.truncf %31 : vector<64x384xf32> to vector<64x384xbf16>
    %33 = vector.extract_strided_slice %32 {offsets = [0, 0], sizes = [64, 128], strides = [1, 1]} : vector<64x384xbf16> to vector<64x128xbf16>
    %34 = vector.shape_cast %33 : vector<64x128xbf16> to vector<2x32x128xbf16>
    %35 = vector.extract_strided_slice %34 {offsets = [0, 0, 0], sizes = [2, 32, 32], strides = [1, 1, 1]} : vector<2x32x128xbf16> to vector<2x32x32xbf16>
    %36 = vector.extract_strided_slice %34 {offsets = [0, 0, 32], sizes = [2, 32, 32], strides = [1, 1, 1]} : vector<2x32x128xbf16> to vector<2x32x32xbf16>
    %37 = vector.extract_strided_slice %34 {offsets = [0, 0, 64], sizes = [2, 32, 32], strides = [1, 1, 1]} : vector<2x32x128xbf16> to vector<2x32x32xbf16>
    %38 = vector.extract_strided_slice %34 {offsets = [0, 0, 96], sizes = [2, 32, 32], strides = [1, 1, 1]} : vector<2x32x128xbf16> to vector<2x32x32xbf16>
    %39 = vector.shape_cast %35 : vector<2x32x32xbf16> to vector<1x2x32x32xbf16>
    %40 = vector.shape_cast %36 : vector<2x32x32xbf16> to vector<1x2x32x32xbf16>
    %41 = vector.shape_cast %37 : vector<2x32x32xbf16> to vector<1x2x32x32xbf16>
    %42 = vector.shape_cast %38 : vector<2x32x32xbf16> to vector<1x2x32x32xbf16>
    %43 = tpu.concatenate %39, %40, %41, %42 in 0 : vector<1x2x32x32xbf16>, vector<1x2x32x32xbf16>, vector<1x2x32x32xbf16>, vector<1x2x32x32xbf16> -> vector<4x2x32x32xbf16>
    %44 = vector.shape_cast %43 : vector<4x2x32x32xbf16> to vector<8x32x32xbf16>
    %45 = vector.extract_strided_slice %32 {offsets = [0, 128], sizes = [64, 128], strides = [1, 1]} : vector<64x384xbf16> to vector<64x128xbf16>
    %46 = vector.shape_cast %45 : vector<64x128xbf16> to vector<2x32x128xbf16>
    %47 = vector.extract_strided_slice %46 {offsets = [0, 0, 0], sizes = [2, 32, 32], strides = [1, 1, 1]} : vector<2x32x128xbf16> to vector<2x32x32xbf16>
    %48 = vector.extract_strided_slice %46 {offsets = [0, 0, 32], sizes = [2, 32, 32], strides = [1, 1, 1]} : vector<2x32x128xbf16> to vector<2x32x32xbf16>
    %49 = vector.extract_strided_slice %46 {offsets = [0, 0, 64], sizes = [2, 32, 32], strides = [1, 1, 1]} : vector<2x32x128xbf16> to vector<2x32x32xbf16>
    %50 = vector.extract_strided_slice %46 {offsets = [0, 0, 96], sizes = [2, 32, 32], strides = [1, 1, 1]} : vector<2x32x128xbf16> to vector<2x32x32xbf16>
    %51 = vector.shape_cast %47 : vector<2x32x32xbf16> to vector<1x2x32x32xbf16>
    %52 = vector.shape_cast %48 : vector<2x32x32xbf16> to vector<1x2x32x32xbf16>
    %53 = vector.shape_cast %49 : vector<2x32x32xbf16> to vector<1x2x32x32xbf16>
    %54 = vector.shape_cast %50 : vector<2x32x32xbf16> to vector<1x2x32x32xbf16>
    %55 = tpu.concatenate %51, %52, %53, %54 in 0 : vector<1x2x32x32xbf16>, vector<1x2x32x32xbf16>, vector<1x2x32x32xbf16>, vector<1x2x32x32xbf16> -> vector<4x2x32x32xbf16>
    %56 = vector.shape_cast %55 : vector<4x2x32x32xbf16> to vector<8x32x32xbf16>
    %57 = vector.extract_strided_slice %32 {offsets = [0, 256], sizes = [64, 128], strides = [1, 1]} : vector<64x384xbf16> to vector<64x128xbf16>
    %58 = vector.shape_cast %57 : vector<64x128xbf16> to vector<2x32x128xbf16>
    %59 = vector.extract_strided_slice %58 {offsets = [0, 0, 0], sizes = [2, 32, 32], strides = [1, 1, 1]} : vector<2x32x128xbf16> to vector<2x32x32xbf16>
    %60 = vector.extract_strided_slice %58 {offsets = [0, 0, 32], sizes = [2, 32, 32], strides = [1, 1, 1]} : vector<2x32x128xbf16> to vector<2x32x32xbf16>
    %61 = vector.extract_strided_slice %58 {offsets = [0, 0, 64], sizes = [2, 32, 32], strides = [1, 1, 1]} : vector<2x32x128xbf16> to vector<2x32x32xbf16>
    %62 = vector.extract_strided_slice %58 {offsets = [0, 0, 96], sizes = [2, 32, 32], strides = [1, 1, 1]} : vector<2x32x128xbf16> to vector<2x32x32xbf16>
    %63 = vector.shape_cast %59 : vector<2x32x32xbf16> to vector<1x2x32x32xbf16>
    %64 = vector.shape_cast %60 : vector<2x32x32xbf16> to vector<1x2x32x32xbf16>
    %65 = vector.shape_cast %61 : vector<2x32x32xbf16> to vector<1x2x32x32xbf16>
    %66 = vector.shape_cast %62 : vector<2x32x32xbf16> to vector<1x2x32x32xbf16>
    %67 = tpu.concatenate %63, %64, %65, %66 in 0 : vector<1x2x32x32xbf16>, vector<1x2x32x32xbf16>, vector<1x2x32x32xbf16>, vector<1x2x32x32xbf16> -> vector<4x2x32x32xbf16>
    %68 = vector.shape_cast %67 : vector<4x2x32x32xbf16> to vector<8x32x32xbf16>
    "tpu.trace_start"() <{level = 10 : i32, message = "nqd,nkd->nqk"}> : () -> ()
    %cst_15 = arith.constant dense<0.000000e+00> : vector<8x32x32xf32>
    %69 = tpu.matmul %44, %56, %cst_15 {dimension_numbers = #tpu.dot_dimension_numbers<[2], [2], [1], [1], [0, 0, 0, 1, 1, 1], [0], [0]>} : vector<8x32x32xbf16>, vector<8x32x32xbf16>, vector<8x32x32xf32> -> vector<8x32x32xf32>
    "tpu.trace_stop"() : () -> ()
    %cst_16 = arith.constant dense<0xFF800000> : vector<8x32xf32>
    %70 = vector.multi_reduction <maximumf>, %69, %cst_16 [2] : vector<8x32x32xf32> to vector<8x32xf32>
    %71 = vector.shape_cast %70 : vector<8x32xf32> to vector<8x32x1xf32>
    %72 = vector.broadcast %71 : vector<8x32x1xf32> to vector<8x32x32xf32>
    %73 = arith.subf %69, %72 : vector<8x32x32xf32>
    %74 = math.exp %73 : vector<8x32x32xf32>
    %cst_17 = arith.constant dense<0.000000e+00> : vector<8x32xf32>
    %75 = vector.multi_reduction <add>, %74, %cst_17 [2] : vector<8x32x32xf32> to vector<8x32xf32>
    %76 = vector.shape_cast %75 : vector<8x32xf32> to vector<8x32x1xf32>
    %77 = tpu.reciprocal %76 {approx = true} : vector<8x32x1xf32> -> vector<8x32x1xf32>
    %78 = vector.broadcast %77 : vector<8x32x1xf32> to vector<8x32x32xf32>
    %79 = arith.mulf %74, %78 : vector<8x32x32xf32>
    %80 = arith.truncf %79 : vector<8x32x32xf32> to vector<8x32x32xbf16>
    "tpu.trace_start"() <{level = 10 : i32, message = "nqk,nkd->nqd"}> : () -> ()
    %cst_18 = arith.constant dense<0.000000e+00> : vector<8x32x32xf32>
    %81 = tpu.matmul %80, %68, %cst_18 {dimension_numbers = #tpu.dot_dimension_numbers<[2], [1], [1], [2], [0, 0, 0, 1, 1, 2], [0], [0]>} : vector<8x32x32xbf16>, vector<8x32x32xbf16>, vector<8x32x32xf32> -> vector<8x32x32xf32>
    "tpu.trace_stop"() : () -> ()
    %82 = arith.truncf %81 : vector<8x32x32xf32> to vector<8x32x32xbf16>
    %c0_19 = arith.constant 0 : index
    %c0_20 = arith.constant 0 : index
    %83 = vector.load %arg6[%c0_19, %c0_20] : memref<128x128xbf16, #tpu.memory_space<vmem>>, vector<128x128xbf16>
    %84 = vector.extract_strided_slice %82 {offsets = [0, 0, 0], sizes = [2, 32, 32], strides = [1, 1, 1]} : vector<8x32x32xbf16> to vector<2x32x32xbf16>
    %85 = vector.shape_cast %84 : vector<2x32x32xbf16> to vector<64x32xbf16>
    %86 = vector.extract_strided_slice %83 {offsets = [0, 0], sizes = [32, 128], strides = [1, 1]} : vector<128x128xbf16> to vector<32x128xbf16>
    %cst_21 = arith.constant dense<0.000000e+00> : vector<64x128xf32>
    %87 = tpu.matmul %85, %86, %cst_21 {dimension_numbers = #tpu.dot_dimension_numbers<[1], [0], [0], [1], [0, 0, 1, 1], [], []>} : vector<64x32xbf16>, vector<32x128xbf16>, vector<64x128xf32> -> vector<64x128xf32>
    %88 = vector.extract_strided_slice %82 {offsets = [2, 0, 0], sizes = [2, 32, 32], strides = [1, 1, 1]} : vector<8x32x32xbf16> to vector<2x32x32xbf16>
    %89 = vector.shape_cast %88 : vector<2x32x32xbf16> to vector<64x32xbf16>
    %90 = vector.extract_strided_slice %83 {offsets = [32, 0], sizes = [32, 128], strides = [1, 1]} : vector<128x128xbf16> to vector<32x128xbf16>
    %cst_22 = arith.constant dense<0.000000e+00> : vector<64x128xf32>
    %91 = tpu.matmul %89, %90, %cst_22 {dimension_numbers = #tpu.dot_dimension_numbers<[1], [0], [0], [1], [0, 0, 1, 1], [], []>} : vector<64x32xbf16>, vector<32x128xbf16>, vector<64x128xf32> -> vector<64x128xf32>
    %92 = arith.addf %87, %91 : vector<64x128xf32>
    %93 = vector.extract_strided_slice %82 {offsets = [4, 0, 0], sizes = [2, 32, 32], strides = [1, 1, 1]} : vector<8x32x32xbf16> to vector<2x32x32xbf16>
    %94 = vector.shape_cast %93 : vector<2x32x32xbf16> to vector<64x32xbf16>
    %95 = vector.extract_strided_slice %83 {offsets = [64, 0], sizes = [32, 128], strides = [1, 1]} : vector<128x128xbf16> to vector<32x128xbf16>
    %cst_23 = arith.constant dense<0.000000e+00> : vector<64x128xf32>
    %96 = tpu.matmul %94, %95, %cst_23 {dimension_numbers = #tpu.dot_dimension_numbers<[1], [0], [0], [1], [0, 0, 1, 1], [], []>} : vector<64x32xbf16>, vector<32x128xbf16>, vector<64x128xf32> -> vector<64x128xf32>
    %97 = arith.addf %92, %96 : vector<64x128xf32>
    %98 = vector.extract_strided_slice %82 {offsets = [6, 0, 0], sizes = [2, 32, 32], strides = [1, 1, 1]} : vector<8x32x32xbf16> to vector<2x32x32xbf16>
    %99 = vector.shape_cast %98 : vector<2x32x32xbf16> to vector<64x32xbf16>
    %100 = vector.extract_strided_slice %83 {offsets = [96, 0], sizes = [32, 128], strides = [1, 1]} : vector<128x128xbf16> to vector<32x128xbf16>
    %cst_24 = arith.constant dense<0.000000e+00> : vector<64x128xf32>
    %101 = tpu.matmul %99, %100, %cst_24 {dimension_numbers = #tpu.dot_dimension_numbers<[1], [0], [0], [1], [0, 0, 1, 1], [], []>} : vector<64x32xbf16>, vector<32x128xbf16>, vector<64x128xf32> -> vector<64x128xf32>
    %102 = arith.addf %97, %101 : vector<64x128xf32>
    %c0_25 = arith.constant 0 : index
    %c0_26 = arith.constant 0 : index
    %103 = vector.load %arg7[%c0_25, %c0_26] : memref<1x128xf32, #tpu.memory_space<vmem>>, vector<1x128xf32>
    %104 = vector.broadcast %103 : vector<1x128xf32> to vector<64x128xf32>
    %105 = arith.addf %102, %104 : vector<64x128xf32>
    %106 = arith.addf %1, %105 : vector<64x128xf32>
    %c0_27 = arith.constant 0 : index
    %c0_28 = arith.constant 0 : index
    %107 = vector.load %arg8[%c0_27, %c0_28] : memref<1x128xf32, #tpu.memory_space<vmem>>, vector<1x128xf32>
    %c0_29 = arith.constant 0 : index
    %c0_30 = arith.constant 0 : index
    %108 = vector.load %arg9[%c0_29, %c0_30] : memref<1x128xf32, #tpu.memory_space<vmem>>, vector<1x128xf32>
    %cst_31 = arith.constant dense<0.000000e+00> : vector<64xf32>
    %109 = vector.multi_reduction <add>, %106, %cst_31 [1] : vector<64x128xf32> to vector<64xf32>
    %110 = vector.shape_cast %109 : vector<64xf32> to vector<64x1xf32>
    %cst_32 = arith.constant 1.280000e+02 : f32
    %111 = vector.broadcast %cst_32 : f32 to vector<64x1xf32>
    %112 = arith.divf %110, %111 : vector<64x1xf32>
    %113 = vector.broadcast %112 : vector<64x1xf32> to vector<64x128xf32>
    %114 = arith.subf %106, %113 : vector<64x128xf32>
    %115 = arith.mulf %114, %114 : vector<64x128xf32>
    %cst_33 = arith.constant dense<0.000000e+00> : vector<64xf32>
    %116 = vector.multi_reduction <add>, %115, %cst_33 [1] : vector<64x128xf32> to vector<64xf32>
    %117 = vector.shape_cast %116 : vector<64xf32> to vector<64x1xf32>
    %cst_34 = arith.constant 1.280000e+02 : f32
    %118 = vector.broadcast %cst_34 : f32 to vector<64x1xf32>
    %119 = arith.divf %117, %118 : vector<64x1xf32>
    %120 = vector.broadcast %112 : vector<64x1xf32> to vector<64x128xf32>
    %121 = arith.subf %106, %120 : vector<64x128xf32>
    %cst_35 = arith.constant 9.99999974E-6 : f32
    %122 = vector.broadcast %cst_35 : f32 to vector<64x1xf32>
    %123 = arith.addf %119, %122 : vector<64x1xf32>
    %124 = math.rsqrt %123 : vector<64x1xf32>
    %125 = vector.broadcast %124 : vector<64x1xf32> to vector<64x128xf32>
    %126 = arith.mulf %121, %125 : vector<64x128xf32>
    %127 = vector.broadcast %107 : vector<1x128xf32> to vector<64x128xf32>
    %128 = arith.mulf %126, %127 : vector<64x128xf32>
    %129 = vector.broadcast %108 : vector<1x128xf32> to vector<64x128xf32>
    %130 = arith.addf %128, %129 : vector<64x128xf32>
    %131 = arith.truncf %130 : vector<64x128xf32> to vector<64x128xbf16>
    %c0_36 = arith.constant 0 : index
    %c0_37 = arith.constant 0 : index
    %132 = vector.load %arg10[%c0_36, %c0_37] : memref<128x256xbf16, #tpu.memory_space<vmem>>, vector<128x256xbf16>
    %cst_38 = arith.constant dense<0.000000e+00> : vector<64x256xf32>
    %133 = tpu.matmul %131, %132, %cst_38 {dimension_numbers = #tpu.dot_dimension_numbers<[1], [0], [0], [1], [0, 0, 1, 1], [], []>} : vector<64x128xbf16>, vector<128x256xbf16>, vector<64x256xf32> -> vector<64x256xf32>
    %c0_39 = arith.constant 0 : index
    %c0_40 = arith.constant 0 : index
    %134 = vector.load %arg11[%c0_39, %c0_40] : memref<1x256xf32, #tpu.memory_space<vmem>>, vector<1x256xf32>
    %135 = vector.broadcast %134 : vector<1x256xf32> to vector<64x256xf32>
    %136 = arith.addf %133, %135 : vector<64x256xf32>
    %cst_41 = arith.constant 5.000000e-01 : f32
    %137 = vector.broadcast %cst_41 : f32 to vector<64x256xf32>
    %138 = arith.mulf %137, %136 : vector<64x256xf32>
    %cst_42 = arith.constant 0.707106769 : f32
    %139 = vector.broadcast %cst_42 : f32 to vector<64x256xf32>
    %140 = arith.mulf %136, %139 : vector<64x256xf32>
    %141 = math.erf %140 : vector<64x256xf32>
    %cst_43 = arith.constant 1.000000e+00 : f32
    %142 = vector.broadcast %cst_43 : f32 to vector<64x256xf32>
    %143 = arith.addf %142, %141 : vector<64x256xf32>
    %144 = arith.mulf %138, %143 : vector<64x256xf32>
    %145 = arith.truncf %144 : vector<64x256xf32> to vector<64x256xbf16>
    %c0_44 = arith.constant 0 : index
    %c0_45 = arith.constant 0 : index
    %146 = vector.load %arg12[%c0_44, %c0_45] : memref<256x128xbf16, #tpu.memory_space<vmem>>, vector<256x128xbf16>
    %cst_46 = arith.constant dense<0.000000e+00> : vector<64x128xf32>
    %147 = tpu.matmul %145, %146, %cst_46 {dimension_numbers = #tpu.dot_dimension_numbers<[1], [0], [0], [1], [0, 0, 1, 1], [], []>} : vector<64x256xbf16>, vector<256x128xbf16>, vector<64x128xf32> -> vector<64x128xf32>
    %c0_47 = arith.constant 0 : index
    %c0_48 = arith.constant 0 : index
    %148 = vector.load %arg13[%c0_47, %c0_48] : memref<1x128xf32, #tpu.memory_space<vmem>>, vector<1x128xf32>
    %149 = vector.broadcast %148 : vector<1x128xf32> to vector<64x128xf32>
    %150 = arith.addf %147, %149 : vector<64x128xf32>
    %151 = arith.addf %106, %150 : vector<64x128xf32>
    %152 = vector.shape_cast %151 : vector<64x128xf32> to vector<2x32x128xf32>
    %c0_49 = arith.constant 0 : index
    %c0_50 = arith.constant 0 : index
    %c0_51 = arith.constant 0 : index
    %153 = vector.load %arg14[%c0_49, %c0_50, %c0_51] : memref<2x32x128xf32, #tpu.memory_space<vmem>>, vector<2x32x128xf32>
    tpu.vector_store %arg14[%c0_49, %c0_50, %c0_51], %152 {strides = array<i32>} : memref<2x32x128xf32, #tpu.memory_space<vmem>>, vector<2x32x128xf32>,
    return
  }
  func.func @transform_0(%arg0: i32) -> (i32, i32, i32) {
    %c0_i32 = arith.constant 0 : i32
    %c0_i32_0 = arith.constant 0 : i32
    %c0_i32_1 = arith.constant 0 : i32
    return %arg0, %c0_i32, %c0_i32_0 : i32, i32, i32
  }
  func.func @transform_1(%arg0: i32) -> (i32, i32) {
    %c0_i32 = arith.constant 0 : i32
    %c0_i32_0 = arith.constant 0 : i32
    %c0_i32_1 = arith.constant 0 : i32
    return %c0_i32, %c0_i32_0 : i32, i32
  }
  func.func @transform_2(%arg0: i32) -> (i32, i32) {
    %c0_i32 = arith.constant 0 : i32
    %c0_i32_0 = arith.constant 0 : i32
    %c0_i32_1 = arith.constant 0 : i32
    return %c0_i32, %c0_i32_0 : i32, i32
  }
  func.func @transform_3(%arg0: i32) -> (i32, i32) {
    %c0_i32 = arith.constant 0 : i32
    %c0_i32_0 = arith.constant 0 : i32
    %c0_i32_1 = arith.constant 0 : i32
    return %c0_i32, %c0_i32_0 : i32, i32
  }
  func.func @transform_4(%arg0: i32) -> (i32, i32) {
    %c0_i32 = arith.constant 0 : i32
    %c0_i32_0 = arith.constant 0 : i32
    %c0_i32_1 = arith.constant 0 : i32
    return %c0_i32, %c0_i32_0 : i32, i32
  }
  func.func @transform_5(%arg0: i32) -> (i32, i32) {
    %c0_i32 = arith.constant 0 : i32
    %c0_i32_0 = arith.constant 0 : i32
    %c0_i32_1 = arith.constant 0 : i32
    return %c0_i32, %c0_i32_0 : i32, i32
  }
  func.func @transform_6(%arg0: i32) -> (i32, i32) {
    %c0_i32 = arith.constant 0 : i32
    %c0_i32_0 = arith.constant 0 : i32
    %c0_i32_1 = arith.constant 0 : i32
    return %c0_i32, %c0_i32_0 : i32, i32
  }
  func.func @transform_7(%arg0: i32) -> (i32, i32) {
    %c0_i32 = arith.constant 0 : i32
    %c0_i32_0 = arith.constant 0 : i32
    %c0_i32_1 = arith.constant 0 : i32
    return %c0_i32, %c0_i32_0 : i32, i32
  }
  func.func @transform_8(%arg0: i32) -> (i32, i32) {
    %c0_i32 = arith.constant 0 : i32
    %c0_i32_0 = arith.constant 0 : i32
    %c0_i32_1 = arith.constant 0 : i32
    return %c0_i32, %c0_i32_0 : i32, i32
  }
  func.func @transform_9(%arg0: i32) -> (i32, i32) {
    %c0_i32 = arith.constant 0 : i32
    %c0_i32_0 = arith.constant 0 : i32
    %c0_i32_1 = arith.constant 0 : i32
    return %c0_i32, %c0_i32_0 : i32, i32
  }
  func.func @transform_10(%arg0: i32) -> (i32, i32) {
    %c0_i32 = arith.constant 0 : i32
    %c0_i32_0 = arith.constant 0 : i32
    %c0_i32_1 = arith.constant 0 : i32
    return %c0_i32, %c0_i32_0 : i32, i32
  }
  func.func @transform_11(%arg0: i32) -> (i32, i32) {
    %c0_i32 = arith.constant 0 : i32
    %c0_i32_0 = arith.constant 0 : i32
    %c0_i32_1 = arith.constant 0 : i32
    return %c0_i32, %c0_i32_0 : i32, i32
  }
  func.func @transform_12(%arg0: i32) -> (i32, i32) {
    %c0_i32 = arith.constant 0 : i32
    %c0_i32_0 = arith.constant 0 : i32
    %c0_i32_1 = arith.constant 0 : i32
    return %c0_i32, %c0_i32_0 : i32, i32
  }
  func.func @transform_13(%arg0: i32) -> (i32, i32, i32) {
    %c0_i32 = arith.constant 0 : i32
    %c0_i32_0 = arith.constant 0 : i32
    %c0_i32_1 = arith.constant 0 : i32
    return %arg0, %c0_i32, %c0_i32_0 : i32, i32, i32
  }
}

module attributes {stable_mosaic.version = 11 : i64} {
  func.func @attention_block_kernel(%arg0: i32, %arg1: memref<2x32x128xf32, #tpu.memory_space<vmem>>, %arg2: memref<1x128xf32, #tpu.memory_space<vmem>>, %arg3: memref<1x128xf32, #tpu.memory_space<vmem>>, %arg4: memref<128x384xbf16, #tpu.memory_space<vmem>>, %arg5: memref<1x384xf32, #tpu.memory_space<vmem>>, %arg6: memref<128x128xbf16, #tpu.memory_space<vmem>>, %arg7: memref<1x128xf32, #tpu.memory_space<vmem>>, %arg8: memref<1x128xf32, #tpu.memory_space<vmem>>, %arg9: memref<1x128xf32, #tpu.memory_space<vmem>>, %arg10: memref<128x256xbf16, #tpu.memory_space<vmem>>, %arg11: memref<1x256xf32, #tpu.memory_space<vmem>>, %arg12: memref<256x128xbf16, #tpu.memory_space<vmem>>, %arg13: memref<1x128xf32, #tpu.memory_space<vmem>>, %arg14: memref<2x32x128xf32, #tpu.memory_space<vmem>>) attributes {dimension_semantics = [#tpu.dimension_semantics<parallel>], iteration_bounds = array<i64: 2>, scalar_prefetch = 0 : i64, scratch_operands = 0 : i64, tpu.core_type = #tpu.core_type<tc>, window_params = [{transform_indices = @transform_0, window_bounds = array<i64: 2, 32, 128>}, {pipeline_mode = #tpu.pipeline_mode<synchronous>, transform_indices = @transform_1, window_bounds = array<i64: 1, 128>}, {pipeline_mode = #tpu.pipeline_mode<synchronous>, transform_indices = @transform_2, window_bounds = array<i64: 1, 128>}, {pipeline_mode = #tpu.pipeline_mode<synchronous>, transform_indices = @transform_3, window_bounds = array<i64: 128, 384>}, {pipeline_mode = #tpu.pipeline_mode<synchronous>, transform_indices = @transform_4, window_bounds = array<i64: 1, 384>}, {pipeline_mode = #tpu.pipeline_mode<synchronous>, transform_indices = @transform_5, window_bounds = array<i64: 128, 128>}, {pipeline_mode = #tpu.pipeline_mode<synchronous>, transform_indices = @transform_6, window_bounds = array<i64: 1, 128>}, {pipeline_mode = #tpu.pipeline_mode<synchronous>, transform_indices = @transform_7, window_bounds = array<i64: 1, 128>}, {pipeline_mode = #tpu.pipeline_mode<synchronous>, transform_indices = @transform_8, window_bounds = array<i64: 1, 128>}, {pipeline_mode = #tpu.pipeline_mode<synchronous>, transform_indices = @transform_9, window_bounds = array<i64: 128, 256>}, {pipeline_mode = #tpu.pipeline_mode<synchronous>, transform_indices = @transform_10, window_bounds = array<i64: 1, 256>}, {pipeline_mode = #tpu.pipeline_mode<synchronous>, transform_indices = @transform_11, window_bounds = array<i64: 256, 128>}, {pipeline_mode = #tpu.pipeline_mode<synchronous>, transform_indices = @transform_12, window_bounds = array<i64: 1, 128>}, {transform_indices = @transform_13, window_bounds = array<i64: 2, 32, 128>}]} {
    %c0 = arith.constant 0 : index
    %c0_0 = arith.constant 0 : index
    %c0_1 = arith.constant 0 : index
    %0 = vector.load %arg1[%c0, %c0_0, %c0_1] : memref<2x32x128xf32, #tpu.memory_space<vmem>>, vector<2x32x128xf32>
    %1 = vector.shape_cast %0 : vector<2x32x128xf32> to vector<64x128xf32>
    %c0_2 = arith.constant 0 : index
    %c0_3 = arith.constant 0 : index
    %2 = vector.load %arg2[%c0_2, %c0_3] : memref<1x128xf32, #tpu.memory_space<vmem>>, vector<1x128xf32>
    %c0_4 = arith.constant 0 : index
    %c0_5 = arith.constant 0 : index
    %3 = vector.load %arg3[%c0_4, %c0_5] : memref<1x128xf32, #tpu.memory_space<vmem>>, vector<1x128xf32>
    %cst = arith.constant dense<0.000000e+00> : vector<64xf32>
    %4 = vector.multi_reduction <add>, %1, %cst [1] : vector<64x128xf32> to vector<64xf32>
    %5 = vector.shape_cast %4 : vector<64xf32> to vector<64x1xf32>
    %cst_6 = arith.constant 1.280000e+02 : f32
    %6 = vector.broadcast %cst_6 : f32 to vector<64x1xf32>
    %7 = arith.divf %5, %6 : vector<64x1xf32>
    %8 = vector.broadcast %7 : vector<64x1xf32> to vector<64x128xf32>
    %9 = arith.subf %1, %8 : vector<64x128xf32>
    %10 = arith.mulf %9, %9 : vector<64x128xf32>
    %cst_7 = arith.constant dense<0.000000e+00> : vector<64xf32>
    %11 = vector.multi_reduction <add>, %10, %cst_7 [1] : vector<64x128xf32> to vector<64xf32>
    %12 = vector.shape_cast %11 : vector<64xf32> to vector<64x1xf32>
    %cst_8 = arith.constant 1.280000e+02 : f32
    %13 = vector.broadcast %cst_8 : f32 to vector<64x1xf32>
    %14 = arith.divf %12, %13 : vector<64x1xf32>
    %15 = vector.broadcast %7 : vector<64x1xf32> to vector<64x128xf32>
    %16 = arith.subf %1, %15 : vector<64x128xf32>
    %cst_9 = arith.constant 9.99999974E-6 : f32
    %17 = vector.broadcast %cst_9 : f32 to vector<64x1xf32>
    %18 = arith.addf %14, %17 : vector<64x1xf32>
    %19 = math.rsqrt %18 : vector<64x1xf32>
    %20 = vector.broadcast %19 : vector<64x1xf32> to vector<64x128xf32>
    %21 = arith.mulf %16, %20 : vector<64x128xf32>
    %22 = vector.broadcast %2 : vector<1x128xf32> to vector<64x128xf32>
    %23 = arith.mulf %21, %22 : vector<64x128xf32>
    %24 = vector.broadcast %3 : vector<1x128xf32> to vector<64x128xf32>
    %25 = arith.addf %23, %24 : vector<64x128xf32>
    %26 = arith.truncf %25 : vector<64x128xf32> to vector<64x128xbf16>
    %c0_10 = arith.constant 0 : index
    %c0_11 = arith.constant 0 : index
    %27 = vector.load %arg4[%c0_10, %c0_11] : memref<128x384xbf16, #tpu.memory_space<vmem>>, vector<128x384xbf16>
    %cst_12 = arith.constant dense<0.000000e+00> : vector<64x384xf32>
    %28 = tpu.matmul %26, %27, %cst_12 {dimension_numbers = #tpu.dot_dimension_numbers<[1], [0], [0], [1], [0, 0, 1, 1], [], []>} : vector<64x128xbf16>, vector<128x384xbf16>, vector<64x384xf32> -> vector<64x384xf32>
    %c0_13 = arith.constant 0 : index
    %c0_14 = arith.constant 0 : index
    %29 = vector.load %arg5[%c0_13, %c0_14] : memref<1x384xf32, #tpu.memory_space<vmem>>, vector<1x384xf32>
    %30 = vector.broadcast %29 : vector<1x384xf32> to vector<64x384xf32>
    %31 = arith.addf %28, %30 : vector<64x384xf32>
    %32 = arith.truncf %31 : vector<64x384xf32> to vector<64x384xbf16>
    %33 = vector.extract_strided_slice %32 {offsets = [0, 0], sizes = [64, 128], strides = [1, 1]} : vector<64x384xbf16> to vector<64x128xbf16>
    %34 = vector.shape_cast %33 : vector<64x128xbf16> to vector<2x32x128xbf16>
    %35 = vector.extract_strided_slice %34 {offsets = [0, 0, 0], sizes = [2, 32, 32], strides = [1, 1, 1]} : vector<2x32x128xbf16> to vector<2x32x32xbf16>
    %36 = vector.extract_strided_slice %34 {offsets = [0, 0, 32], sizes = [2, 32, 32], strides = [1, 1, 1]} : vector<2x32x128xbf16> to vector<2x32x32xbf16>
    %37 = vector.extract_strided_slice %34 {offsets = [0, 0, 64], sizes = [2, 32, 32], strides = [1, 1, 1]} : vector<2x32x128xbf16> to vector<2x32x32xbf16>
    %38 = vector.extract_strided_slice %34 {offsets = [0, 0, 96], sizes = [2, 32, 32], strides = [1, 1, 1]} : vector<2x32x128xbf16> to vector<2x32x32xbf16>
    %39 = vector.shape_cast %35 : vector<2x32x32xbf16> to vector<1x2x32x32xbf16>
    %40 = vector.shape_cast %36 : vector<2x32x32xbf16> to vector<1x2x32x32xbf16>
    %41 = vector.shape_cast %37 : vector<2x32x32xbf16> to vector<1x2x32x32xbf16>
    %42 = vector.shape_cast %38 : vector<2x32x32xbf16> to vector<1x2x32x32xbf16>
    %43 = tpu.concatenate %39, %40, %41, %42 in 0 : vector<1x2x32x32xbf16>, vector<1x2x32x32xbf16>, vector<1x2x32x32xbf16>, vector<1x2x32x32xbf16> -> vector<4x2x32x32xbf16>
    %44 = vector.shape_cast %43 : vector<4x2x32x32xbf16> to vector<8x32x32xbf16>
    %45 = vector.extract_strided_slice %32 {offsets = [0, 128], sizes = [64, 128], strides = [1, 1]} : vector<64x384xbf16> to vector<64x128xbf16>
    %46 = vector.shape_cast %45 : vector<64x128xbf16> to vector<2x32x128xbf16>
    %47 = vector.extract_strided_slice %46 {offsets = [0, 0, 0], sizes = [2, 32, 32], strides = [1, 1, 1]} : vector<2x32x128xbf16> to vector<2x32x32xbf16>
    %48 = vector.extract_strided_slice %46 {offsets = [0, 0, 32], sizes = [2, 32, 32], strides = [1, 1, 1]} : vector<2x32x128xbf16> to vector<2x32x32xbf16>
    %49 = vector.extract_strided_slice %46 {offsets = [0, 0, 64], sizes = [2, 32, 32], strides = [1, 1, 1]} : vector<2x32x128xbf16> to vector<2x32x32xbf16>
    %50 = vector.extract_strided_slice %46 {offsets = [0, 0, 96], sizes = [2, 32, 32], strides = [1, 1, 1]} : vector<2x32x128xbf16> to vector<2x32x32xbf16>
    %51 = vector.shape_cast %47 : vector<2x32x32xbf16> to vector<1x2x32x32xbf16>
    %52 = vector.shape_cast %48 : vector<2x32x32xbf16> to vector<1x2x32x32xbf16>
    %53 = vector.shape_cast %49 : vector<2x32x32xbf16> to vector<1x2x32x32xbf16>
    %54 = vector.shape_cast %50 : vector<2x32x32xbf16> to vector<1x2x32x32xbf16>
    %55 = tpu.concatenate %51, %52, %53, %54 in 0 : vector<1x2x32x32xbf16>, vector<1x2x32x32xbf16>, vector<1x2x32x32xbf16>, vector<1x2x32x32xbf16> -> vector<4x2x32x32xbf16>
    %56 = vector.shape_cast %55 : vector<4x2x32x32xbf16> to vector<8x32x32xbf16>
    %57 = vector.extract_strided_slice %32 {offsets = [0, 256], sizes = [64, 128], strides = [1, 1]} : vector<64x384xbf16> to vector<64x128xbf16>
    %58 = vector.shape_cast %57 : vector<64x128xbf16> to vector<2x32x128xbf16>
    %59 = vector.extract_strided_slice %58 {offsets = [0, 0, 0], sizes = [2, 32, 32], strides = [1, 1, 1]} : vector<2x32x128xbf16> to vector<2x32x32xbf16>
    %60 = vector.extract_strided_slice %58 {offsets = [0, 0, 32], sizes = [2, 32, 32], strides = [1, 1, 1]} : vector<2x32x128xbf16> to vector<2x32x32xbf16>
    %61 = vector.extract_strided_slice %58 {offsets = [0, 0, 64], sizes = [2, 32, 32], strides = [1, 1, 1]} : vector<2x32x128xbf16> to vector<2x32x32xbf16>
    %62 = vector.extract_strided_slice %58 {offsets = [0, 0, 96], sizes = [2, 32, 32], strides = [1, 1, 1]} : vector<2x32x128xbf16> to vector<2x32x32xbf16>
    %63 = vector.shape_cast %59 : vector<2x32x32xbf16> to vector<1x2x32x32xbf16>
    %64 = vector.shape_cast %60 : vector<2x32x32xbf16> to vector<1x2x32x32xbf16>
    %65 = vector.shape_cast %61 : vector<2x32x32xbf16> to vector<1x2x32x32xbf16>
    %66 = vector.shape_cast %62 : vector<2x32x32xbf16> to vector<1x2x32x32xbf16>
    %67 = tpu.concatenate %63, %64, %65, %66 in 0 : vector<1x2x32x32xbf16>, vector<1x2x32x32xbf16>, vector<1x2x32x32xbf16>, vector<1x2x32x32xbf16> -> vector<4x2x32x32xbf16>
    %68 = vector.shape_cast %67 : vector<4x2x32x32xbf16> to vector<8x32x32xbf16>
    "tpu.trace_start"() <{level = 10 : i32, message = "nqd,nkd->nqk"}> : () -> ()
    %cst_15 = arith.constant dense<0.000000e+00> : vector<8x32x32xf32>
    %69 = tpu.matmul %44, %56, %cst_15 {dimension_numbers = #tpu.dot_dimension_numbers<[2], [2], [1], [1], [0, 0, 0, 1, 1, 1], [0], [0]>} : vector<8x32x32xbf16>, vector<8x32x32xbf16>, vector<8x32x32xf32> -> vector<8x32x32xf32>
    "tpu.trace_stop"() : () -> ()
    %cst_16 = arith.constant dense<0xFF800000> : vector<8x32xf32>
    %70 = vector.multi_reduction <maximumf>, %69, %cst_16 [2] : vector<8x32x32xf32> to vector<8x32xf32>
    %71 = vector.shape_cast %70 : vector<8x32xf32> to vector<8x32x1xf32>
    %72 = vector.broadcast %71 : vector<8x32x1xf32> to vector<8x32x32xf32>
    %73 = arith.subf %69, %72 : vector<8x32x32xf32>
    %74 = math.exp %73 : vector<8x32x32xf32>
    %cst_17 = arith.constant dense<0.000000e+00> : vector<8x32xf32>
    %75 = vector.multi_reduction <add>, %74, %cst_17 [2] : vector<8x32x32xf32> to vector<8x32xf32>
    %76 = vector.shape_cast %75 : vector<8x32xf32> to vector<8x32x1xf32>
    %77 = tpu.reciprocal %76 {approx = true} : vector<8x32x1xf32> -> vector<8x32x1xf32>
    %78 = vector.broadcast %77 : vector<8x32x1xf32> to vector<8x32x32xf32>
    %79 = arith.mulf %74, %78 : vector<8x32x32xf32>
    %80 = arith.truncf %79 : vector<8x32x32xf32> to vector<8x32x32xbf16>
    "tpu.trace_start"() <{level = 10 : i32, message = "nqk,nkd->nqd"}> : () -> ()
    %cst_18 = arith.constant dense<0.000000e+00> : vector<8x32x32xf32>
    %81 = tpu.matmul %80, %68, %cst_18 {dimension_numbers = #tpu.dot_dimension_numbers<[2], [1], [1], [2], [0, 0, 0, 1, 1, 2], [0], [0]>} : vector<8x32x32xbf16>, vector<8x32x32xbf16>, vector<8x32x32xf32> -> vector<8x32x32xf32>
    "tpu.trace_stop"() : () -> ()
    %82 = arith.truncf %81 : vector<8x32x32xf32> to vector<8x32x32xbf16>
    %c0_19 = arith.constant 0 : index
    %c0_20 = arith.constant 0 : index
    %83 = vector.load %arg6[%c0_19, %c0_20] : memref<128x128xbf16, #tpu.memory_space<vmem>>, vector<128x128xbf16>
    %84 = vector.extract_strided_slice %82 {offsets = [0, 0, 0], sizes = [2, 32, 32], strides = [1, 1, 1]} : vector<8x32x32xbf16> to vector<2x32x32xbf16>
    %85 = vector.shape_cast %84 : vector<2x32x32xbf16> to vector<64x32xbf16>
    %86 = vector.extract_strided_slice %83 {offsets = [0, 0], sizes = [32, 128], strides = [1, 1]} : vector<128x128xbf16> to vector<32x128xbf16>
    %cst_21 = arith.constant dense<0.000000e+00> : vector<64x128xf32>
    %87 = tpu.matmul %85, %86, %cst_21 {dimension_numbers = #tpu.dot_dimension_numbers<[1], [0], [0], [1], [0, 0, 1, 1], [], []>} : vector<64x32xbf16>, vector<32x128xbf16>, vector<64x128xf32> -> vector<64x128xf32>
    %88 = vector.extract_strided_slice %82 {offsets = [2, 0, 0], sizes = [2, 32, 32], strides = [1, 1, 1]} : vector<8x32x32xbf16> to vector<2x32x32xbf16>
    %89 = vector.shape_cast %88 : vector<2x32x32xbf16> to vector<64x32xbf16>
    %90 = vector.extract_strided_slice %83 {offsets = [32, 0], sizes = [32, 128], strides = [1, 1]} : vector<128x128xbf16> to vector<32x128xbf16>
    %cst_22 = arith.constant dense<0.000000e+00> : vector<64x128xf32>
    %91 = tpu.matmul %89, %90, %cst_22 {dimension_numbers = #tpu.dot_dimension_numbers<[1], [0], [0], [1], [0, 0, 1, 1], [], []>} : vector<64x32xbf16>, vector<32x128xbf16>, vector<64x128xf32> -> vector<64x128xf32>
    %92 = arith.addf %87, %91 : vector<64x128xf32>
    %93 = vector.extract_strided_slice %82 {offsets = [4, 0, 0], sizes = [2, 32, 32], strides = [1, 1, 1]} : vector<8x32x32xbf16> to vector<2x32x32xbf16>
    %94 = vector.shape_cast %93 : vector<2x32x32xbf16> to vector<64x32xbf16>
    %95 = vector.extract_strided_slice %83 {offsets = [64, 0], sizes = [32, 128], strides = [1, 1]} : vector<128x128xbf16> to vector<32x128xbf16>
    %cst_23 = arith.constant dense<0.000000e+00> : vector<64x128xf32>
    %96 = tpu.matmul %94, %95, %cst_23 {dimension_numbers = #tpu.dot_dimension_numbers<[1], [0], [0], [1], [0, 0, 1, 1], [], []>} : vector<64x32xbf16>, vector<32x128xbf16>, vector<64x128xf32> -> vector<64x128xf32>
    %97 = arith.addf %92, %96 : vector<64x128xf32>
    %98 = vector.extract_strided_slice %82 {offsets = [6, 0, 0], sizes = [2, 32, 32], strides = [1, 1, 1]} : vector<8x32x32xbf16> to vector<2x32x32xbf16>
    %99 = vector.shape_cast %98 : vector<2x32x32xbf16> to vector<64x32xbf16>
    %100 = vector.extract_strided_slice %83 {offsets = [96, 0], sizes = [32, 128], strides = [1, 1]} : vector<128x128xbf16> to vector<32x128xbf16>
    %cst_24 = arith.constant dense<0.000000e+00> : vector<64x128xf32>
    %101 = tpu.matmul %99, %100, %cst_24 {dimension_numbers = #tpu.dot_dimension_numbers<[1], [0], [0], [1], [0, 0, 1, 1], [], []>} : vector<64x32xbf16>, vector<32x128xbf16>, vector<64x128xf32> -> vector<64x128xf32>
    %102 = arith.addf %97, %101 : vector<64x128xf32>
    %c0_25 = arith.constant 0 : index
    %c0_26 = arith.constant 0 : index
    %103 = vector.load %arg7[%c0_25, %c0_26] : memref<1x128xf32, #tpu.memory_space<vmem>>, vector<1x128xf32>
    %104 = vector.broadcast %103 : vector<1x128xf32> to vector<64x128xf32>
    %105 = arith.addf %102, %104 : vector<64x128xf32>
    %106 = arith.addf %1, %105 : vector<64x128xf32>
    %c0_27 = arith.constant 0 : index
    %c0_28 = arith.constant 0 : index
    %107 = vector.load %arg8[%c0_27, %c0_28] : memref<1x128xf32, #tpu.memory_space<vmem>>, vector<1x128xf32>
    %c0_29 = arith.constant 0 : index
    %c0_30 = arith.constant 0 : index
    %108 = vector.load %arg9[%c0_29, %c0_30] : memref<1x128xf32, #tpu.memory_space<vmem>>, vector<1x128xf32>
    %cst_31 = arith.constant dense<0.000000e+00> : vector<64xf32>
    %109 = vector.multi_reduction <add>, %106, %cst_31 [1] : vector<64x128xf32> to vector<64xf32>
    %110 = vector.shape_cast %109 : vector<64xf32> to vector<64x1xf32>
    %cst_32 = arith.constant 1.280000e+02 : f32
    %111 = vector.broadcast %cst_32 : f32 to vector<64x1xf32>
    %112 = arith.divf %110, %111 : vector<64x1xf32>
    %113 = vector.broadcast %112 : vector<64x1xf32> to vector<64x128xf32>
    %114 = arith.subf %106, %113 : vector<64x128xf32>
    %115 = arith.mulf %114, %114 : vector<64x128xf32>
    %cst_33 = arith.constant dense<0.000000e+00> : vector<64xf32>
    %116 = vector.multi_reduction <add>, %115, %cst_33 [1] : vector<64x128xf32> to vector<64xf32>
    %117 = vector.shape_cast %116 : vector<64xf32> to vector<64x1xf32>
    %cst_34 = arith.constant 1.280000e+02 : f32
    %118 = vector.broadcast %cst_34 : f32 to vector<64x1xf32>
    %119 = arith.divf %117, %118 : vector<64x1xf32>
    %120 = vector.broadcast %112 : vector<64x1xf32> to vector<64x128xf32>
    %121 = arith.subf %106, %120 : vector<64x128xf32>
    %cst_35 = arith.constant 9.99999974E-6 : f32
    %122 = vector.broadcast %cst_35 : f32 to vector<64x1xf32>
    %123 = arith.addf %119, %122 : vector<64x1xf32>
    %124 = math.rsqrt %123 : vector<64x1xf32>
    %125 = vector.broadcast %124 : vector<64x1xf32> to vector<64x128xf32>
    %126 = arith.mulf %121, %125 : vector<64x128xf32>
    %127 = vector.broadcast %107 : vector<1x128xf32> to vector<64x128xf32>
    %128 = arith.mulf %126, %127 : vector<64x128xf32>
    %129 = vector.broadcast %108 : vector<1x128xf32> to vector<64x128xf32>
    %130 = arith.addf %128, %129 : vector<64x128xf32>
    %131 = arith.truncf %130 : vector<64x128xf32> to vector<64x128xbf16>
    %c0_36 = arith.constant 0 : index
    %c0_37 = arith.constant 0 : index
    %132 = vector.load %arg10[%c0_36, %c0_37] : memref<128x256xbf16, #tpu.memory_space<vmem>>, vector<128x256xbf16>
    %cst_38 = arith.constant dense<0.000000e+00> : vector<64x256xf32>
    %133 = tpu.matmul %131, %132, %cst_38 {dimension_numbers = #tpu.dot_dimension_numbers<[1], [0], [0], [1], [0, 0, 1, 1], [], []>} : vector<64x128xbf16>, vector<128x256xbf16>, vector<64x256xf32> -> vector<64x256xf32>
    %c0_39 = arith.constant 0 : index
    %c0_40 = arith.constant 0 : index
    %134 = vector.load %arg11[%c0_39, %c0_40] : memref<1x256xf32, #tpu.memory_space<vmem>>, vector<1x256xf32>
    %135 = vector.broadcast %134 : vector<1x256xf32> to vector<64x256xf32>
    %136 = arith.addf %133, %135 : vector<64x256xf32>
    %cst_41 = arith.constant 5.000000e-01 : f32
    %137 = vector.broadcast %cst_41 : f32 to vector<64x256xf32>
    %138 = arith.mulf %137, %136 : vector<64x256xf32>
    %cst_42 = arith.constant 0.707106769 : f32
    %139 = vector.broadcast %cst_42 : f32 to vector<64x256xf32>
    %140 = arith.mulf %136, %139 : vector<64x256xf32>
    %141 = math.erf %140 : vector<64x256xf32>
    %cst_43 = arith.constant 1.000000e+00 : f32
    %142 = vector.broadcast %cst_43 : f32 to vector<64x256xf32>
    %143 = arith.addf %142, %141 : vector<64x256xf32>
    %144 = arith.mulf %138, %143 : vector<64x256xf32>
    %145 = arith.truncf %144 : vector<64x256xf32> to vector<64x256xbf16>
    %c0_44 = arith.constant 0 : index
    %c0_45 = arith.constant 0 : index
    %146 = vector.load %arg12[%c0_44, %c0_45] : memref<256x128xbf16, #tpu.memory_space<vmem>>, vector<256x128xbf16>
    %cst_46 = arith.constant dense<0.000000e+00> : vector<64x128xf32>
    %147 = tpu.matmul %145, %146, %cst_46 {dimension_numbers = #tpu.dot_dimension_numbers<[1], [0], [0], [1], [0, 0, 1, 1], [], []>} : vector<64x256xbf16>, vector<256x128xbf16>, vector<64x128xf32> -> vector<64x128xf32>
    %c0_47 = arith.constant 0 : index
    %c0_48 = arith.constant 0 : index
    %148 = vector.load %arg13[%c0_47, %c0_48] : memref<1x128xf32, #tpu.memory_space<vmem>>, vector<1x128xf32>
    %149 = vector.broadcast %148 : vector<1x128xf32> to vector<64x128xf32>
    %150 = arith.addf %147, %149 : vector<64x128xf32>
    %151 = arith.addf %106, %150 : vector<64x128xf32>
    %152 = vector.shape_cast %151 : vector<64x128xf32> to vector<2x32x128xf32>
    %c0_49 = arith.constant 0 : index
    %c0_50 = arith.constant 0 : index
    %c0_51 = arith.constant 0 : index
    %153 = vector.load %arg14[%c0_49, %c0_50, %c0_51] : memref<2x32x128xf32, #tpu.memory_space<vmem>>, vector<2x32x128xf32>
    tpu.vector_store %arg14[%c0_49, %c0_50, %c0_51], %152 {strides = array<i32>} : memref<2x32x128xf32, #tpu.memory_space<vmem>>, vector<2x32x128xf32>,
    return
  }
  func.func @transform_0(%arg0: i32) -> (i32, i32, i32) {
    %c0_i32 = arith.constant 0 : i32
    %c0_i32_0 = arith.constant 0 : i32
    %c0_i32_1 = arith.constant 0 : i32
    return %arg0, %c0_i32, %c0_i32_0 : i32, i32, i32
  }
  func.func @transform_1(%arg0: i32) -> (i32, i32) {
    %c0_i32 = arith.constant 0 : i32
    %c0_i32_0 = arith.constant 0 : i32
    %c0_i32_1 = arith.constant 0 : i32
    return %c0_i32, %c0_i32_0 : i32, i32
  }
  func.func @transform_2(%arg0: i32) -> (i32, i32) {
    %c0_i32 = arith.constant 0 : i32
    %c0_i32_0 = arith.constant 0 : i32
    %c0_i32_1 = arith.constant 0 : i32
    return %c0_i32, %c0_i32_0 : i32, i32
  }
  func.func @transform_3(%arg0: i32) -> (i32, i32) {
    %c0_i32 = arith.constant 0 : i32
    %c0_i32_0 = arith.constant 0 : i32
    %c0_i32_1 = arith.constant 0 : i32
    return %c0_i32, %c0_i32_0 : i32, i32
  }
  func.func @transform_4(%arg0: i32) -> (i32, i32) {
    %c0_i32 = arith.constant 0 : i32
    %c0_i32_0 = arith.constant 0 : i32
    %c0_i32_1 = arith.constant 0 : i32
    return %c0_i32, %c0_i32_0 : i32, i32
  }
  func.func @transform_5(%arg0: i32) -> (i32, i32) {
    %c0_i32 = arith.constant 0 : i32
    %c0_i32_0 = arith.constant 0 : i32
    %c0_i32_1 = arith.constant 0 : i32
    return %c0_i32, %c0_i32_0 : i32, i32
  }
  func.func @transform_6(%arg0: i32) -> (i32, i32) {
    %c0_i32 = arith.constant 0 : i32
    %c0_i32_0 = arith.constant 0 : i32
    %c0_i32_1 = arith.constant 0 : i32
    return %c0_i32, %c0_i32_0 : i32, i32
  }
  func.func @transform_7(%arg0: i32) -> (i32, i32) {
    %c0_i32 = arith.constant 0 : i32
    %c0_i32_0 = arith.constant 0 : i32
    %c0_i32_1 = arith.constant 0 : i32
    return %c0_i32, %c0_i32_0 : i32, i32
  }
  func.func @transform_8(%arg0: i32) -> (i32, i32) {
    %c0_i32 = arith.constant 0 : i32
    %c0_i32_0 = arith.constant 0 : i32
    %c0_i32_1 = arith.constant 0 : i32
    return %c0_i32, %c0_i32_0 : i32, i32
  }
  func.func @transform_9(%arg0: i32) -> (i32, i32) {
    %c0_i32 = arith.constant 0 : i32
    %c0_i32_0 = arith.constant 0 : i32
    %c0_i32_1 = arith.constant 0 : i32
    return %c0_i32, %c0_i32_0 : i32, i32
  }
  func.func @transform_10(%arg0: i32) -> (i32, i32) {
    %c0_i32 = arith.constant 0 : i32
    %c0_i32_0 = arith.constant 0 : i32
    %c0_i32_1 = arith.constant 0 : i32
    return %c0_i32, %c0_i32_0 : i32, i32
  }
  func.func @transform_11(%arg0: i32) -> (i32, i32) {
    %c0_i32 = arith.constant 0 : i32
    %c0_i32_0 = arith.constant 0 : i32
    %c0_i32_1 = arith.constant 0 : i32
    return %c0_i32, %c0_i32_0 : i32, i32
  }
  func.func @transform_12(%arg0: i32) -> (i32, i32) {
    %c0_i32 = arith.constant 0 : i32
    %c0_i32_0 = arith.constant 0 : i32
    %c0_i32_1 = arith.constant 0 : i32
    return %c0_i32, %c0_i32_0 : i32, i32
  }
  func.func @transform_13(%arg0: i32) -> (i32, i32, i32) {
    %c0_i32 = arith.constant 0 : i32
    %c0_i32_0 = arith.constant 0 : i32
    %c0_i32_1 = arith.constant 0 : i32
    return %arg0, %c0_i32, %c0_i32_0 : i32, i32, i32
  }
}

</mosaic_0001>

<bundles_post_ra>
// kernel: tpu_custom_call.1
= control target key start
LH: loop header
LB: loop body
LE: loop exit
PB: predicated region body
PF: predicated region fallthrough
CT: control target
= control target key end

     0   :  { %s5774_s0 = inlined_call_operand.hbm [shape: f32[4,32,128], index: 0, kind: input, shape index: {}]   ;;  %s5775_s1 = inlined_call_operand.vmem [shape: f32[1,128], index: 1, kind: input, shape index: {}]   ;;  %s5776_s2 = inlined_call_operand.vmem [shape: f32[1,128], index: 2, kind: input, shape index: {}]   ;;  %s5777_s3 = inlined_call_operand.hbm [shape: bf16[128,384], index: 3, kind: input, shape index: {}]   ;;  %s5778_s4 = inlined_call_operand.vmem [shape: f32[1,384], index: 4, kind: input, shape index: {}]   ;;  %s5779_s5 = inlined_call_operand.hbm [shape: bf16[128,128], index: 5, kind: input, shape index: {}]   ;;  %s5780_s6 = inlined_call_operand.vmem [shape: f32[1,128], index: 6, kind: input, shape index: {}]   ;;  %s5781_s7 = inlined_call_operand.vmem [shape: f32[1,128], index: 7, kind: input, shape index: {}]   ;;  %s5782_s8 = inlined_call_operand.vmem [shape: f32[1,128], index: 8, kind: input, shape index: {}]   ;;  %s5783_s9 = inlined_call_operand.hbm [shape: bf16[128,256], index: 9, kind: input, shape index: {}]   ;;  %s5784_s10 = inlined_call_operand.vmem [shape: f32[1,256], index: 10, kind: input, shape index: {}]   ;;  %s5785_s11 = inlined_call_operand.hbm [shape: bf16[256,128], index: 11, kind: input, shape index: {}]   ;;  %s5786_s12 = inlined_call_operand.vmem [shape: f32[1,128], index: 12, kind: input, shape index: {}]   ;;  %s5787_s13 = inlined_call_operand.hbm [shape: f32[4,32,128], index: 13, kind: output, shape index: {}]  }
   0x1   :  { %5796 = sst [smem:[#allocation18_spill]] %s5777_s3 }
   0x2   :  { %5797 = sst [smem:[#allocation19_spill]] %s5782_s8 }
   0x3   :  { %5798 = sst [smem:[#allocation20_spill]] %s5784_s10 }
   0x4   :  { %5799 = sst [smem:[#allocation21_spill]] %s5786_s12 }
   0x5   :  { %5800 = sst [smem:[#allocation22_spill]] %s5787_s13 }
   0x6   :  { %18 = vsyncpa [#allocation3], 0 }
   0x7   :  { %20 = vsyncpa [#allocation3 + $0x1], 0 }
   0x8   :  { %21 = vsyncpa [#allocation6], 0 }
   0x9   :  { %22 = vsyncpa [#allocation9], 0 }
   0xa   :  { %23 = vsyncpa [#allocation4], 0 }
   0xb   :  { %25 = vsyncpa [#allocation4 + $0x1], 0  ;;  %s4743_s25 = smov 0   ;;  %s4745_s26 = smov 0  }
   0xc   :  { %s4747_s27 = smov 0   ;;  %s4749_s28 = smov 0  }
   0xd LB: > { %5801 = sst [smem:[#allocation16_spill]] %s4641_s25  ;;  %s4764_s29 = sadd.s32 4294967295, %s4653_s28   ;;  %s4653_s28 = sphi %s4749_s28, %s5831_s28   ;;  %s4649_s27 = sphi %s4747_s27, %s5830_s27   ;;  %s4645_s26 = sphi %s4745_s26, %s5829_s26   ;;  %s4641_s25 = sphi %s4743_s25, %s5828_s25  }
   0xe   : > { %s3532_s30 = sadd.s32 4294967294, %s4653_s28   ;;  %p51_p0 = scmp.ne.s32.totalorder %s4645_s26, %s4641_s25 }
   0xf   : > { %p5790_p1 = scmp.eq.s32.totalorder %s4764_s29, 0  ;;  %p333_p3 = scmp.eq.s32.totalorder %s3532_s30, 1 }
  0x10   : > { %p3533_p5 = scmp.ge.s32.totalorder %s4653_s28, 1  ;;  %p340_p7 = scmp.lt.s32.totalorder %s4653_s28, 3 }
  0x11   : > { %p4773_p4 = por %p5790_p1, %p51_p0  ;;  %p4778_p6 = por %p333_p3, %p51_p0 }
  0x12   : > { %p4783_p8 = pnand %p3533_p5, %p340_p7  ;;  %s4655_s17 = smov [#allocation5]  }
  0x13   : > { %s5802_s14 = scalar_select %p4773_p4, 1, 0 }
  0x14   : > { %s5803_s15 = scalar_select %p4778_p6, 1, 0 }
  0x15   : > { %s5805_s16 = scalar_select %p4783_p8, 1, 0 }
  0x16   : > { %5804 = sst [smem:[#allocation17_spill]] %s5803_s15  ;;  %s358_s18 = sshll.u32 %s4655_s17, 4  ;;  %s4787_s18 = int_to_ptr.vmem [resolvable:$true] %s358_s18 }
  0x17   : > { %p4078_p9 = pneg %p4783_p8  ;;  %s4656_s20 = smov [#allocation8]  }
  0x18   : > { %s396_s21 = sshll.u32 %s4656_s20, 4  ;;  %s5807_s3 = sld [smem:[#allocation18_spill]]  ;;  %s4798_s21 = int_to_ptr.vmem [resolvable:$true] %s396_s21 }
  0x19   : > { %p4794_p11 = pnand %p4078_p9, %p5790_p1 }
  0x1b   : > { %p4808_p13 = pneg %p4794_p11 }
  0x1e   : > { %s4437_s24 = scalar_lea.hbm %s5807_s3, 3072 }
  0x1f   : > { %p4438_p12 = scmp.ne.s32.totalorder %s5807_s3, %s4437_s24  ;;  %p4444_p5 = scmp.lt.u32.totalorder %s4437_s24, %s5807_s3 }
  0x21   : > { %p4440_p0 = pnand %p4808_p13, %p4438_p12 }
  0x23   : > { %p4441_p3 = pneg %p4440_p0 }
  0x25   : > { %p4446_p7 = pnand %p4444_p5, %p4441_p3 }
  0x27   : > { %4449 = shalt.err (!%p4446_p7)
}
  0x28   : > { %s4450_s22 = scalar_lea.vmem %s4787_s18, 3072  ;;  %p4458_p2 = scmp.lt.s32.totalorder %s4787_s18, %s4787_s18 }
  0x29   : > { %p4451_p9 = scmp.ne.s32.totalorder %s4787_s18, %s4450_s22  ;;  %p4459_p6 = scmp.lt.s32.totalorder %s4450_s22, %s4450_s22 }
  0x2b   : > { %p4453_p10 = pnand %p4451_p9, %p4808_p13  ;;  %p4460_p12 = por %p4459_p6, %p4458_p2 }
  0x2d   : > { %p4454_p1 = pneg %p4453_p10 }
  0x2f   : > { %p4461_p0 = pnand %p4460_p12, %p4454_p1 }
  0x31   : > { %4464 = shalt.err (!%p4461_p0)
}
  0x32   : > { %s4657_s23 = smov 192   ;;  %s4658_s25 = smov 12  }
  0x33   : > { %4081 = dma.hbm_to_vmem [thread:$0]  (!%p4794_p11), %s5807_s3, 3072, %s4787_s18, [#allocation6], %s4657_s23, %s4657_s23, %s4658_s25  }
  0x34   : > { %s4465_s13 = scalar_lea.hbm %s5783_s9, 2048 }
  0x35   : > { %p4466_p2 = scmp.ne.s32.totalorder %s5783_s9, %s4465_s13  ;;  %p4472_p10 = scmp.lt.u32.totalorder %s4465_s13, %s5783_s9 }
  0x37   : > { %p4468_p1 = pnand %p4466_p2, %p4808_p13 }
  0x39   : > { %p4469_p6 = pneg %p4468_p1 }
  0x3b   : > { %p4474_p3 = pnand %p4472_p10, %p4469_p6 }
  0x3d   : > { %4477 = shalt.err (!%p4474_p3)
}
  0x3e   : > { %s4478_s18 = scalar_lea.vmem %s4798_s21, 2048  ;;  %p4486_p12 = scmp.lt.s32.totalorder %s4798_s21, %s4798_s21 }
  0x3f   : > { %p4479_p5 = scmp.ne.s32.totalorder %s4798_s21, %s4478_s18  ;;  %p4487_p0 = scmp.lt.s32.totalorder %s4478_s18, %s4478_s18 }
  0x41   : > { %p4481_p7 = pnand %p4479_p5, %p4808_p13  ;;  %p4488_p2 = por %p4487_p0, %p4486_p12 }
  0x43   : > { %p4482_p9 = pneg %p4481_p7 }
  0x45   : > { %p4489_p1 = pnand %p4488_p2, %p4482_p9 }
  0x47   : > { %4492 = shalt.err (!%p4489_p1)
}
  0x48   : > { %s5794_s10 = smov 128   ;;  %s5795_s8 = smov 8  }
  0x49   : > { %4087 = dma.hbm_to_vmem [thread:$0]  (!%p4794_p11), %s5783_s9, 2048, %s4798_s21, [#allocation9], %s5794_s10, %s5794_s10, %s5795_s8  }
  0x4a   : > { %s4661_s23 = smov [#allocation7]   ;;  %s4493_s17 = scalar_lea.hbm %s5779_s5, 1024 }
  0x4b   : > { %s374_s25 = sshll.u32 %s4661_s23, 4  ;;  %p4494_p6 = scmp.ne.s32.totalorder %s5779_s5, %s4493_s17  ;;  %s375_s25 = int_to_ptr.vmem [resolvable:$true] %s374_s25 }
  0x4c   : > { %p4500_p5 = scmp.lt.u32.totalorder %s4493_s17, %s5779_s5 }
  0x4d   : > { %p4496_p10 = pnand %p4494_p6, %p4808_p13 }
  0x4f   : > { %p4497_p3 = pneg %p4496_p10 }
  0x51   : > { %p4502_p7 = pnand %p4500_p5, %p4497_p3 }
  0x53   : > { %4505 = shalt.err (!%p4502_p7)
}
  0x54   : > { %s4506_s21 = scalar_lea.vmem %s375_s25, 1024  ;;  %p4514_p2 = scmp.lt.s32.totalorder %s375_s25, %s375_s25 }
  0x55   : > { %p4507_p9 = scmp.ne.s32.totalorder %s375_s25, %s4506_s21  ;;  %p4515_p1 = scmp.lt.s32.totalorder %s4506_s21, %s4506_s21 }
  0x57   : > { %p4509_p12 = pnand %p4507_p9, %p4808_p13  ;;  %p4516_p4 = por %p4515_p1, %p4514_p2 }
  0x59   : > { %p4510_p0 = pneg %p4509_p12 }
  0x5b   : > { %p4517_p8 = pnand %p4516_p4, %p4510_p0 }
  0x5d   : > { %4520 = shalt.err (!%p4517_p8)
}
  0x5e   : > { %s4662_s12 = smov 64   ;;  %s4663_s13 = smov 4  }
  0x5f   : > { %4084 = dma.hbm_to_vmem [thread:$0]  (!%p4794_p11), %s5779_s5, 1024, %s375_s25, [#allocation6], %s4662_s12, %s4662_s12, %s4663_s13  }
  0x60   : > { %s4664_s24 = smov [#allocation10]   ;;  %s4521_s22 = scalar_lea.hbm %s5785_s11, 2048 }
  0x61   : > { %s412_s30 = sshll.u32 %s4664_s24, 4  ;;  %p4522_p4 = scmp.ne.s32.totalorder %s5785_s11, %s4521_s22  ;;  %s413_s30 = int_to_ptr.vmem [resolvable:$true] %s412_s30 }
  0x62   : > { %p4528_p10 = scmp.lt.u32.totalorder %s4521_s22, %s5785_s11 }
  0x63   : > { %p4524_p8 = pnand %p4522_p4, %p4808_p13 }
  0x65   : > { %p4525_p6 = pneg %p4524_p8 }
  0x67   : > { %p4530_p3 = pnand %p4528_p10, %p4525_p6 }
  0x69   : > { %4533 = shalt.err (!%p4530_p3)
}
  0x6a   : > { %s4534_s25 = scalar_lea.vmem %s413_s30, 2048  ;;  %p4542_p12 = scmp.lt.s32.totalorder %s413_s30, %s413_s30 }
  0x6b   : > { %p4535_p5 = scmp.ne.s32.totalorder %s413_s30, %s4534_s25  ;;  %p4543_p0 = scmp.lt.s32.totalorder %s4534_s25, %s4534_s25 }
  0x6d   : > { %p4537_p7 = pnand %p4535_p5, %p4808_p13  ;;  %p4544_p2 = por %p4543_p0, %p4542_p12 }
  0x6f   : > { %p4538_p9 = pneg %p4537_p7 }
  0x71   : > { %p4545_p1 = pnand %p4544_p2, %p4538_p9 }
  0x73   : > { %4548 = shalt.err (!%p4545_p1)
}
  0x74   : > { %4090 = dma.hbm_to_vmem [thread:$0]  (!%p4794_p11), %s5785_s11, 2048, %s413_s30, [#allocation9], %s4662_s12, %s4662_s12, %s4663_s13  }
  0x75   : > { %s4892_s15 = sadd.s32 1, %s4653_s28   ;;  %s38_s10 = sadd.s32 1, %s4649_s27 }
  0x76   : > { %s35_s19 = ssub.s32 %s4653_s28, %s4892_s15  ;;  %p45_p13 = scmp.ne.s32.totalorder %s4649_s27, %s4645_s26 }
  0x77   : > { %p36_p4 = scmp.eq.s32.totalorder %s35_s19, 0  ;;  %p46_p8 = scmp.eq.s32.totalorder %s4653_s28, 0 }
  0x78   : > { %p5809_p6 = scmp.eq.s32.totalorder %s4764_s29, 1  ;;  %p4103_p3 = scmp.lt.s32.totalorder %s4653_s28, 2 }
  0x79   : > { %s4908_s24 = scalar_select %p36_p4, %s4649_s27, %s38_s10  }
  0x7a   : > { %p4902_p10 = por %p5809_p6, %p45_p13  ;;  %p47_p5 = por %p46_p8, %p45_p13 }
  0x7b   : > { %s429_s17 = sand.u32 1, %s4649_s27   ;;  %s3675_s12 = sshll.u32 %s4653_s28, 10 }
  0x7c   : > { %s3539_s20 = sshll.u32 %s429_s17, 6  ;;  %s4915_s22 = scalar_lea.hbm %s5774_s0, %s3675_s12 }
  0x7d   : > { %s433_s18 = scalar_lea.vmem [#allocation2], %s3539_s20  ;;  %p4919_p11 = pnand %p4103_p3, %p47_p5 }
  0x7e   : > { %s441_s21 = sshll.u32 %s433_s18, 4  ;;  %s4923_s3 = scalar_lea.sflag [#allocation3], %s429_s17  ;;  %s4917_s21 = int_to_ptr.vmem [resolvable:$true] %s441_s21 }
  0x7f   : > { %s4549_s23 = scalar_lea.hbm %s4915_s22, 1024  ;;  %p4551_p9 = pneg %p4919_p11 }
  0x80   : > { %p4550_p7 = scmp.ne.s32.totalorder %s4915_s22, %s4549_s23  ;;  %s4554_s20 = scalar_lea.hbm %s5774_s0, 2048 }
  0x81   : > { %p4555_p2 = scmp.lt.u32.totalorder %s4915_s22, %s5774_s0  ;;  %p4556_p1 = scmp.lt.u32.totalorder %s4554_s20, %s4549_s23 }
  0x82   : > { %p4552_p12 = pnand %p4551_p9, %p4550_p7  ;;  %p4558_p4 = scmp.lt.u32.totalorder %s4549_s23, %s4915_s22 }
  0x83   : > { %p4557_p13 = por %p4556_p1, %p4555_p2 }
  0x84   : > { %p4553_p0 = pneg %p4552_p12 }
  0x85   : > { %p4559_p8 = por %p4558_p4, %p4557_p13 }
  0x87   : > { %p4560_p6 = pnand %p4559_p8, %p4553_p0 }
  0x89   : > { %4563 = shalt.err (!%p4560_p6)
}
  0x8a   : > { %s4564_s17 = scalar_lea.vmem %s4917_s21, 1024  ;;  %s4665_s30 = smov [#allocation2]  }
  0x8b   : > { %p4565_p3 = scmp.ne.s32.totalorder %s4917_s21, %s4564_s17  ;;  %s4569_s18 = sshll.u32 %s4665_s30, 4  ;;  %s4570_s18 = int_to_ptr.vmem [resolvable:$false] %s4569_s18 }
  0x8c   : > { %s4571_s10 = scalar_lea.vmem %s4570_s18, 2048  ;;  %p4572_p12 = scmp.lt.s32.totalorder %s4917_s21, %s4570_s18 }
  0x8d   : > { %p4567_p5 = pnand %p4565_p3, %p4551_p9  ;;  %p4573_p2 = scmp.lt.s32.totalorder %s4571_s10, %s4564_s17 }
  0x8f   : > { %p4568_p7 = pneg %p4567_p5  ;;  %p4574_p1 = por %p4573_p2, %p4572_p12 }
  0x91   : > { %p4575_p13 = pnand %p4574_p1, %p4568_p7 }
  0x93   : > { %4578 = shalt.err (!%p4575_p13)
}
  0x94   : > { %s5812_s23 = smov 8   ;;  %s5813_s19 = smov 128  }
  0x95   : > { %4094 = dma.hbm_to_vmem [thread:$0]  (!%p4919_p11), %s4915_s22, 1024, %s4917_s21, %s4923_s3, %s5813_s19, %s5813_s19, %s5812_s23  }
  0x96   : > { %p5814_p9 = scmp.ne.s32.totalorder %s5805_s16, 0 }
  0x97   : > { %s4957_s20 = sand.u32 (!%p5814_p9), 1, %s4645_s26   ;;  %p5815_p0 = scmp.ne.s32.totalorder (!%p5814_p9), %s5802_s14, 0 }
  0x98   : > { %453 = sbr.rel (%p5814_p9) target bundleno = 2682 (0xa7a), region = 72  ;;  %s3544_s12 = sshll.u32 (!%p5814_p9), %s4957_s20, 6 }
  0x99   : > { %s456_s13 = scalar_lea.sflag (!%p5814_p9), [#allocation3], %s4957_s20  ;;  %s4963_s25 = scalar_lea.vmem (!%p5814_p9), [#allocation2], %s3544_s12 }
  0x9f   : > { %4624 = dma.done.wait (%p5815_p0), %s456_s13, 1024  }
  0xa0   : > { %4626 = vsyncadd (%p5815_p0), %s456_s13, 4294966272  ;;  %p5816_p11 = scmp.eq.s32.totalorder %s4764_s29, 0 }
  0xa2   : > { %4628 = dma.done.wait (%p5816_p11), [#allocation6], 4096   ;;  %p5817_p4 = pmov %p5816_p11 }
  0xa4   : > { %4630 = vsyncadd (%p5817_p4), [#allocation6], 4294963200  ;;  %p5818_p8 = pmov %p5817_p4 }
  0xa5   : > { %p5819_p6 = pmov %p5817_p4 }
  0xa6   : > { %4632 = dma.done.wait (%p5818_p8), [#allocation9], 4096  }
  0xa7   : > { %4634 = vsyncadd (%p5819_p6), [#allocation9], 4294963200  ;;  %v521_v0 = vld [vmem:[%s4963_s25] sm:$0xff]  ;;  %v523_v1 = vld [vmem:[%s4963_s25 + $0x10] sm:$0xff]  ;;  %v4666_v56 = vmov 0   ;;  %vm1075_vm0 = vcmask 261120  }
  0xa8   : > { %531 = vadd.xlane.f32.xlu0 %v521_v0  ;;  %535 = vadd.xlane.f32.xlu1 %v523_v1  ;;  %v522_v2 = vld [vmem:[%s4963_s25 + $0x8] sm:$0xff]  ;;  %v524_v3 = vld [vmem:[%s4963_s25 + $0x18] sm:$0xff]  ;;  %v525_v4 = vld [vmem:[%s4963_s25 + $0x20] sm:$0xff]  ;;  %s4667_s30 = smov 96   ;;  %s4668_s18 = smov 64  }
  0xa9   : > { %v526_v5 = vld [vmem:[%s4963_s25 + $0x28] sm:$0xff]  ;;  %v527_v6 = vld [vmem:[%s4963_s25 + $0x30] sm:$0xff]  ;;  %v528_v7 = vld [vmem:[%s4963_s25 + $0x38] sm:$0xff]  ;;  %861 = vmatprep.mubr.bf16.mxu0 %v4666_v56  ;;  %s4669_s10 = smov 32   ;;  %s5820_s22 = sld [smem:[#allocation19_spill]] }
  0xaa   : > { %v4157_v8 = vld [vmem:[#allocation5 + $0x4] ss:$12 sps:$4 sm:$0xff]   ;;  %v4159_v9 = vld [vmem:[#allocation5] ss:$12 sps:$4 sm:$0xff]   ;;  %v4160_v10 = vld [vmem:[#allocation5 + $0x1c] ss:$12 sps:$4 sm:$0xff]  }
  0xab   : > { %829 = vmatprep.subr.bf16.mxu0 %v4157_v8  ;;  %v4162_v43 = vld [vmem:[#allocation5 + $0x18] ss:$12 sps:$4 sm:$0xff]   ;;  %v4163_v44 = vld [vmem:[#allocation5 + $0x34] ss:$12 sps:$4 sm:$0xff]   ;;  %v4165_v45 = vld [vmem:[#allocation5 + $0x30] ss:$12 sps:$4 sm:$0xff]  }
  0xac   : > { %533 = vadd.xlane.f32.xlu0 %v522_v2  ;;  %537 = vadd.xlane.f32.xlu1 %v524_v3  ;;  %v4166_v46 = vld [vmem:[#allocation5 + $0x4c] ss:$12 sps:$4 sm:$0xff]   ;;  %v4168_v47 = vld [vmem:[#allocation5 + $0x48] ss:$12 sps:$4 sm:$0xff]   ;;  %v4169_v48 = vld [vmem:[#allocation5 + $0x64] ss:$12 sps:$4 sm:$0xff]  }
  0xad   : > { %830 = vmatpush1.bf16.msra.mxu0 %v4159_v9  ;;  %v4171_v49 = vld [vmem:[#allocation5 + $0x60] ss:$12 sps:$4 sm:$0xff]   ;;  %v4172_v50 = vld [vmem:[#allocation5 + $0x7c] ss:$12 sps:$4 sm:$0xff]   ;;  %v4174_v51 = vld [vmem:[#allocation5 + $0x78] ss:$12 sps:$4 sm:$0xff]  }
  0xae   : > { %831 = vmatprep.subr.bf16.mxu0 %v4160_v10  ;;  %v4175_v52 = vld [vmem:[#allocation5 + $0x94] ss:$12 sps:$4 sm:$0xff]   ;;  %v4177_v53 = vld [vmem:[#allocation5 + $0x90] ss:$12 sps:$4 sm:$0xff]   ;;  %v4178_v54 = vld [vmem:[#allocation5 + $0xac] ss:$12 sps:$4 sm:$0xff]  }
  0xaf   : > { %v4180_v55 = vld [vmem:[#allocation5 + $0xa8] ss:$12 sps:$4 sm:$0xff]   ;;  %s5821_s17 = sld [smem:[#allocation20_spill]]  ;;  %s5706_s23 = scalar_lea.vmem [#allocation11], %s3544_s12 }
  0xb0   : > { %539 = vadd.xlane.f32.xlu0 %v525_v4  ;;  %541 = vadd.xlane.f32.xlu1 %v526_v5  ;;  %v4181_v57 = vld [vmem:[#allocation5 + $0x8] ss:$12 sps:$4 sm:$0xff]   ;;  %s3677_s12 = sshll.u32 %s4764_s29, 10  ;;  %s3421_s19 = sshll.u32 %s5706_s23, 4  ;;  %s5727_s19 = int_to_ptr.vmem [resolvable:$true] %s3421_s19 }
  0xb1   : > { %832 = vmatpush1.bf16.msra.mxu0 %v4162_v43  ;;  %s5823_s14 = sld [smem:[#allocation22_spill]]  ;;  %s4579_s29 = scalar_lea.vmem %s5727_s19, 1024 }
  0xb2   : > { %833 = vmatprep.subr.bf16.mxu0 %v4163_v44  ;;  %p4580_p3 = scmp.ne.s32.totalorder %s5727_s19, %s4579_s29  ;;  %s4670_s21 = smov [#allocation11]  }
  0xb3   : > { %s4583_s3 = sshll.u32 %s4670_s21, 4  ;;  %s4584_s3 = int_to_ptr.vmem [resolvable:$false] %s4583_s3 }
  0xb4   : > { %543 = vadd.xlane.f32.xlu0 %v527_v6  ;;  %545 = vadd.xlane.f32.xlu1 %v528_v7  ;;  %p4581_p5 = pnand %p4580_p3, %p4902_p10  ;;  %p4586_p12 = scmp.lt.s32.totalorder %s5727_s19, %s4584_s3 }
  0xb5   : > { %834 = vmatpush1.bf16.msra.mxu0 %v4165_v45  ;;  %v4183_v45 = vld [vmem:[#allocation5 + $0x38] ss:$12 sps:$4 sm:$0xff]  }
  0xb6   : > { %835 = vmatprep.subr.bf16.mxu0 %v4166_v46  ;;  %p4582_p7 = pneg %p4581_p5 }
  0xb7   : > { %s5725_s16 = scalar_lea.hbm %s5823_s14, %s3677_s12 }
  0xb9   : > { %836 = vmatpush1.bf16.msra.mxu0 %v4168_v47 }
  0xba   : > { %837 = vmatprep.subr.bf16.mxu0 %v4169_v48  ;;  %v4184_v48 = vld [vmem:[#allocation5 + $0x50] ss:$12 sps:$4 sm:$0xff]  }
  0xbd   : > { %838 = vmatpush1.bf16.msra.mxu0 %v4171_v49 }
  0xbe   : > { %839 = vmatprep.subr.bf16.mxu0 %v4172_v50 }
  0xc1   : > { %840 = vmatpush1.bf16.msra.mxu0 %v4174_v51 }
  0xc2   : > { %841 = vmatprep.subr.bf16.mxu0 %v4175_v52 }
  0xc5   : > { %842 = vmatpush1.bf16.msra.mxu0 %v4177_v53 }
  0xc6   : > { %843 = vmatprep.subr.bf16.mxu0 %v4178_v54  ;;  %v4185_v54 = vld [vmem:[#allocation5 + $0x68] ss:$12 sps:$4 sm:$0xff]  }
  0xc9   : > { %844 = vmatpush1.bf16.msra.mxu0 %v4180_v55 }
  0xca   : > { %3818 = vmatprep.subr.bf16.mxu0 %v4181_v57 }
 0x135   : > { %v532_v11 = vpop.xlane.xlu0 %531  ;;  %v536_v12 = vpop.xlane.xlu1 %535 }
 0x136   : > { %v548_v13 = vmul.f32 0.0078125, %v532_v11  ;;  %v550_v14 = vmul.f32 0.0078125, %v536_v12 }
 0x138   : > { %v4985_v15 = vsub.f32 %v521_v0, %v548_v13  ;;  %v4987_v16 = vsub.f32 %v523_v1, %v550_v14 }
 0x139   : > { %v534_v17 = vpop.xlane.xlu0 %533  ;;  %v538_v18 = vpop.xlane.xlu1 %537 }
 0x13a   : > { %v549_v19 = vmul.f32 0.0078125, %v534_v17  ;;  %v564_v20 = vmul.f32 %v4985_v15, %v4985_v15  ;;  %v551_v21 = vmul.f32 0.0078125, %v538_v18  ;;  %v566_v22 = vmul.f32 %v4987_v16, %v4987_v16 }
 0x13c   : > { %572 = vadd.xlane.f32.xlu0 %v564_v20  ;;  %v4993_v23 = vsub.f32 %v522_v2, %v549_v19  ;;  %v4995_v24 = vsub.f32 %v524_v3, %v551_v21  ;;  %v3550_v19 = vld [vmem:[%s5775_s1] ss:$0 sm:$0xff] }
 0x13d   : > { %v540_v25 = vpop.xlane.xlu0 %539  ;;  %v542_v26 = vpop.xlane.xlu1 %541 }
 0x13e   : > { %v552_v27 = vmul.f32 0.0078125, %v540_v25  ;;  %v565_v28 = vmul.f32 %v4993_v23, %v4993_v23  ;;  %v553_v29 = vmul.f32 0.0078125, %v542_v26  ;;  %v567_v30 = vmul.f32 %v4995_v24, %v4995_v24 }
 0x140   : > { %576 = vadd.xlane.f32.xlu0 %v566_v22  ;;  %574 = vadd.xlane.f32.xlu1 %v565_v28  ;;  %v5001_v31 = vsub.f32 %v525_v4, %v552_v27  ;;  %v5003_v32 = vsub.f32 %v526_v5, %v553_v29  ;;  %v3551_v28 = vld [vmem:[%s5776_s2] ss:$0 sm:$0xff] }
 0x141   : > { %v544_v33 = vpop.xlane.xlu0 %543  ;;  %v546_v34 = vpop.xlane.xlu1 %545 }
 0x142   : > { %v554_v35 = vmul.f32 0.0078125, %v544_v33  ;;  %v568_v36 = vmul.f32 %v5001_v31, %v5001_v31  ;;  %v555_v37 = vmul.f32 0.0078125, %v546_v34  ;;  %v569_v38 = vmul.f32 %v5003_v32, %v5003_v32 }
 0x144   : > { %578 = vadd.xlane.f32.xlu1 %v567_v30  ;;  %580 = vadd.xlane.f32.xlu0 %v568_v36  ;;  %v5009_v39 = vsub.f32 %v527_v6, %v554_v35  ;;  %v5011_v40 = vsub.f32 %v528_v7, %v555_v37 }
 0x146   : > { %v570_v41 = vmul.f32 %v5009_v39, %v5009_v39  ;;  %v571_v42 = vmul.f32 %v5011_v40, %v5011_v40 }
 0x148   : > { %582 = vadd.xlane.f32.xlu1 %v569_v38  ;;  %584 = vadd.xlane.f32.xlu0 %v570_v41  ;;  %v4182_v38 = vld [vmem:[#allocation5 + $0x20] ss:$12 sps:$4 sm:$0xff]  }
 0x14c   : > { %586 = vadd.xlane.f32.xlu1 %v571_v42 }
 0x1c9   : > { %v573_v58 = vpop.xlane.xlu0 %572 }
 0x1ca   : > { %v588_v59 = vmul.f32 0.0078125, %v573_v58  ;;  %v4186_v58 = vld [vmem:[#allocation5 + $0x80] ss:$12 sps:$4 sm:$0xff]  }
 0x1cc   : > { %v596_v60 = vadd.f32 1e-05, %v588_v59 }
 0x1cd   : > { %v575_v61 = vpop.xlane.xlu1 %574  ;;  %v577_v62 = vpop.xlane.xlu0 %576 }
 0x1ce   : > { %4237 = vrsqrt.f32 %v596_v60  ;;  %v589_v63 = vmul.f32 0.0078125, %v575_v61  ;;  %v590_v0 = vmul.f32 0.0078125, %v577_v62  ;;  %v4187_v62 = vld [vmem:[#allocation5 + $0x98] ss:$12 sps:$4 sm:$0xff]  }
 0x1d0   : > { %v597_v1 = vadd.f32 1e-05, %v589_v63  ;;  %v598_v2 = vadd.f32 1e-05, %v590_v0 }
 0x1d1   : > { %v579_v3 = vpop.xlane.xlu1 %578  ;;  %v581_v4 = vpop.xlane.xlu0 %580 }
 0x1d2   : > { %4239 = vrsqrt.f32 %v597_v1  ;;  %v591_v5 = vmul.f32 0.0078125, %v579_v3  ;;  %v592_v7 = vmul.f32 0.0078125, %v581_v4  ;;  %v5041_v3 = vld [vmem:[%s5778_s4] sm:$0x7] }
 0x1d3   : > { %4241 = vrsqrt.f32 %v598_v2 }
 0x1d4   : > { %v599_v6 = vadd.f32 1e-05, %v591_v5  ;;  %v600_v11 = vadd.f32 1e-05, %v592_v7 }
 0x1d5   : > { %v583_v8 = vpop.xlane.xlu1 %582  ;;  %v585_v13 = vpop.xlane.xlu0 %584 }
 0x1d6   : > { %4243 = vrsqrt.f32 %v599_v6  ;;  %v593_v9 = vmul.f32 0.0078125, %v583_v8  ;;  %v594_v21 = vmul.f32 0.0078125, %v585_v13 }
 0x1d8   : > { %v4238_v10 = vpop.eup %4237  ;;  %v601_v12 = vadd.f32 1e-05, %v593_v9  ;;  %v602_v30 = vadd.f32 1e-05, %v594_v21 }
 0x1d9   : > { %v587_v14 = vpop.xlane.xlu1 %586  ;;  %v612_v17 = vmul.f32 %v4238_v10, %v4985_v15 }
 0x1da   : > { %4245 = vrsqrt.f32 %v601_v12  ;;  %v595_v18 = vmul.f32 0.0078125, %v587_v14 }
 0x1db   : > { %4247 = vrsqrt.f32 %v600_v11  ;;  %v626_v25 = vmul.f32 %v3550_v19, %v612_v17 }
 0x1dc   : > { %v4240_v20 = vpop.eup %4239  ;;  %v603_v27 = vadd.f32 1e-05, %v595_v18 }
 0x1dd   : > { %v613_v22 = vmul.f32 %v4240_v20, %v4993_v23  ;;  %v4242_v26 = vpop.eup %4241  ;;  %v640_v33 = vadd.f32 %v3551_v28, %v626_v25 }
 0x1de   : > { %v614_v35 = vmul.f32 %v4242_v26, %v4987_v16  ;;  %4249 = vrsqrt.f32 %v603_v27 }
 0x1df   : > { %v627_v29 = vmul.f32 %v3550_v19, %v613_v22  ;;  %4251 = vrsqrt.f32 %v602_v30 }
 0x1e0   : > { %v4244_v15 = vpop.eup %4243  ;;  %v628_v42 = vmul.f32 %v3550_v19, %v614_v35 }
 0x1e1   : > { %v641_v34 = vadd.f32 %v3551_v28, %v627_v29  ;;  %v615_v36 = vmul.f32 %v4244_v15, %v4995_v24 }
 0x1e2   : > { %v642_v16 = vadd.f32 %v3551_v28, %v628_v42 }
 0x1e3   : > { %v648_v37 = vpack.c.bf16 %v641_v34, %v640_v33  ;;  %v629_v23 = vmul.f32 %v3550_v19, %v615_v36 }
 0x1e4   : > { %v4246_v41 = vpop.eup %4245 }
 0x1e5   : > { %862 = vmatmul.mubr.bf16.vlgmr.msra.gmra.mrb[0].mxu0 %v648_v37  ;;  %v4248_v43 = vpop.eup %4247  ;;  %v643_v44 = vadd.f32 %v3551_v28, %v629_v23  ;;  %v617_v46 = vmul.f32 %v4246_v41, %v5003_v32 }
 0x1e6   : > { %3819 = vmatpush3.bf16.msra.mxu0 %v4181_v57  ;;  %871 = vmatprep.mubr.bf16.mxu0 %v4666_v56  ;;  %v616_v24 = vmul.f32 %v4248_v43, %v5001_v31 }
 0x1e7   : > { %3820 = vmatprep.subr.bf16.mxu0 %v4182_v38  ;;  %v649_v47 = vpack.c.bf16 %v643_v44, %v642_v16  ;;  %v631_v49 = vmul.f32 %v3550_v19, %v617_v46 }
 0x1e8   : > { %v4250_v50 = vpop.eup %4249  ;;  %v630_v51 = vmul.f32 %v3550_v19, %v616_v24 }
 0x1e9   : > { %v4252_v52 = vpop.eup %4251  ;;  %v645_v53 = vadd.f32 %v3551_v28, %v631_v49  ;;  %v619_v32 = vmul.f32 %v4250_v50, %v5011_v40  ;;  %v4188_v40 = vld [vmem:[#allocation5 + $0xb0] ss:$12 sps:$4 sm:$0xff]  }
 0x1ea   : > { %3821 = vmatpush3.bf16.msra.mxu0 %v4182_v38  ;;  %v644_v55 = vadd.f32 %v3551_v28, %v630_v51  ;;  %v618_v31 = vmul.f32 %v4252_v52, %v5009_v39  ;;  %v686_v39 = vlaneseq }
 0x1eb   : > { %3822 = vmatprep.subr.bf16.mxu0 %v4183_v45  ;;  %v633_v59 = vmul.f32 %v3550_v19, %v619_v32 }
 0x1ec   : > { %v650_v57 = vpack.c.bf16 %v645_v53, %v644_v55  ;;  %v632_v60 = vmul.f32 %v3550_v19, %v618_v31  ;;  %v5035_v1 = vshrl.u32 %v686_v39, 7 }
 0x1ed   : > { %872 = vmatmul.mubr.bf16.gmra.mrb[4].mxu0 %v649_v47  ;;  %v647_v61 = vadd.f32 %v3551_v28, %v633_v59 }
 0x1ee   : > { %3823 = vmatpush3.bf16.msra.mxu0 %v4183_v45  ;;  %881 = vmatprep.mubr.bf16.mxu0 %v4666_v56  ;;  %v646_v63 = vadd.f32 %v3551_v28, %v632_v60  ;;  %v688_v2 = vsub.s32 0, %v5035_v1  ;;  %v692_v4 = vsub.s32 1, %v5035_v1  ;;  %v696_v50 = vsub.s32 2, %v5035_v1 }
 0x1ef   : > { %3824 = vmatprep.subr.bf16.mxu0 %v4184_v48 }
 0x1f0   : > { %v651_v0 = vpack.c.bf16 %v647_v61, %v646_v63  ;;  %v689_v5 = vrot.slane %v5041_v3, %v688_v2  ;;  %v693_v7 = vrot.slane %v5041_v3, %v692_v4  ;;  %v697_v32 = vrot.slane %v5041_v3, %v696_v50 }
 0x1f2   : > { %3825 = vmatpush3.bf16.msra.mxu0 %v4184_v48 }
 0x1f3   : > { %3826 = vmatprep.subr.bf16.mxu0 %v4185_v54 }
 0x1f5   : > { %882 = vmatmul.mubr.bf16.gmra.mrb[8].mxu0 %v650_v57 }
 0x1f6   : > { %3827 = vmatpush3.bf16.msra.mxu0 %v4185_v54  ;;  %891 = vmatprep.mubr.bf16.mxu0 %v4666_v56 }
 0x1f7   : > { %3828 = vmatprep.subr.bf16.mxu0 %v4186_v58 }
 0x1fa   : > { %3829 = vmatpush3.bf16.msra.mxu0 %v4186_v58 }
 0x1fb   : > { %3830 = vmatprep.subr.bf16.mxu0 %v4187_v62 }
 0x1fd   : > { %892 = vmatmul.mubr.bf16.gmra.mrb[12].mxu0 %v651_v0 }
 0x1fe   : > { %3831 = vmatpush3.bf16.msra.mxu0 %v4187_v62  ;;  %3834 = vmatprep.mubr.bf16.mxu0 %v648_v37 }
 0x1ff   : > { %3832 = vmatprep.subr.bf16.mxu0 %v4188_v40 }
 0x202   : > { %3833 = vmatpush3.bf16.msra.mxu0 %v4188_v40 }
 0x205   : > { %3835 = vmatmul.mubr.bf16.vlgmr.msra.gmra.mrb[16].mxu0 %v649_v47 }
 0x206   : > { %3838 = vmatprep.mubr.bf16.mxu0 %v650_v57 }
 0x20d   : > { %3839 = vmatmul.mubr.bf16.gmra.mrb[20].mxu0 %v651_v0 }
 0x2b8   : > { %v863_v6 = vpop.f32.mrb[0].mxu0 }
 0x2b9   : > { %v865_v8 = vpop.f32.mrb[1].mxu0  ;;  %v864_v10 = vadd.f32 %v863_v6, %v689_v5 }
 0x2ba   : > { %v867_v9 = vpop.f32.mrb[2].mxu0  ;;  %v866_v13 = vadd.f32 %v865_v8, %v693_v7 }
 0x2bb   : > { %v868_v11 = vadd.f32 %v867_v9, %v689_v5  ;;  %v869_v12 = vpop.f32.mrb[3].mxu0 }
 0x2bc   : > { %v870_v14 = vadd.f32 %v869_v12, %v693_v7 }
 0x2bd   : > { %v5050_v17 = vpack.c.bf16 %v868_v11, %v864_v10 }
 0x2be   : > { %v5052_v18 = vpack.c.bf16 %v870_v14, %v866_v13 }
 0x2bf   : > { %3846 = vmatprep.mubr.msk.bf16.mxu1 %vm1075_vm0, %v5050_v17 }
 0x2c0   : > { %1011 = vrot.lane.b32.xlu0 %v5052_v18, %s4667_s30  ;;  %v873_v19 = vpop.f32.mrb[4].mxu0  ;;  %4042 = vmatprep.subr.msk.bf16.mxu1 %vm1075_vm0, %v5052_v18  ;;  %v1083_v20 = vsel %vm1075_vm0, %v5052_v18, 0 }
 0x2c1   : > { %v875_v21 = vpop.f32.mrb[5].mxu0  ;;  %3843 = vmatpush3.bf16.xpose.msra.mxu1 %v1083_v20  ;;  %v874_v25 = vadd.f32 %v873_v19, %v689_v5 }
 0x2c2   : > { %v877_v22 = vpop.f32.mrb[6].mxu0  ;;  %v876_v28 = vadd.f32 %v875_v21, %v693_v7 }
 0x2c3   : > { %v878_v26 = vadd.f32 %v877_v22, %v689_v5  ;;  %v879_v27 = vpop.f32.mrb[7].mxu0 }
 0x2c4   : > { %v880_v29 = vadd.f32 %v879_v27, %v693_v7 }
 0x2c5   : > { %v5062_v15 = vpack.c.bf16 %v878_v26, %v874_v25 }
 0x2c6   : > { %v5064_v30 = vpack.c.bf16 %v880_v29, %v876_v28 }
 0x2c7   : > { %985 = vrot.lane.b32.xlu0 %v5062_v15, %s4667_s30 }
 0x2c8   : > { %1013 = vrot.lane.b32.xlu1 %v5064_v30, %s4667_s30  ;;  %v883_v33 = vpop.f32.mrb[8].mxu0  ;;  %4043 = vmatprep.subr.msk.bf16.mxu1 %vm1075_vm0, %v5064_v30  ;;  %v1086_v34 = vsel %vm1075_vm0, %v5064_v30, 0 }
 0x2c9   : > { %v885_v35 = vpop.f32.mrb[9].mxu0  ;;  %3845 = vmatpush3.bf16.xpose.msra.mxu1 %v1086_v34  ;;  %v884_v37 = vadd.f32 %v883_v33, %v689_v5 }
 0x2ca   : > { %v887_v36 = vpop.f32.mrb[10].mxu0  ;;  %v886_v41 = vadd.f32 %v885_v35, %v693_v7 }
 0x2cb   : > { %v888_v38 = vadd.f32 %v887_v36, %v689_v5  ;;  %v889_v23 = vpop.f32.mrb[11].mxu0 }
 0x2cc   : > { %v890_v42 = vadd.f32 %v889_v23, %v693_v7 }
 0x2cd   : > { %v5074_v43 = vpack.c.bf16 %v888_v38, %v884_v37 }
 0x2ce   : > { %v974_v44 = vpack.c.bf16 %v890_v42, %v886_v41 }
 0x2cf   : > { %3854 = vmatprep.mubr.msk.bf16.mxu0 %vm1075_vm0, %v5074_v43 }
 0x2d0   : > { %3847 = vmatmul.mubr.msk.bf16.vlgmr.msra.gmra.mrb[0].mxu1 %vm1075_vm0, %v5062_v15  ;;  %1015 = vrot.lane.b32.xlu1 %v974_v44, %s4667_s30  ;;  %v893_v45 = vpop.f32.mrb[12].mxu0  ;;  %v1144_v46 = vsel %vm1075_vm0, %v974_v44, 0 }
 0x2d1   : > { %4044 = vmatprep.subr.msk.bf16.mxu0 %vm1075_vm0, %v974_v44  ;;  %v895_v16 = vpop.f32.mrb[13].mxu0  ;;  %v894_v47 = vadd.f32 %v893_v45, %v689_v5 }
 0x2d2   : > { %3851 = vmatpush3.bf16.xpose.msra.mxu0 %v1144_v46  ;;  %v897_v24 = vpop.f32.mrb[14].mxu0  ;;  %v896_v51 = vadd.f32 %v895_v16, %v693_v7 }
 0x2d3   : > { %v898_v48 = vadd.f32 %v897_v24, %v689_v5  ;;  %v899_v49 = vpop.f32.mrb[15].mxu0 }
 0x2d4   : > { %v900_v52 = vadd.f32 %v899_v49, %v693_v7  ;;  %983 = vrot.lane.b32.xlu1 %v5050_v17, %s4667_s30 }
 0x2d5   : > { %v976_v53 = vpack.c.bf16 %v898_v48, %v894_v47 }
 0x2d6   : > { %v977_v54 = vpack.c.bf16 %v900_v52, %v896_v51 }
 0x2d8   : > { %1019 = vrot.lane.b32.xlu1 %v5052_v18, %s4668_s18  ;;  %v3836_v55 = vpop.f32.mrb[16].mxu0  ;;  %1017 = vrot.lane.b32.xlu0 %v977_v54, %s4667_s30  ;;  %v1147_v31 = vsel %vm1075_vm0, %v977_v54, 0 }
 0x2d9   : > { %4045 = vmatprep.subr.msk.bf16.mxu0 %vm1075_vm0, %v977_v54  ;;  %v936_v57 = vpop.f32.mrb[17].mxu0  ;;  %v945_v59 = vadd.f32 %v3836_v55, %v697_v32 }
 0x2da   : > { %3853 = vmatpush3.bf16.xpose.msra.mxu0 %v1147_v31  ;;  %v3837_v58 = vpop.f32.mrb[18].mxu0  ;;  %v937_v62 = vadd.f32 %v936_v57, %v697_v32 }
 0x2db   : > { %v948_v60 = vadd.f32 %v3837_v58, %v697_v32  ;;  %v939_v61 = vpop.f32.mrb[19].mxu0 }
 0x2dc   : > { %v940_v63 = vadd.f32 %v939_v61, %v697_v32  ;;  %987 = vrot.lane.b32.xlu1 %v5074_v43, %s4667_s30  ;;  %1021 = vrot.lane.b32.xlu0 %v5064_v30, %s4668_s18 }
 0x2dd   : > { %v5096_v0 = vpack.c.bf16 %v948_v60, %v945_v59 }
 0x2de   : > { %v5098_v40 = vpack.c.bf16 %v940_v63, %v937_v62 }
 0x2e0   : > { %1023 = vrot.lane.b32.xlu1 %v974_v44, %s4668_s18  ;;  %v3840_v39 = vpop.f32.mrb[20].mxu0  ;;  %989 = vrot.lane.b32.xlu0 %v976_v53, %s4667_s30 }
 0x2e1   : > { %3855 = vmatmul.mubr.msk.bf16.vlgmr.msra.gmra.mrb[24].mxu0 %vm1075_vm0, %v976_v53  ;;  %v952_v3 = vpop.f32.mrb[21].mxu0  ;;  %v961_v6 = vadd.f32 %v3840_v39, %v697_v32 }
 0x2e2   : > { %v3841_v5 = vpop.f32.mrb[22].mxu0  ;;  %v953_v9 = vadd.f32 %v952_v3, %v697_v32 }
 0x2e3   : > { %v964_v7 = vadd.f32 %v3841_v5, %v697_v32  ;;  %v955_v8 = vpop.f32.mrb[23].mxu0 }
 0x2e4   : > { %v956_v10 = vadd.f32 %v955_v8, %v697_v32  ;;  %991 = vrot.lane.b32.xlu1 %v5050_v17, %s4668_s18  ;;  %993 = vrot.lane.b32.xlu0 %v5062_v15, %s4668_s18 }
 0x2e5   : > { %v5107_v11 = vpack.c.bf16 %v964_v7, %v961_v6 }
 0x2e6   : > { %v5109_v12 = vpack.c.bf16 %v956_v10, %v953_v9 }
 0x2e8   : > { %1025 = vrot.lane.b32.xlu1 %v977_v54, %s4668_s18  ;;  %1027 = vrot.lane.b32.xlu0 %v5052_v18, %s4669_s10 }
 0x2ec   : > { %995 = vrot.lane.b32.xlu1 %v5074_v43, %s4668_s18  ;;  %997 = vrot.lane.b32.xlu0 %v976_v53, %s4668_s18 }
 0x2f0   : > { %1029 = vrot.lane.b32.xlu1 %v5064_v30, %s4669_s10  ;;  %999 = vrot.lane.b32.xlu0 %v5050_v17, %s4669_s10 }
 0x2f4   : > { %1001 = vrot.lane.b32.xlu1 %v5062_v15, %s4669_s10  ;;  %1031 = vrot.lane.b32.xlu0 %v974_v44, %s4669_s10 }
 0x2f8   : > { %1033 = vrot.lane.b32.xlu1 %v977_v54, %s4669_s10  ;;  %1003 = vrot.lane.b32.xlu0 %v5074_v43, %s4669_s10 }
 0x2fc   : > { %1005 = vrot.lane.b32.xlu1 %v976_v53, %s4669_s10  ;;  %1039 = vrot.lane.b32.xlu0 %v5098_v40, %s4667_s30 }
 0x300   : > { %1041 = vrot.lane.b32.xlu1 %v5096_v0, %s4667_s30  ;;  %1051 = vrot.lane.b32.xlu0 %v5098_v40, %s4668_s18 }
 0x304   : > { %1053 = vrot.lane.b32.xlu1 %v5096_v0, %s4668_s18  ;;  %1045 = vrot.lane.b32.xlu0 %v5107_v11, %s4667_s30 }
 0x308   : > { %1043 = vrot.lane.b32.xlu0 %v5109_v12, %s4667_s30 }
 0x332   : > { %v1012_v13 = vpop.permute.xlu0 %1011 }
 0x333   : > { %4046 = vmatprep.subr.msk.bf16.mxu1 %vm1075_vm0, %v1012_v13  ;;  %v1205_v14 = vsel %vm1075_vm0, %v1012_v13, 0 }
 0x334   : > { %3859 = vmatpush3.bf16.xpose.msra.mxu1 %v1205_v14 }
 0x339   : > { %v986_v21 = vpop.permute.xlu0 %985 }
 0x33a   : > { %v1014_v17 = vpop.permute.xlu1 %1013 }
 0x33b   : > { %4047 = vmatprep.subr.msk.bf16.mxu1 %vm1075_vm0, %v1014_v17  ;;  %v1208_v18 = vsel %vm1075_vm0, %v1014_v17, 0 }
 0x33c   : > { %3861 = vmatpush3.bf16.xpose.msra.mxu1 %v1208_v18 }
 0x342   : > { %v1016_v19 = vpop.permute.xlu1 %1015 }
 0x343   : > { %4048 = vmatprep.subr.msk.bf16.mxu0 %vm1075_vm0, %v1016_v19  ;;  %v1266_v20 = vsel %vm1075_vm0, %v1016_v19, 0 }
 0x344   : > { %3867 = vmatpush3.bf16.xpose.msra.mxu0 %v1266_v20 }
 0x346   : > { %v984_v22 = vpop.permute.xlu1 %983 }
 0x347   : > { %3862 = vmatprep.mubr.msk.bf16.mxu1 %vm1075_vm0, %v984_v22 }
 0x348   : > { %3863 = vmatmul.mubr.msk.bf16.vlgmr.msra.gmra.mrb[4].mxu1 %vm1075_vm0, %v986_v21 }
 0x34a   : > { %v1020_v25 = vpop.permute.xlu1 %1019  ;;  %v1018_v26 = vpop.permute.xlu0 %1017 }
 0x34b   : > { %4049 = vmatprep.subr.msk.bf16.mxu0 %vm1075_vm0, %v1018_v26  ;;  %4050 = vmatprep.subr.msk.bf16.mxu1 %vm1075_vm0, %v1020_v25  ;;  %v1269_v27 = vsel %vm1075_vm0, %v1018_v26, 0  ;;  %v1327_v28 = vsel %vm1075_vm0, %v1020_v25, 0 }
 0x34c   : > { %3869 = vmatpush3.bf16.xpose.msra.mxu0 %v1269_v27  ;;  %3875 = vmatpush3.bf16.xpose.msra.mxu1 %v1327_v28 }
 0x34e   : > { %v988_v29 = vpop.permute.xlu1 %987  ;;  %v1022_v15 = vpop.permute.xlu0 %1021 }
 0x34f   : > { %3870 = vmatprep.mubr.msk.bf16.mxu0 %vm1075_vm0, %v988_v29  ;;  %4051 = vmatprep.subr.msk.bf16.mxu1 %vm1075_vm0, %v1022_v15  ;;  %v1330_v34 = vsel %vm1075_vm0, %v1022_v15, 0 }
 0x352   : > { %v1024_v30 = vpop.permute.xlu1 %1023  ;;  %v990_v33 = vpop.permute.xlu0 %989 }
 0x353   : > { %3871 = vmatmul.mubr.msk.bf16.vlgmr.msra.gmra.mrb[28].mxu0 %vm1075_vm0, %v990_v33  ;;  %4052 = vmatprep.subr.msk.bf16.mxu0 %vm1075_vm0, %v1024_v30  ;;  %v1388_v35 = vsel %vm1075_vm0, %v1024_v30, 0 }
 0x354   : > { %3877 = vmatpush3.bf16.xpose.msra.mxu1 %v1330_v34  ;;  %3883 = vmatpush3.bf16.xpose.msra.mxu0 %v1388_v35 }
 0x356   : > { %v992_v36 = vpop.permute.xlu1 %991  ;;  %v994_v37 = vpop.permute.xlu0 %993 }
 0x357   : > { %3878 = vmatprep.mubr.msk.bf16.mxu1 %vm1075_vm0, %v992_v36 }
 0x35a   : > { %v1026_v38 = vpop.permute.xlu1 %1025  ;;  %v1028_v23 = vpop.permute.xlu0 %1027 }
 0x35b   : > { %3879 = vmatmul.mubr.msk.bf16.vlgmr.msra.gmra.mrb[8].mxu1 %vm1075_vm0, %v994_v37  ;;  %4053 = vmatprep.subr.msk.bf16.mxu0 %vm1075_vm0, %v1026_v38  ;;  %v1391_v41 = vsel %vm1075_vm0, %v1026_v38, 0  ;;  %v1449_v42 = vsel %vm1075_vm0, %v1028_v23, 0 }
 0x35c   : > { %4054 = vmatprep.subr.msk.bf16.mxu1 %vm1075_vm0, %v1028_v23  ;;  %3885 = vmatpush3.bf16.xpose.msra.mxu0 %v1391_v41 }
 0x35d   : > { %3891 = vmatpush3.bf16.xpose.msra.mxu1 %v1449_v42 }
 0x35e   : > { %v996_v43 = vpop.permute.xlu1 %995  ;;  %v998_v44 = vpop.permute.xlu0 %997 }
 0x35f   : > { %3886 = vmatprep.mubr.msk.bf16.mxu0 %vm1075_vm0, %v996_v43 }
 0x362   : > { %v1030_v45 = vpop.permute.xlu1 %1029  ;;  %v1000_v46 = vpop.permute.xlu0 %999 }
 0x363   : > { %v1452_v16 = vsel %vm1075_vm0, %v1030_v45, 0  ;;  %3887 = vmatmul.mubr.msk.bf16.vlgmr.msra.gmra.mrb[32].mxu0 %vm1075_vm0, %v998_v44  ;;  %4055 = vmatprep.subr.msk.bf16.mxu1 %vm1075_vm0, %v1030_v45 }
 0x364   : > { %3894 = vmatprep.mubr.msk.bf16.mxu1 %vm1075_vm0, %v1000_v46 }
 0x365   : > { %3893 = vmatpush3.bf16.xpose.msra.mxu1 %v1452_v16 }
 0x366   : > { %3906 = vmatprep.subr.bf16.mxu1 %v5098_v40  ;;  %v1002_v24 = vpop.permute.xlu1 %1001  ;;  %v1032_v47 = vpop.permute.xlu0 %1031 }
 0x367   : > { %v1510_v48 = vsel %vm1075_vm0, %v1032_v47, 0  ;;  %4056 = vmatprep.subr.msk.bf16.mxu0 %vm1075_vm0, %v1032_v47 }
 0x368   : > { %3899 = vmatpush3.bf16.xpose.msra.mxu0 %v1510_v48 }
 0x36a   : > { %v1034_v49 = vpop.permute.xlu1 %1033  ;;  %v1004_v50 = vpop.permute.xlu0 %1003 }
 0x36b   : > { %4057 = vmatprep.subr.msk.bf16.mxu0 %vm1075_vm0, %v1034_v49  ;;  %3902 = vmatprep.mubr.msk.bf16.mxu0 %vm1075_vm0, %v1004_v50  ;;  %v1513_v51 = vsel %vm1075_vm0, %v1034_v49, 0 }
 0x36c   : > { %3895 = vmatmul.mubr.msk.bf16.vlgmr.msra.gmra.mrb[12].mxu1 %vm1075_vm0, %v1002_v24 }
 0x36d   : > { %3907 = vmatpush3.bf16.msra.mxu1 %v5098_v40 }
 0x36e   : > { %3908 = vmatprep.subr.bf16.mxu1 %v5096_v0  ;;  %v1040_v52 = vpop.permute.xlu0 %1039  ;;  %v1006_v53 = vpop.permute.xlu1 %1005 }
 0x370   : > { %3901 = vmatpush3.bf16.xpose.msra.mxu0 %v1513_v51 }
 0x371   : > { %3909 = vmatpush3.bf16.msra.mxu1 %v5096_v0  ;;  %3922 = vmatprep.subr.bf16.mxu0 %v1040_v52 }
 0x372   : > { %3914 = vmatprep.subr.bf16.mxu1 %v5109_v12  ;;  %v1042_v54 = vpop.permute.xlu1 %1041  ;;  %v5181_v32 = vpop.permute.xlu0 %1051 }
 0x376   : > { %v5238_v27 = vpop.permute.xlu0 %1045  ;;  %v5262_v42 = vpop.permute.xlu1 %1053 }
 0x377   : > { %3903 = vmatmul.mubr.msk.bf16.vlgmr.msra.gmra.mrb[36].mxu0 %vm1075_vm0, %v1006_v53 }
 0x378   : > { %3923 = vmatpush3.bf16.msra.mxu0 %v1040_v52 }
 0x379   : > { %3924 = vmatprep.subr.bf16.mxu0 %v1042_v54 }
 0x37a   : > { %v5246_v30 = vpop.permute.xlu0 %1043 }
 0x37c   : > { %3925 = vmatpush3.bf16.msra.mxu0 %v1042_v54 }
 0x37d   : > { %3938 = vmatprep.subr.bf16.mxu0 %v5181_v32 }
 0x3a3   : > { %v5184_v55 = vpop.f32.mrb[0].mxu1 }
 0x3a4   : > { %v5186_v31 = vpop.f32.mrb[1].mxu1  ;;  %v1570_v57 = vsel %vm1075_vm0, %v5184_v55, -inf }
 0x3a5   : > { %v5190_v58 = vpop.f32.mrb[2].mxu1  ;;  %1571 = vmax.xlane.f32.xlu0 %v1570_v57  ;;  %v1564_v61 = vsel %vm1075_vm0, %v5186_v31, -inf }
 0x3a6   : > { %v5192_v59 = vpop.f32.mrb[3].mxu1  ;;  %v1573_v62 = vsel %vm1075_vm0, %v5190_v58, -inf }
 0x3a7   : > { %v1567_v60 = vsel %vm1075_vm0, %v5192_v59, -inf }
 0x3a8   : > { %1568 = vmax.xlane.f32.xlu1 %v1567_v60 }
 0x3a9   : > { %1565 = vmax.xlane.f32.xlu0 %v1564_v61 }
 0x3ad   : > { %1574 = vmax.xlane.f32.xlu0 %v1573_v62 }
 0x3b4   : > { %v5200_v63 = vpop.f32.mrb[24].mxu0 }
 0x3b5   : > { %v5202_v39 = vpop.f32.mrb[25].mxu0  ;;  %v1582_v3 = vsel %vm1075_vm0, %v5200_v63, -inf }
 0x3b6   : > { %1583 = vmax.xlane.f32.xlu0 %v1582_v3  ;;  %v5206_v5 = vpop.f32.mrb[26].mxu0  ;;  %v1576_v8 = vsel %vm1075_vm0, %v5202_v39, -inf }
 0x3b7   : > { %v5208_v6 = vpop.f32.mrb[27].mxu0  ;;  %v1585_v7 = vsel %vm1075_vm0, %v5206_v5, -inf }
 0x3b8   : > { %1586 = vmax.xlane.f32.xlu1 %v1585_v7  ;;  %v1579_v9 = vsel %vm1075_vm0, %v5208_v6, -inf }
 0x3ba   : > { %1577 = vmax.xlane.f32.xlu0 %v1576_v8 }
 0x3bc   : > { %1580 = vmax.xlane.f32.xlu1 %v1579_v9 }
 0x41b   : > { %v5216_v10 = vpop.f32.mrb[4].mxu1 }
 0x41c   : > { %v5218_v13 = vpop.f32.mrb[5].mxu1  ;;  %v1594_v14 = vsel %vm1075_vm0, %v5216_v10, -inf }
 0x41d   : > { %1595 = vmax.xlane.f32.xlu0 %v1594_v14  ;;  %v5222_v17 = vpop.f32.mrb[6].mxu1  ;;  %v1588_v20 = vsel %vm1075_vm0, %v5218_v13, -inf }
 0x41e   : > { %v5224_v18 = vpop.f32.mrb[7].mxu1  ;;  %v1597_v19 = vsel %vm1075_vm0, %v5222_v17, -inf }
 0x41f   : > { %1598 = vmax.xlane.f32.xlu1 %v1597_v19  ;;  %v1591_v21 = vsel %vm1075_vm0, %v5224_v18, -inf }
 0x421   : > { %1589 = vmax.xlane.f32.xlu0 %v1588_v20 }
 0x423   : > { %1592 = vmax.xlane.f32.xlu1 %v1591_v21 }
 0x426   : > { %v5232_v22 = vpop.f32.mrb[28].mxu0 }
 0x427   : > { %v5234_v25 = vpop.f32.mrb[29].mxu0  ;;  %v1606_v26 = vsel %vm1075_vm0, %v5232_v22, -inf }
 0x428   : > { %1607 = vmax.xlane.f32.xlu0 %v1606_v26  ;;  %v5240_v28 = vpop.f32.mrb[30].mxu0  ;;  %v1600_v41 = vsel %vm1075_vm0, %v5234_v25, -inf }
 0x429   : > { %v5242_v29 = vpop.f32.mrb[31].mxu0  ;;  %v1609_v15 = vsel %vm1075_vm0, %v5240_v28, -inf }
 0x42a   : > { %1610 = vmax.xlane.f32.xlu1 %v1609_v15  ;;  %v1603_v43 = vsel %vm1075_vm0, %v5242_v29, -inf }
 0x42e   : > { %v5248_v33 = vpop.f32.mrb[8].mxu1 }
 0x42f   : > { %v5250_v34 = vpop.f32.mrb[9].mxu1  ;;  %v1618_v35 = vsel %vm1075_vm0, %v5248_v33, -inf }
 0x430   : > { %1619 = vmax.xlane.f32.xlu0 %v1618_v35  ;;  %v5254_v36 = vpop.f32.mrb[10].mxu1  ;;  %v1612_v24 = vsel %vm1075_vm0, %v5250_v34, -inf }
 0x431   : > { %v5256_v37 = vpop.f32.mrb[11].mxu1  ;;  %v1621_v38 = vsel %vm1075_vm0, %v5254_v36, -inf }
 0x432   : > { %1622 = vmax.xlane.f32.xlu1 %v1621_v38  ;;  %v1572_v23 = vpop.xlane.xlu0 %1571  ;;  %v1615_v49 = vsel %vm1075_vm0, %v5256_v37, -inf }
 0x433   : > { %v1662_v46 = vsub.f32 %v5184_v55, %v1572_v23 }
 0x434   : > { %1601 = vmax.xlane.f32.xlu0 %v1600_v41 }
 0x435   : > { %v1569_v50 = vpop.xlane.xlu1 %1568  ;;  %v1696_v52 = vmul.f32 1.442695, %v1662_v46 }
 0x436   : > { %1604 = vmax.xlane.f32.xlu1 %v1603_v43  ;;  %v5266_v44 = vpop.f32.mrb[32].mxu0  ;;  %v1566_v45 = vpop.xlane.xlu0 %1565  ;;  %v1661_v57 = vsub.f32 %v5192_v59, %v1569_v50 }
 0x437   : > { %v5269_v16 = vpop.f32.mrb[33].mxu0  ;;  %v1660_v53 = vsub.f32 %v5186_v31, %v1566_v45  ;;  %v1630_v55 = vsel %vm1075_vm0, %v5266_v44, -inf  ;;  %4253 = vpow2.f32 %v1696_v52 }
 0x438   : > { %1613 = vmax.xlane.f32.xlu0 %v1612_v24  ;;  %v5273_v47 = vpop.f32.mrb[34].mxu0  ;;  %v1624_v14 = vsel %vm1075_vm0, %v5269_v16, -inf }
 0x439   : > { %v5275_v48 = vpop.f32.mrb[35].mxu0  ;;  %v1633_v61 = vsel %vm1075_vm0, %v5273_v47, -inf  ;;  %v1692_v62 = vmul.f32 1.442695, %v1660_v53 }
 0x43a   : > { %1616 = vmax.xlane.f32.xlu1 %v1615_v49  ;;  %v1575_v51 = vpop.xlane.xlu0 %1574  ;;  %v1627_v19 = vsel %vm1075_vm0, %v5275_v48, -inf }
 0x43b   : > { %v1663_v54 = vsub.f32 %v5190_v58, %v1575_v51  ;;  %v1694_v58 = vmul.f32 1.442695, %v1661_v57 }
 0x43c   : > { %1631 = vmax.xlane.f32.xlu0 %v1630_v55 }
 0x43d   : > { %v1698_v60 = vmul.f32 1.442695, %v1663_v54 }
 0x43e   : > { %1634 = vmax.xlane.f32.xlu1 %v1633_v61 }
 0x43f   : > { %v5286_v3 = vpop.f32.mrb[12].mxu1  ;;  %4255 = vpow2.f32 %v1698_v60 }
 0x440   : > { %v5288_v7 = vpop.f32.mrb[13].mxu1  ;;  %v1642_v31 = vsel %vm1075_vm0, %v5286_v3, -inf  ;;  %4257 = vpow2.f32 %v1692_v62 }
 0x441   : > { %1643 = vmax.xlane.f32.xlu0 %v1642_v31  ;;  %v5292_v8 = vpop.f32.mrb[14].mxu1  ;;  %4259 = vpow2.f32 %v1694_v58  ;;  %v1636_v20 = vsel %vm1075_vm0, %v5288_v7, -inf  ;;  %v5304_v21 = vpop.eup %4253 }
 0x442   : > { %v5294_v59 = vpop.f32.mrb[15].mxu1  ;;  %v1645_v9 = vsel %vm1075_vm0, %v5292_v8, -inf  ;;  %v1762_v41 = vsel %vm1075_vm0, %v5304_v21, 0.0 }
 0x443   : > { %1646 = vmax.xlane.f32.xlu1 %v1645_v9  ;;  %v1639_v26 = vsel %vm1075_vm0, %v5294_v59, -inf  ;;  %v1584_v55 = vpop.xlane.xlu0 %1583 }
 0x444   : > { %v1666_v60 = vsub.f32 %v5200_v63, %v1584_v55 }
 0x445   : > { %1625 = vmax.xlane.f32.xlu0 %v1624_v14  ;;  %v1587_v57 = vpop.xlane.xlu1 %1586 }
 0x446   : > { %v1667_v62 = vsub.f32 %v5206_v5, %v1587_v57  ;;  %v1704_v58 = vmul.f32 1.442695, %v1666_v60 }
 0x447   : > { %1628 = vmax.xlane.f32.xlu1 %v1627_v19  ;;  %v1578_v61 = vpop.xlane.xlu0 %1577 }
 0x448   : > { %v1664_v9 = vsub.f32 %v5202_v39, %v1578_v61  ;;  %v1706_v14 = vmul.f32 1.442695, %v1667_v62  ;;  %4261 = vpow2.f32 %v1704_v58 }
 0x449   : > { %1637 = vmax.xlane.f32.xlu0 %v1636_v20  ;;  %v5310_v35 = vpop.eup %4255  ;;  %v1581_v31 = vpop.xlane.xlu1 %1580 }
 0x44a   : > { %v5308_v15 = vpop.f32.mrb[36].mxu0  ;;  %v5318_v43 = vpop.eup %4257  ;;  %v1765_v46 = vsel %vm1075_vm0, %v5310_v35, 0.0  ;;  %v1665_v19 = vsub.f32 %v5208_v6, %v1581_v31  ;;  %v1700_v20 = vmul.f32 1.442695, %v1664_v9  ;;  %4263 = vpow2.f32 %v1706_v14 }
 0x44b   : > { %1640 = vmax.xlane.f32.xlu1 %v1639_v26  ;;  %v5312_v38 = vpop.f32.mrb[37].mxu0  ;;  %v5324_v24 = vpop.eup %4259  ;;  %v1756_v49 = vsel %vm1075_vm0, %v5318_v43, 0.0  ;;  %v1654_v51 = vsel %vm1075_vm0, %v5308_v15, -inf }
 0x44c   : > { %v5314_v23 = vpop.f32.mrb[38].mxu0  ;;  %v1759_v50 = vsel %vm1075_vm0, %v5324_v24, 0.0  ;;  %v1648_v53 = vsel %vm1075_vm0, %v5312_v38, -inf  ;;  %v1702_v26 = vmul.f32 1.442695, %v1665_v19  ;;  %4265 = vpow2.f32 %v1700_v20 }
 0x44d   : > { %1763 = vadd.xlane.f32.xlu0 %v1762_v41  ;;  %v5320_v45 = vpop.f32.mrb[39].mxu0  ;;  %v1657_v52 = vsel %vm1075_vm0, %v5314_v23, -inf }
 0x44e   : > { %v1651_v54 = vsel %vm1075_vm0, %v5320_v45, -inf  ;;  %4267 = vpow2.f32 %v1702_v26 }
 0x44f   : > { %1766 = vadd.xlane.f32.xlu1 %v1765_v46 }
 0x451   : > { %1757 = vadd.xlane.f32.xlu0 %v1756_v49 }
 0x452   : > { %v5346_v41 = vpop.eup %4261 }
 0x453   : > { %1760 = vadd.xlane.f32.xlu1 %v1759_v50  ;;  %v1774_v63 = vsel %vm1075_vm0, %v5346_v41, 0.0 }
 0x454   : > { %v5348_v46 = vpop.eup %4263 }
 0x455   : > { %1655 = vmax.xlane.f32.xlu0 %v1654_v51  ;;  %v1777_v39 = vsel %vm1075_vm0, %v5348_v46, 0.0 }
 0x456   : > { %v5352_v5 = vpop.eup %4265 }
 0x457   : > { %1658 = vmax.xlane.f32.xlu1 %v1657_v52  ;;  %v1768_v49 = vsel %vm1075_vm0, %v5352_v5, 0.0 }
 0x458   : > { %v5356_v6 = vpop.eup %4267 }
 0x459   : > { %1649 = vmax.xlane.f32.xlu0 %v1648_v53  ;;  %v1771_v50 = vsel %vm1075_vm0, %v5356_v6, 0.0 }
 0x45b   : > { %1652 = vmax.xlane.f32.xlu1 %v1651_v54 }
 0x46c   : > { %1057 = vrot.lane.b32.xlu1 %v5107_v11, %s4668_s18 }
 0x46f   : > { %1055 = vrot.lane.b32.xlu0 %v5109_v12, %s4668_s18 }
 0x48e   : > { %1775 = vadd.xlane.f32.xlu0 %v1774_v63 }
 0x490   : > { %1778 = vadd.xlane.f32.xlu1 %v1777_v39 }
 0x492   : > { %1769 = vadd.xlane.f32.xlu0 %v1768_v49 }
 0x494   : > { %1772 = vadd.xlane.f32.xlu1 %v1771_v50 }
 0x4aa   : > { %v1596_v51 = vpop.xlane.xlu0 %1595 }
 0x4ab   : > { %v1670_v52 = vsub.f32 %v5216_v10, %v1596_v51 }
 0x4ac   : > { %v1599_v53 = vpop.xlane.xlu1 %1598 }
 0x4ad   : > { %v1712_v54 = vmul.f32 1.442695, %v1670_v52  ;;  %v1671_v55 = vsub.f32 %v5222_v17, %v1599_v53 }
 0x4ae   : > { %v1590_v57 = vpop.xlane.xlu0 %1589 }
 0x4af   : > { %4269 = vpow2.f32 %v1712_v54  ;;  %v1714_v60 = vmul.f32 1.442695, %v1671_v55  ;;  %v1668_v61 = vsub.f32 %v5218_v13, %v1590_v57 }
 0x4b0   : > { %v1593_v62 = vpop.xlane.xlu1 %1592 }
 0x4b1   : > { %4271 = vpow2.f32 %v1714_v60  ;;  %v1708_v31 = vmul.f32 1.442695, %v1668_v61  ;;  %v1669_v58 = vsub.f32 %v5224_v18, %v1593_v62 }
 0x4b3   : > { %4273 = vpow2.f32 %v1708_v31  ;;  %v1710_v9 = vmul.f32 1.442695, %v1669_v58 }
 0x4b5   : > { %4275 = vpow2.f32 %v1710_v9  ;;  %v1608_v14 = vpop.xlane.xlu0 %1607 }
 0x4b6   : > { %v1674_v10 = vsub.f32 %v5232_v22, %v1608_v14 }
 0x4b7   : > { %v1611_v19 = vpop.xlane.xlu1 %1610 }
 0x4b8   : > { %v1720_v20 = vmul.f32 1.442695, %v1674_v10  ;;  %v1675_v17 = vsub.f32 %v5240_v28, %v1611_v19 }
 0x4b9   : > { %v5368_v26 = vpop.eup %4269 }
 0x4ba   : > { %4277 = vpow2.f32 %v1720_v20  ;;  %v1722_v63 = vmul.f32 1.442695, %v1675_v17  ;;  %v1786_v13 = vsel %vm1075_vm0, %v5368_v26, 0.0 }
 0x4bb   : > { %v5372_v39 = vpop.eup %4271  ;;  %1787 = vadd.xlane.f32.xlu0 %v1786_v13 }
 0x4bc   : > { %4279 = vpow2.f32 %v1722_v63  ;;  %v1789_v18 = vsel %vm1075_vm0, %v5372_v39, 0.0 }
 0x4bd   : > { %v5376_v49 = vpop.eup %4273  ;;  %1790 = vadd.xlane.f32.xlu1 %v1789_v18  ;;  %v1620_v22 = vpop.xlane.xlu0 %1619 }
 0x4be   : > { %v1678_v28 = vsub.f32 %v5248_v33, %v1620_v22  ;;  %v1780_v50 = vsel %vm1075_vm0, %v5376_v49, 0.0 }
 0x4bf   : > { %v5381_v51 = vpop.eup %4275  ;;  %v1623_v52 = vpop.xlane.xlu1 %1622  ;;  %1781 = vadd.xlane.f32.xlu0 %v1780_v50 }
 0x4c0   : > { %v1728_v53 = vmul.f32 1.442695, %v1678_v28  ;;  %v1679_v54 = vsub.f32 %v5254_v36, %v1623_v52  ;;  %v1783_v55 = vsel %vm1075_vm0, %v5381_v51, 0.0 }
 0x4c1   : > { %1784 = vadd.xlane.f32.xlu1 %v1783_v55  ;;  %v1602_v57 = vpop.xlane.xlu0 %1601 }
 0x4c2   : > { %4281 = vpow2.f32 %v1728_v53  ;;  %v1730_v60 = vmul.f32 1.442695, %v1679_v54  ;;  %v1672_v61 = vsub.f32 %v5234_v25, %v1602_v57 }
 0x4c3   : > { %v1605_v33 = vpop.xlane.xlu1 %1604 }
 0x4c4   : > { %v5387_v62 = vpop.eup %4277  ;;  %4283 = vpow2.f32 %v1730_v60  ;;  %v1716_v31 = vmul.f32 1.442695, %v1672_v61  ;;  %v1673_v58 = vsub.f32 %v5242_v29, %v1605_v33 }
 0x4c5   : > { %v1614_v9 = vpop.xlane.xlu0 %1613  ;;  %v1798_v36 = vsel %vm1075_vm0, %v5387_v62, 0.0 }
 0x4c6   : > { %v5392_v14 = vpop.eup %4279  ;;  %4285 = vpow2.f32 %v1716_v31  ;;  %v1718_v10 = vmul.f32 1.442695, %v1673_v58  ;;  %v1676_v19 = vsub.f32 %v5250_v34, %v1614_v9  ;;  %1799 = vadd.xlane.f32.xlu0 %v1798_v36 }
 0x4c7   : > { %v1617_v20 = vpop.xlane.xlu1 %1616  ;;  %v1801_v25 = vsel %vm1075_vm0, %v5392_v14, 0.0 }
 0x4c8   : > { %4287 = vpow2.f32 %v1718_v10  ;;  %v1724_v17 = vmul.f32 1.442695, %v1676_v19  ;;  %v1677_v63 = vsub.f32 %v5256_v37, %v1617_v20  ;;  %1802 = vadd.xlane.f32.xlu1 %v1801_v25 }
 0x4c9   : > { %v1632_v29 = vpop.xlane.xlu0 %1631 }
 0x4ca   : > { %4289 = vpow2.f32 %v1724_v17  ;;  %v1726_v13 = vmul.f32 1.442695, %v1677_v63  ;;  %v1682_v18 = vsub.f32 %v5266_v44, %v1632_v29 }
 0x4cb   : > { %v1635_v22 = vpop.xlane.xlu1 %1634 }
 0x4cc   : > { %v5399_v28 = vpop.eup %4281  ;;  %4291 = vpow2.f32 %v1726_v13  ;;  %v1736_v34 = vmul.f32 1.442695, %v1682_v18  ;;  %v1683_v9 = vsub.f32 %v5273_v47, %v1635_v22 }
 0x4cd   : > { %v1810_v50 = vsel %vm1075_vm0, %v5399_v28, 0.0 }
 0x4ce   : > { %v5403_v52 = vpop.eup %4283  ;;  %4293 = vpow2.f32 %v1736_v34  ;;  %v1644_v53 = vpop.xlane.xlu0 %1643  ;;  %1811 = vadd.xlane.f32.xlu0 %v1810_v50  ;;  %v1738_v47 = vmul.f32 1.442695, %v1683_v9 }
 0x4cf   : > { %v1686_v37 = vsub.f32 %v5286_v3, %v1644_v53  ;;  %v1813_v54 = vsel %vm1075_vm0, %v5403_v52, 0.0 }
 0x4d0   : > { %v5408_v55 = vpop.eup %4285  ;;  %v1647_v44 = vpop.xlane.xlu1 %1646  ;;  %1814 = vadd.xlane.f32.xlu1 %v1813_v54 }
 0x4d1   : > { %v1744_v57 = vmul.f32 1.442695, %v1686_v37  ;;  %v1792_v60 = vsel %vm1075_vm0, %v5408_v55, 0.0  ;;  %v1687_v10 = vsub.f32 %v5292_v8, %v1647_v44 }
 0x4d2   : > { %v5412_v61 = vpop.eup %4287  ;;  %v1626_v33 = vpop.xlane.xlu0 %1625  ;;  %1793 = vadd.xlane.f32.xlu0 %v1792_v60 }
 0x4d3   : > { %4295 = vpow2.f32 %v1744_v57  ;;  %v1680_v31 = vsub.f32 %v5269_v16, %v1626_v33  ;;  %v1795_v3 = vsel %vm1075_vm0, %v5412_v61, 0.0  ;;  %v1746_v8 = vmul.f32 1.442695, %v1687_v10 }
 0x4d4   : > { %v5417_v58 = vpop.eup %4289  ;;  %v1629_v36 = vpop.xlane.xlu1 %1628  ;;  %1796 = vadd.xlane.f32.xlu1 %v1795_v3 }
 0x4d5   : > { %v1732_v19 = vmul.f32 1.442695, %v1680_v31  ;;  %v1804_v20 = vsel %vm1075_vm0, %v5417_v58, 0.0 }
 0x4d6   : > { %v5423_v25 = vpop.eup %4291  ;;  %v1638_v17 = vpop.xlane.xlu0 %1637  ;;  %1805 = vadd.xlane.f32.xlu0 %v1804_v20 }
 0x4d7   : > { %4297 = vpow2.f32 %v1732_v19  ;;  %v1684_v16 = vsub.f32 %v5288_v7, %v1638_v17  ;;  %v1807_v63 = vsel %vm1075_vm0, %v5423_v25, 0.0  ;;  %v1681_v7 = vsub.f32 %v5275_v48, %v1629_v36 }
 0x4d8   : > { %v5428_v29 = vpop.eup %4293  ;;  %v1641_v13 = vpop.xlane.xlu1 %1640  ;;  %1808 = vadd.xlane.f32.xlu1 %v1807_v63 }
 0x4d9   : > { %v1740_v18 = vmul.f32 1.442695, %v1684_v16  ;;  %v1822_v22 = vsel %vm1075_vm0, %v5428_v29, 0.0  ;;  %v1734_v60 = vmul.f32 1.442695, %v1681_v7  ;;  %v1685_v33 = vsub.f32 %v5294_v59, %v1641_v13 }
 0x4da   : > { %v1764_v34 = vpop.xlane.xlu0 %1763  ;;  %1823 = vadd.xlane.f32.xlu0 %v1822_v22 }
 0x4db   : > { %4299 = vpow2.f32 %v1740_v18  ;;  %v1742_v10 = vmul.f32 1.442695, %v1685_v33 }
 0x4dc   : > { %4301 = vpow2.f32 %v1738_v47  ;;  %v1767_v50 = vpop.xlane.xlu1 %1766 }
 0x4dd   : > { %v5432_v53 = vpop.eup %4295  ;;  %4303 = vpow2.f32 %v1746_v8 }
 0x4de   : > { %4305 = vrcp.f32 %v1767_v50  ;;  %v1758_v37 = vpop.xlane.xlu0 %1757  ;;  %v1834_v54 = vsel %vm1075_vm0, %v5432_v53, 0.0 }
 0x4df   : > { %4307 = vrcp.f32 %v1758_v37  ;;  %1835 = vadd.xlane.f32.xlu1 %v1834_v54 }
 0x4e0   : > { %4309 = vrcp.f32 %v1764_v34  ;;  %v1761_v44 = vpop.xlane.xlu1 %1760 }
 0x4e1   : > { %v5437_v57 = vpop.eup %4297  ;;  %4311 = vrcp.f32 %v1761_v44 }
 0x4e2   : > { %v1656_v31 = vpop.xlane.xlu0 %1655  ;;  %v1816_v3 = vsel %vm1075_vm0, %v5437_v57, 0.0  ;;  %4313 = vpow2.f32 %v1734_v60 }
 0x4e3   : > { %v1690_v48 = vsub.f32 %v5308_v15, %v1656_v31  ;;  %1817 = vadd.xlane.f32.xlu0 %v1816_v3 }
 0x4e4   : > { %v1659_v9 = vpop.xlane.xlu1 %1658 }
 0x4e5   : > { %v5443_v36 = vpop.eup %4299  ;;  %v1752_v19 = vmul.f32 1.442695, %v1690_v48  ;;  %v1691_v20 = vsub.f32 %v5314_v23, %v1659_v9 }
 0x4e6   : > { %v5446_v17 = vpop.eup %4301  ;;  %v1650_v16 = vpop.xlane.xlu0 %1649  ;;  %v1828_v59 = vsel %vm1075_vm0, %v5443_v36, 0.0 }
 0x4e7   : > { %v5450_v63 = vpop.eup %4303  ;;  %4315 = vpow2.f32 %v1752_v19  ;;  %v1754_v47 = vmul.f32 1.442695, %v1691_v20  ;;  %v1688_v15 = vsub.f32 %v5312_v38, %v1650_v16  ;;  %1829 = vadd.xlane.f32.xlu1 %v1828_v59  ;;  %v1825_v50 = vsel %vm1075_vm0, %v5446_v17, 0.0 }
 0x4e8   : > { %v4306_v13 = vpop.eup %4305  ;;  %v1653_v8 = vpop.xlane.xlu1 %1652  ;;  %4317 = vpow2.f32 %v1742_v10 }
 0x4e9   : > { %v4308_v18 = vpop.eup %4307  ;;  %v1748_v22 = vmul.f32 1.442695, %v1688_v15  ;;  %v1689_v23 = vsub.f32 %v5320_v45, %v1653_v8  ;;  %4319 = vpow2.f32 %v1754_v47  ;;  %v1887_v37 = vmul.f32 %v4306_v13, %v5310_v35 }
 0x4ea   : > { %v4310_v34 = vpop.eup %4309  ;;  %v1884_v38 = vmul.f32 %v4308_v18, %v5318_v43  ;;  %v1837_v45 = vsel %vm1075_vm0, %v5450_v63, 0.0  ;;  %v5500_v47 = vpop.permute.xlu0 %1055 }
 0x4eb   : > { %v4312_v7 = vpop.eup %4311  ;;  %v1750_v54 = vmul.f32 1.442695, %v1689_v23  ;;  %1826 = vadd.xlane.f32.xlu1 %v1825_v50  ;;  %v1886_v60 = vmul.f32 %v4310_v34, %v5304_v21  ;;  %4321 = vpow2.f32 %v1748_v22 }
 0x4ec   : > { %v1885_v44 = vmul.f32 %v4312_v7, %v5324_v24  ;;  %v5462_v31 = vpop.eup %4313  ;;  %v5502_v15 = vpop.permute.xlu1 %1057 }
 0x4ed   : > { %4323 = vpow2.f32 %v1750_v54  ;;  %v1917_v3 = vpack.c.bf16 %v1887_v37, %v1886_v60  ;;  %v1819_v21 = vsel %vm1075_vm0, %v5462_v31, 0.0 }
 0x4ee   : > { %v1916_v33 = vpack.c.bf16 %v1885_v44, %v1884_v38 }
 0x4ef   : > { %1838 = vadd.xlane.f32.xlu1 %v1837_v45 }
 0x4f0   : > { %3910 = vmatprep.mubr.msk.bf16.mxu1 %vm1075_vm0, %v1916_v33 }
 0x4f1   : > { %v5465_v35 = vpop.eup %4315  ;;  %3911 = vmatmul.mubr.msk.bf16.vlgmr.msra.gmra.mrb[16].mxu1 %vm1075_vm0, %v1917_v3 }
 0x4f2   : > { %3915 = vmatpush3.bf16.msra.mxu1 %v5109_v12  ;;  %v1846_v43 = vsel %vm1075_vm0, %v5465_v35, 0.0  ;;  %v5473_v24 = vpop.eup %4317 }
 0x4f3   : > { %3916 = vmatprep.subr.bf16.mxu1 %v5107_v11  ;;  %1820 = vadd.xlane.f32.xlu1 %v1819_v21  ;;  %v5476_v48 = vpop.eup %4319  ;;  %v1831_v9 = vsel %vm1075_vm0, %v5473_v24, 0.0 }
 0x4f4   : > { %1847 = vadd.xlane.f32.xlu0 %v1846_v43  ;;  %v1849_v19 = vsel %vm1075_vm0, %v5476_v48, 0.0 }
 0x4f5   : > { %v5481_v10 = vpop.eup %4321 }
 0x4f6   : > { %3917 = vmatpush3.bf16.msra.mxu1 %v5107_v11  ;;  %v1840_v16 = vsel %vm1075_vm0, %v5481_v10, 0.0 }
 0x4f7   : > { %3930 = vmatprep.subr.bf16.mxu1 %v5246_v30  ;;  %1832 = vadd.xlane.f32.xlu1 %v1831_v9  ;;  %v5486_v20 = vpop.eup %4323 }
 0x4f8   : > { %1850 = vadd.xlane.f32.xlu0 %v1849_v19  ;;  %v1843_v59 = vsel %vm1075_vm0, %v5486_v20, 0.0 }
 0x4fb   : > { %1841 = vadd.xlane.f32.xlu1 %v1840_v16 }
 0x4fc   : > { %1844 = vadd.xlane.f32.xlu0 %v1843_v59 }
 0x50c   : > { %1065 = vrot.lane.b32.xlu1 %v5096_v0, %s4669_s10 }
 0x510   : > { %1067 = vrot.lane.b32.xlu1 %v5109_v12, %s4669_s10 }
 0x512   : > { %1063 = vrot.lane.b32.xlu0 %v5098_v40, %s4669_s10 }
 0x514   : > { %1069 = vrot.lane.b32.xlu1 %v5107_v11, %s4669_s10  ;;  %s5822_s10 = sld [smem:[#allocation21_spill]] }
 0x51b   : > { %v1776_v13 = vpop.xlane.xlu0 %1775 }
 0x51d   : > { %v1779_v8 = vpop.xlane.xlu1 %1778 }
 0x51e   : > { %4325 = vrcp.f32 %v1779_v8 }
 0x51f   : > { %v1770_v18 = vpop.xlane.xlu0 %1769 }
 0x520   : > { %4327 = vrcp.f32 %v1770_v18 }
 0x521   : > { %4329 = vrcp.f32 %v1776_v13  ;;  %v1773_v0 = vpop.xlane.xlu1 %1772 }
 0x522   : > { %4331 = vrcp.f32 %v1773_v0 }
 0x528   : > { %v4326_v22 = vpop.eup %4325 }
 0x529   : > { %v1891_v40 = vmul.f32 %v4326_v22, %v5348_v46 }
 0x52a   : > { %v4328_v12 = vpop.eup %4327 }
 0x52b   : > { %v4330_v23 = vpop.eup %4329  ;;  %v1888_v11 = vmul.f32 %v4328_v12, %v5352_v5 }
 0x52c   : > { %v4332_v34 = vpop.eup %4331  ;;  %v1890_v7 = vmul.f32 %v4330_v23, %v5346_v41 }
 0x52d   : > { %v1889_v50 = vmul.f32 %v4332_v34, %v5356_v6 }
 0x52e   : > { %v1919_v54 = vpack.c.bf16 %v1891_v40, %v1890_v7 }
 0x52f   : > { %v1918_v37 = vpack.c.bf16 %v1889_v50, %v1888_v11 }
 0x531   : > { %3918 = vmatprep.mubr.msk.bf16.mxu1 %vm1075_vm0, %v1918_v37 }
 0x532   : > { %3919 = vmatmul.mubr.msk.bf16.vlgmr.msra.gmra.mrb[20].mxu1 %vm1075_vm0, %v1919_v54 }
 0x533   : > { %3931 = vmatpush3.bf16.msra.mxu1 %v5246_v30 }
 0x534   : > { %3932 = vmatprep.subr.bf16.mxu1 %v5238_v27 }
 0x537   : > { %3933 = vmatpush3.bf16.msra.mxu1 %v5238_v27 }
 0x538   : > { %3946 = vmatprep.subr.bf16.mxu1 %v5500_v47 }
 0x548   : > { %v1788_v46 = vpop.xlane.xlu0 %1787 }
 0x54a   : > { %v1791_v5 = vpop.xlane.xlu1 %1790 }
 0x54b   : > { %4333 = vrcp.f32 %v1791_v5 }
 0x54c   : > { %v1782_v6 = vpop.xlane.xlu0 %1781 }
 0x54d   : > { %4335 = vrcp.f32 %v1782_v6 }
 0x54e   : > { %4337 = vrcp.f32 %v1788_v46  ;;  %v1785_v41 = vpop.xlane.xlu1 %1784 }
 0x54f   : > { %4339 = vrcp.f32 %v1785_v41 }
 0x553   : > { %v1800_v60 = vpop.xlane.xlu0 %1799 }
 0x555   : > { %v4334_v38 = vpop.eup %4333  ;;  %v1803_v3 = vpop.xlane.xlu1 %1802 }
 0x556   : > { %v1895_v30 = vmul.f32 %v4334_v38, %v5372_v39  ;;  %4341 = vrcp.f32 %v1803_v3 }
 0x557   : > { %v4336_v44 = vpop.eup %4335 }
 0x558   : > { %v4338_v45 = vpop.eup %4337  ;;  %v1892_v27 = vmul.f32 %v4336_v44, %v5376_v49 }
 0x559   : > { %v4340_v33 = vpop.eup %4339  ;;  %v1894_v43 = vmul.f32 %v4338_v45, %v5368_v26 }
 0x55a   : > { %v1893_v21 = vmul.f32 %v4340_v33, %v5381_v51 }
 0x55b   : > { %v1812_v9 = vpop.xlane.xlu0 %1811  ;;  %v1921_v59 = vpack.c.bf16 %v1895_v30, %v1894_v43 }
 0x55c   : > { %v1920_v19 = vpack.c.bf16 %v1893_v21, %v1892_v27 }
 0x55d   : > { %v1815_v16 = vpop.xlane.xlu1 %1814 }
 0x55e   : > { %3926 = vmatprep.mubr.msk.bf16.mxu0 %vm1075_vm0, %v1920_v19 }
 0x55f   : > { %3927 = vmatmul.mubr.msk.bf16.vlgmr.msra.gmra.mrb[40].mxu0 %vm1075_vm0, %v1921_v59  ;;  %v1794_v13 = vpop.xlane.xlu0 %1793 }
 0x560   : > { %3939 = vmatpush3.bf16.msra.mxu0 %v5181_v32  ;;  %4343 = vrcp.f32 %v1794_v13  ;;  %v4342_v51 = vpop.eup %4341 }
 0x561   : > { %4345 = vrcp.f32 %v1800_v60  ;;  %3940 = vmatprep.subr.bf16.mxu0 %v5262_v42  ;;  %v1797_v39 = vpop.xlane.xlu1 %1796  ;;  %v1899_v32 = vmul.f32 %v4342_v51, %v5392_v14 }
 0x562   : > { %4347 = vrcp.f32 %v1797_v39 }
 0x563   : > { %4349 = vrcp.f32 %v1815_v16  ;;  %v1806_v26 = vpop.xlane.xlu0 %1805 }
 0x564   : > { %3941 = vmatpush3.bf16.msra.mxu0 %v5262_v42  ;;  %4351 = vrcp.f32 %v1806_v26 }
 0x565   : > { %4353 = vrcp.f32 %v1812_v9  ;;  %v1809_v49 = vpop.xlane.xlu1 %1808 }
 0x566   : > { %4355 = vrcp.f32 %v1809_v49 }
 0x56a   : > { %v4344_v8 = vpop.eup %4343 }
 0x56b   : > { %v4346_v18 = vpop.eup %4345  ;;  %v1896_v12 = vmul.f32 %v4344_v8, %v5408_v55  ;;  %v4189_v8 = vld [vmem:[#allocation7] sm:$0xff]  }
 0x56c   : > { %v4348_v0 = vpop.eup %4347  ;;  %v1898_v40 = vmul.f32 %v4346_v18, %v5387_v62  ;;  %v1836_v37 = vpop.xlane.xlu1 %1835 }
 0x56d   : > { %v4350_v22 = vpop.eup %4349  ;;  %v1897_v23 = vmul.f32 %v4348_v0, %v5412_v61 }
 0x56e   : > { %v4352_v34 = vpop.eup %4351  ;;  %v1903_v7 = vmul.f32 %v4350_v22, %v5403_v52  ;;  %v1923_v54 = vpack.c.bf16 %v1899_v32, %v1898_v40  ;;  %v1824_v52 = vpop.xlane.xlu0 %1823  ;;  %v4190_v40 = vld [vmem:[#allocation7 + $0x8] sm:$0xff]  }
 0x56f   : > { %v4354_v11 = vpop.eup %4353  ;;  %v1922_v42 = vpack.c.bf16 %v1897_v23, %v1896_v12  ;;  %v1900_v46 = vmul.f32 %v4352_v34, %v5417_v58 }
 0x570   : > { %v4356_v50 = vpop.eup %4355  ;;  %v1902_v55 = vmul.f32 %v4354_v11, %v5399_v28 }
 0x571   : > { %3934 = vmatprep.mubr.msk.bf16.mxu1 %vm1075_vm0, %v1922_v42  ;;  %v1901_v14 = vmul.f32 %v4356_v50, %v5423_v25 }
 0x572   : > { %3935 = vmatmul.mubr.msk.bf16.vlgmr.msra.gmra.mrb[24].mxu1 %vm1075_vm0, %v1923_v54  ;;  %v1925_v5 = vpack.c.bf16 %v1903_v7, %v1902_v55  ;;  %v1818_v25 = vpop.xlane.xlu0 %1817  ;;  %v4195_v55 = vld [vmem:[#allocation7 + $0x30] sm:$0xff]  }
 0x573   : > { %3947 = vmatpush3.bf16.msra.mxu1 %v5500_v47  ;;  %v1924_v62 = vpack.c.bf16 %v1901_v14, %v1900_v46  ;;  %v4193_v46 = vld [vmem:[#allocation7 + $0x20] sm:$0xff]   ;;  %v4194_v14 = vld [vmem:[#allocation7 + $0x28] sm:$0xff]  }
 0x574   : > { %v1830_v61 = vpop.xlane.xlu1 %1829  ;;  %3948 = vmatprep.subr.bf16.mxu1 %v5502_v15 }
 0x575   : > { %3942 = vmatprep.mubr.msk.bf16.mxu0 %vm1075_vm0, %v1924_v62 }
 0x576   : > { %3943 = vmatmul.mubr.msk.bf16.vlgmr.msra.gmra.mrb[44].mxu0 %vm1075_vm0, %v1925_v5 }
 0x577   : > { %3949 = vmatpush3.bf16.msra.mxu1 %v5502_v15 }
 0x578   : > { %v1827_v58 = vpop.xlane.xlu1 %1826 }
 0x579   : > { %4357 = vrcp.f32 %v1827_v58 }
 0x57a   : > { %4359 = vrcp.f32 %v1818_v25 }
 0x57b   : > { %4361 = vrcp.f32 %v1824_v52 }
 0x57c   : > { %v1839_v6 = vpop.xlane.xlu1 %1838 }
 0x580   : > { %v1821_v28 = vpop.xlane.xlu1 %1820 }
 0x581   : > { %4363 = vrcp.f32 %v1821_v28  ;;  %v1848_v47 = vpop.xlane.xlu0 %1847 }
 0x582   : > { %4365 = vrcp.f32 %v1830_v61 }
 0x583   : > { %4367 = vrcp.f32 %v1839_v6  ;;  %v4358_v44 = vpop.eup %4357 }
 0x584   : > { %4369 = vrcp.f32 %v1836_v37  ;;  %v1833_v41 = vpop.xlane.xlu1 %1832  ;;  %v4360_v60 = vpop.eup %4359  ;;  %v1907_v3 = vmul.f32 %v4358_v44, %v5446_v17 }
 0x585   : > { %4371 = vrcp.f32 %v1833_v41  ;;  %v1851_v38 = vpop.xlane.xlu0 %1850  ;;  %v4362_v33 = vpop.eup %4361  ;;  %v1904_v43 = vmul.f32 %v4360_v60, %v5437_v57 }
 0x586   : > { %4373 = vrcp.f32 %v1851_v38  ;;  %v1906_v16 = vmul.f32 %v4362_v33, %v5428_v29 }
 0x587   : > { %4375 = vrcp.f32 %v1848_v47 }
 0x588   : > { %v1842_v15 = vpop.xlane.xlu1 %1841  ;;  %v1927_v49 = vpack.c.bf16 %v1907_v3, %v1906_v16 }
 0x589   : > { %4377 = vrcp.f32 %v1842_v15  ;;  %v1845_v45 = vpop.xlane.xlu0 %1844 }
 0x58a   : > { %4379 = vrcp.f32 %v1845_v45 }
 0x58b   : > { %v4364_v30 = vpop.eup %4363 }
 0x58c   : > { %v4366_v27 = vpop.eup %4365  ;;  %v1066_v21 = vpop.permute.xlu1 %1065  ;;  %v1905_v9 = vmul.f32 %v4364_v30, %v5462_v31 }
 0x58d   : > { %v4368_v19 = vpop.eup %4367  ;;  %v1064_v59 = vpop.permute.xlu0 %1063  ;;  %v1908_v57 = vmul.f32 %v4366_v27, %v5443_v36 }
 0x58e   : > { %v4370_v13 = vpop.eup %4369  ;;  %3954 = vmatprep.subr.bf16.mxu0 %v1064_v59  ;;  %v1926_v39 = vpack.c.bf16 %v1905_v9, %v1904_v43  ;;  %v1911_v51 = vmul.f32 %v4368_v19, %v5450_v63  ;;  %v4191_v63 = vld [vmem:[#allocation7 + $0x10] sm:$0xff]  }
 0x58f   : > { %v4372_v26 = vpop.eup %4371  ;;  %3955 = vmatpush3.bf16.msra.mxu0 %v1064_v59  ;;  %v1910_v0 = vmul.f32 %v4370_v13, %v5432_v53  ;;  %v4196_v59 = vld [vmem:[#allocation7 + $0x38] sm:$0xff]  }
 0x590   : > { %3956 = vmatprep.subr.bf16.mxu0 %v1066_v21  ;;  %v1068_v17 = vpop.permute.xlu1 %1067  ;;  %3950 = vmatprep.mubr.msk.bf16.mxu1 %vm1075_vm0, %v1926_v39  ;;  %v1909_v31 = vmul.f32 %v4372_v26, %v5473_v24  ;;  %v4374_v18 = vpop.eup %4373 }
 0x591   : > { %3951 = vmatmul.mubr.msk.bf16.vlgmr.msra.gmra.mrb[28].mxu1 %vm1075_vm0, %v1927_v49  ;;  %3962 = vmatprep.subr.bf16.mxu1 %v1068_v17  ;;  %v4376_v29 = vpop.eup %4375  ;;  %v1915_v23 = vmul.f32 %v4374_v18, %v5476_v48  ;;  %v1929_v36 = vpack.c.bf16 %v1911_v51, %v1910_v0 }
 0x592   : > { %3963 = vmatpush3.bf16.msra.mxu1 %v1068_v17  ;;  %v1928_v32 = vpack.c.bf16 %v1909_v31, %v1908_v57  ;;  %v1914_v53 = vmul.f32 %v4376_v29, %v5465_v35 }
 0x593   : > { %v4378_v22 = vpop.eup %4377  ;;  %3957 = vmatpush3.bf16.msra.mxu0 %v1066_v21 }
 0x594   : > { %v4380_v12 = vpop.eup %4379  ;;  %v1070_v34 = vpop.permute.xlu1 %1069  ;;  %3958 = vmatprep.mubr.msk.bf16.mxu0 %vm1075_vm0, %v1928_v32  ;;  %v1912_v24 = vmul.f32 %v4378_v22, %v5481_v10  ;;  %3982 = vmatprep.subr.bf16.mxu0 %v4189_v8  ;;  %v1931_v48 = vpack.c.bf16 %v1915_v23, %v1914_v53  ;;  %v4192_v10 = vld [vmem:[#allocation7 + $0x18] sm:$0xff]  }
 0x595   : > { %3964 = vmatprep.subr.bf16.mxu1 %v1070_v34  ;;  %v1913_v11 = vmul.f32 %v4380_v12, %v5486_v20 }
 0x596   : > { %3959 = vmatmul.mubr.msk.bf16.vlgmr.msra.gmra.mrb[48].mxu0 %vm1075_vm0, %v1929_v36  ;;  %3965 = vmatpush3.bf16.msra.mxu1 %v1070_v34 }
 0x597   : > { %v1930_v42 = vpack.c.bf16 %v1913_v11, %v1912_v24  ;;  %3983 = vmatpush3.bf16.msra.mxu0 %v4189_v8  ;;  %3970 = vmatprep.subr.bf16.mxu1 %v4191_v63 }
 0x598   : > { %3984 = vmatprep.subr.bf16.mxu0 %v4190_v40 }
 0x599   : > { %3966 = vmatprep.mubr.msk.bf16.mxu1 %vm1075_vm0, %v1930_v42 }
 0x59a   : > { %3967 = vmatmul.mubr.msk.bf16.vlgmr.msra.gmra.mrb[32].mxu1 %vm1075_vm0, %v1931_v48 }
 0x59b   : > { %3985 = vmatpush3.bf16.msra.mxu0 %v4190_v40  ;;  %3971 = vmatpush3.bf16.msra.mxu1 %v4191_v63 }
 0x59c   : > { %3972 = vmatprep.subr.bf16.mxu1 %v4192_v10  ;;  %3994 = vmatprep.subr.bf16.mxu0 %v4193_v46 }
 0x59f   : > { %3973 = vmatpush3.bf16.msra.mxu1 %v4192_v10 }
 0x5c4   : > { %v3912_v20 = vpop.f32.mrb[16].mxu1 }
 0x5c5   : > { %v1972_v50 = vpop.f32.mrb[17].mxu1 }
 0x5c6   : > { %v3913_v35 = vpop.f32.mrb[18].mxu1 }
 0x5c7   : > { %v2373_v7 = vpack.c.bf16 %v3913_v35, %v3912_v20  ;;  %v1975_v37 = vpop.f32.mrb[19].mxu1  ;;  %v3632_v35 = vld [vmem:[%s5780_s6] ss:$0 sm:$0xff] }
 0x5c8   : > { %v2372_v54 = vpack.c.bf16 %v1975_v37, %v1972_v50 }
 0x5ca   : > { %3986 = vmatprep.mubr.msk.bf16.mxu0 %vm1075_vm0, %v2372_v54 }
 0x5cb   : > { %3987 = vmatmul.mubr.msk.bf16.vlgmr.msra.gmra.mrb[52].mxu0 %vm1075_vm0, %v2373_v7 }
 0x5cc   : > { %3995 = vmatpush3.bf16.msra.mxu0 %v4193_v46 }
 0x5cd   : > { %3996 = vmatprep.subr.bf16.mxu0 %v4194_v14 }
 0x5d0   : > { %3997 = vmatpush3.bf16.msra.mxu0 %v4194_v14 }
 0x5d1   : > { %4006 = vmatprep.subr.bf16.mxu0 %v4195_v55 }
 0x605   : > { %v3920_v62 = vpop.f32.mrb[20].mxu1 }
 0x606   : > { %v2027_v61 = vpop.f32.mrb[21].mxu1 }
 0x607   : > { %v3921_v5 = vpop.f32.mrb[22].mxu1 }
 0x608   : > { %v2375_v52 = vpack.c.bf16 %v3921_v5, %v3920_v62  ;;  %v2030_v58 = vpop.f32.mrb[23].mxu1 }
 0x609   : > { %v2374_v25 = vpack.c.bf16 %v2030_v58, %v2027_v61 }
 0x60b   : > { %3990 = vmatprep.mubr.msk.bf16.mxu0 %vm1075_vm0, %v2374_v25 }
 0x60c   : > { %3991 = vmatmul.mubr.msk.bf16.gmra.mrb[56].mxu0 %vm1075_vm0, %v2375_v52  ;;  %v4429_v52 = vld [vmem:[%s4963_s25] sm:$0xff] }
 0x632   : > { %v3928_v6 = vpop.f32.mrb[40].mxu0 }
 0x633   : > { %v2082_v28 = vpop.f32.mrb[41].mxu0 }
 0x634   : > { %v3929_v47 = vpop.f32.mrb[42].mxu0 }
 0x635   : > { %v2377_v41 = vpack.c.bf16 %v3929_v47, %v3928_v6  ;;  %v2085_v38 = vpop.f32.mrb[43].mxu0  ;;  %v4430_v6 = vld [vmem:[%s4963_s25 + $0x8] sm:$0xff] }
 0x636   : > { %v2376_v44 = vpack.c.bf16 %v2085_v38, %v2082_v28 }
 0x638   : > { %3974 = vmatprep.mubr.msk.bf16.mxu1 %vm1075_vm0, %v2376_v44 }
 0x639   : > { %3975 = vmatmul.mubr.msk.bf16.vlgmr.msra.gmra.mrb[36].mxu1 %vm1075_vm0, %v2377_v41 }
 0x645   : > { %v3936_v15 = vpop.f32.mrb[24].mxu1 }
 0x646   : > { %v2137_v60 = vpop.f32.mrb[25].mxu1 }
 0x647   : > { %v3937_v45 = vpop.f32.mrb[26].mxu1 }
 0x648   : > { %v2379_v33 = vpack.c.bf16 %v3937_v45, %v3936_v15  ;;  %v2140_v30 = vpop.f32.mrb[27].mxu1 }
 0x649   : > { %v2378_v3 = vpack.c.bf16 %v2140_v30, %v2137_v60  ;;  %v3944_v27 = vpop.f32.mrb[44].mxu0  ;;  %v4431_v60 = vld [vmem:[%s4963_s25 + $0x10] sm:$0xff] }
 0x64a   : > { %v2192_v21 = vpop.f32.mrb[45].mxu0 }
 0x64b   : > { %v3945_v43 = vpop.f32.mrb[46].mxu0  ;;  %3978 = vmatprep.mubr.msk.bf16.mxu1 %vm1075_vm0, %v2378_v3 }
 0x64c   : > { %v2381_v9 = vpack.c.bf16 %v3945_v43, %v3944_v27  ;;  %v2195_v19 = vpop.f32.mrb[47].mxu0  ;;  %3979 = vmatmul.mubr.msk.bf16.gmra.mrb[40].mxu1 %vm1075_vm0, %v2379_v33  ;;  %v4432_v43 = vld [vmem:[%s4963_s25 + $0x18] sm:$0xff] }
 0x64d   : > { %v2380_v16 = vpack.c.bf16 %v2195_v19, %v2192_v21  ;;  %3061 = vmatprep.mubr.bf16.mxu1 %v4666_v56 }
 0x64f   : > { %3998 = vmatprep.mubr.msk.bf16.mxu0 %vm1075_vm0, %v2380_v16  ;;  %v4433_v16 = vld [vmem:[%s4963_s25 + $0x28] sm:$0xff] }
 0x650   : > { %3999 = vmatmul.mubr.msk.bf16.vlgmr.msra.gmra.mrb[52].mxu0 %vm1075_vm0, %v2381_v9 }
 0x651   : > { %4007 = vmatpush3.bf16.msra.mxu0 %v4195_v55 }
 0x652   : > { %4008 = vmatprep.subr.bf16.mxu0 %v4196_v59 }
 0x655   : > { %4009 = vmatpush3.bf16.msra.mxu0 %v4196_v59 }
 0x664   : > { %v3952_v13 = vpop.f32.mrb[28].mxu1 }
 0x665   : > { %v2247_v39 = vpop.f32.mrb[29].mxu1 }
 0x666   : > { %v3953_v26 = vpop.f32.mrb[30].mxu1 }
 0x667   : > { %v2383_v49 = vpack.c.bf16 %v3953_v26, %v3952_v13  ;;  %v2250_v51 = vpop.f32.mrb[31].mxu1 }
 0x668   : > { %v2382_v17 = vpack.c.bf16 %v2250_v51, %v2247_v39  ;;  %v4434_v39 = vld [vmem:[%s4963_s25 + $0x20] sm:$0xff] }
 0x669   : > { %v3960_v57 = vpop.f32.mrb[48].mxu0 }
 0x66a   : > { %v2302_v31 = vpop.f32.mrb[49].mxu0  ;;  %4002 = vmatprep.mubr.msk.bf16.mxu0 %vm1075_vm0, %v2382_v17  ;;  %v4436_v17 = vld [vmem:[%s4963_s25 + $0x30] sm:$0xff] }
 0x66b   : > { %v3961_v8 = vpop.f32.mrb[50].mxu0  ;;  %4003 = vmatmul.mubr.msk.bf16.gmra.mrb[56].mxu0 %vm1075_vm0, %v2383_v49  ;;  %v4435_v49 = vld [vmem:[%s4963_s25 + $0x38] sm:$0xff] }
 0x66c   : > { %v2385_v18 = vpack.c.bf16 %v3961_v8, %v3960_v57  ;;  %v2305_v29 = vpop.f32.mrb[51].mxu0  ;;  %v4199_v8 = vld [vmem:[#allocation8 + $0x4] ss:$8 sps:$4 sm:$0xff]  }
 0x66d   : > { %v2384_v0 = vpack.c.bf16 %v2305_v29, %v2302_v31  ;;  %v3968_v32 = vpop.f32.mrb[32].mxu1  ;;  %v4197_v31 = vld [vmem:[#allocation8] ss:$8 sps:$4 sm:$0xff]   ;;  %3029 = vmatprep.subr.bf16.mxu1 %v4199_v8  ;;  %v4200_v29 = vld [vmem:[#allocation8 + $0x10] ss:$8 sps:$4 sm:$0xff]  }
 0x66e   : > { %v2357_v22 = vpop.f32.mrb[33].mxu1  ;;  %3030 = vmatpush1.bf16.msra.mxu1 %v4197_v31 }
 0x66f   : > { %v3969_v63 = vpop.f32.mrb[34].mxu1  ;;  %4010 = vmatprep.mubr.msk.bf16.mxu0 %vm1075_vm0, %v2384_v0 }
 0x670   : > { %v2387_v12 = vpack.c.bf16 %v3969_v63, %v3968_v32  ;;  %v2360_v23 = vpop.f32.mrb[35].mxu1 }
 0x671   : > { %v2386_v34 = vpack.c.bf16 %v2360_v23, %v2357_v22 }
 0x673   : > { %4011 = vmatmul.mubr.msk.bf16.vlgmr.msra.gmra.mrb[52].mxu0 %vm1075_vm0, %v2385_v18  ;;  %v4202_v18 = vld [vmem:[#allocation8 + $0x14] ss:$8 sps:$4 sm:$0xff]  }
 0x674   : > { %4014 = vmatprep.mubr.msk.bf16.mxu0 %vm1075_vm0, %v2386_v34  ;;  %3031 = vmatprep.subr.bf16.mxu1 %v4202_v18 }
 0x675   : > { %3032 = vmatpush1.bf16.msra.mxu1 %v4200_v29 }
 0x67b   : > { %4015 = vmatmul.mubr.msk.bf16.gmra.mrb[56].mxu0 %vm1075_vm0, %v2387_v12 }
 0x70c   : > { %v3976_v36 = vpop.f32.mrb[36].mxu1 }
 0x70d   : > { %v2462_v24 = vpop.f32.mrb[37].mxu1 }
 0x70e   : > { %v3977_v40 = vpop.f32.mrb[38].mxu1 }
 0x70f   : > { %v2465_v11 = vpop.f32.mrb[39].mxu1 }
 0x71f   : > { %v3980_v53 = vpop.f32.mrb[40].mxu1 }
 0x720   : > { %v2478_v42 = vpop.f32.mrb[41].mxu1 }
 0x721   : > { %v3981_v48 = vpop.f32.mrb[42].mxu1 }
 0x722   : > { %v2481_v10 = vpop.f32.mrb[43].mxu1 }
 0x746   : > { %v4012_v20 = vpop.f32.mrb[52].mxu0 }
 0x747   : > { %v4018_v50 = vadd.f32 %v4012_v20, %v3976_v36  ;;  %v2737_v7 = vpop.f32.mrb[53].mxu0 }
 0x748   : > { %v4019_v37 = vadd.f32 %v2737_v7, %v2462_v24  ;;  %v4013_v54 = vpop.f32.mrb[54].mxu0 }
 0x749   : > { %v4020_v46 = vadd.f32 %v4013_v54, %v3977_v40  ;;  %v2740_v14 = vpop.f32.mrb[55].mxu0  ;;  %v2785_v61 = vadd.f32 %v4018_v50, %v3632_v35 }
 0x74a   : > { %v2783_v55 = vadd.f32 %v4019_v37, %v3632_v35  ;;  %v4021_v62 = vadd.f32 %v2740_v14, %v2465_v11 }
 0x74b   : > { %v2786_v38 = vadd.f32 %v4020_v46, %v3632_v35  ;;  %v5585_v45 = vadd.f32 %v4431_v60, %v2785_v61  ;;  %v4206_v60 = vld [vmem:[#allocation8 + $0x30] ss:$8 sps:$4 sm:$0xff]  }
 0x74c   : > { %v2784_v5 = vadd.f32 %v4021_v62, %v3632_v35  ;;  %v5577_v58 = vadd.f32 %v4429_v52, %v2783_v55 }
 0x74d   : > { %v5589_v9 = vadd.f32 %v4432_v43, %v2786_v38  ;;  %v4205_v38 = vld [vmem:[#allocation8 + $0x24] ss:$8 sps:$4 sm:$0xff]   ;;  %v4215_v43 = vld [vmem:[#allocation8 + $0x60] ss:$8 sps:$4 sm:$0xff]  }
 0x74e   : > { %2801 = vadd.xlane.f32.xlu0 %v5577_v58  ;;  %v4016_v25 = vpop.f32.mrb[56].mxu0  ;;  %v5581_v28 = vadd.f32 %v4430_v6, %v2784_v5  ;;  %3033 = vmatprep.subr.bf16.mxu1 %v4205_v38  ;;  %v3634_v38 = vld [vmem:[%s5820_s22] ss:$0 sm:$0xff]  ;;  %s3407_s22 = scalar_lea.sflag [#allocation4], %s4957_s20 }
 0x74f   : > { %v4022_v47 = vadd.f32 %v4016_v25, %v3980_v53  ;;  %v2753_v41 = vpop.f32.mrb[57].mxu0 }
 0x750   : > { %v4023_v44 = vadd.f32 %v2753_v41, %v2478_v42  ;;  %2803 = vadd.xlane.f32.xlu1 %v5581_v28  ;;  %v4017_v15 = vpop.f32.mrb[58].mxu0 }
 0x751   : > { %v4024_v33 = vadd.f32 %v4017_v15, %v3981_v48  ;;  %v2756_v30 = vpop.f32.mrb[59].mxu0  ;;  %v2789_v13 = vadd.f32 %v4022_v47, %v3632_v35  ;;  %v4208_v15 = vld [vmem:[#allocation8 + $0x34] ss:$8 sps:$4 sm:$0xff]  }
 0x752   : > { %v4025_v3 = vadd.f32 %v2756_v30, %v2481_v10  ;;  %2805 = vadd.xlane.f32.xlu0 %v5585_v45  ;;  %v2787_v27 = vadd.f32 %v4023_v44, %v3632_v35  ;;  %v4203_v44 = vld [vmem:[#allocation8 + $0x20] ss:$8 sps:$4 sm:$0xff]  }
 0x753   : > { %v2790_v19 = vadd.f32 %v4024_v33, %v3632_v35  ;;  %v5605_v57 = vadd.f32 %v4436_v17, %v2789_v13  ;;  %3034 = vmatpush1.bf16.msra.mxu1 %v4203_v44  ;;  %v4211_v33 = vld [vmem:[#allocation8 + $0x44] ss:$8 sps:$4 sm:$0xff]   ;;  %v4209_v30 = vld [vmem:[#allocation8 + $0x40] ss:$8 sps:$4 sm:$0xff]  }
 0x754   : > { %v2788_v21 = vadd.f32 %v4025_v3, %v3632_v35  ;;  %v5597_v26 = vadd.f32 %v4434_v39, %v2787_v27  ;;  %3035 = vmatprep.subr.bf16.mxu1 %v4208_v15  ;;  %v4214_v3 = vld [vmem:[#allocation8 + $0x54] ss:$8 sps:$4 sm:$0xff]   ;;  %v4212_v27 = vld [vmem:[#allocation8 + $0x50] ss:$8 sps:$4 sm:$0xff]   ;;  %v4221_v13 = vld [vmem:[#allocation10 + $0x40] sm:$0xff]  }
 0x755   : > { %v5601_v51 = vadd.f32 %v4435_v49, %v2790_v19  ;;  %v4220_v19 = vld [vmem:[#allocation8 + $0x74] ss:$8 sps:$4 sm:$0xff]  }
 0x756   : > { %2807 = vadd.xlane.f32.xlu0 %v5589_v9  ;;  %v5593_v59 = vadd.f32 %v4433_v16, %v2788_v21  ;;  %v4217_v21 = vld [vmem:[#allocation8 + $0x64] ss:$8 sps:$4 sm:$0xff]   ;;  %v4218_v16 = vld [vmem:[#allocation8 + $0x70] ss:$8 sps:$4 sm:$0xff]  }
 0x757   : > { %3036 = vmatpush1.bf16.msra.mxu1 %v4206_v60 }
 0x758   : > { %2811 = vadd.xlane.f32.xlu1 %v5593_v59  ;;  %3037 = vmatprep.subr.bf16.mxu1 %v4211_v33 }
 0x75a   : > { %2809 = vadd.xlane.f32.xlu0 %v5597_v26 }
 0x75b   : > { %3038 = vmatpush1.bf16.msra.mxu1 %v4209_v30  ;;  %v4222_v30 = vld [vmem:[#allocation10] sm:$0xff]  }
 0x75c   : > { %2815 = vadd.xlane.f32.xlu1 %v5601_v51  ;;  %3039 = vmatprep.subr.bf16.mxu1 %v4214_v3 }
 0x75e   : > { %2813 = vadd.xlane.f32.xlu0 %v5605_v57 }
 0x75f   : > { %3040 = vmatpush1.bf16.msra.mxu1 %v4212_v27  ;;  %v4223_v27 = vld [vmem:[#allocation10 + $0x48] sm:$0xff]  }
 0x760   : > { %3041 = vmatprep.subr.bf16.mxu1 %v4217_v21 }
 0x763   : > { %3042 = vmatpush1.bf16.msra.mxu1 %v4215_v43 }
 0x764   : > { %3043 = vmatprep.subr.bf16.mxu1 %v4220_v19 }
 0x767   : > { %3044 = vmatpush1.bf16.msra.mxu1 %v4218_v16  ;;  %v4224_v16 = vld [vmem:[#allocation10 + $0x8] sm:$0xff]  }
 0x768   : > { %3778 = vmatprep.subr.bf16.mxu1 %v4221_v13 }
 0x7db   : > { %v2802_v0 = vpop.xlane.xlu0 %2801 }
 0x7dc   : > { %v2817_v32 = vmul.f32 0.0078125, %v2802_v0 }
 0x7dd   : > { %v2804_v22 = vpop.xlane.xlu1 %2803 }
 0x7de   : > { %v5609_v63 = vsub.f32 %v5577_v58, %v2817_v32  ;;  %v2818_v12 = vmul.f32 0.0078125, %v2804_v22 }
 0x7df   : > { %v2806_v23 = vpop.xlane.xlu0 %2805 }
 0x7e0   : > { %v5612_v34 = vsub.f32 %v5581_v28, %v2818_v12  ;;  %v2819_v36 = vmul.f32 0.0078125, %v2806_v23  ;;  %v2833_v24 = vmul.f32 %v5609_v63, %v5609_v63 }
 0x7e2   : > { %v5617_v40 = vsub.f32 %v5585_v45, %v2819_v36  ;;  %2841 = vadd.xlane.f32.xlu0 %v2833_v24  ;;  %v2834_v11 = vmul.f32 %v5612_v34, %v5612_v34 }
 0x7e3   : > { %v2808_v53 = vpop.xlane.xlu0 %2807 }
 0x7e4   : > { %v2820_v42 = vmul.f32 0.0078125, %v2808_v53  ;;  %2843 = vadd.xlane.f32.xlu1 %v2834_v11  ;;  %v2835_v48 = vmul.f32 %v5617_v40, %v5617_v40 }
 0x7e5   : > { %v2812_v10 = vpop.xlane.xlu1 %2811 }
 0x7e6   : > { %v5624_v20 = vsub.f32 %v5589_v9, %v2820_v42  ;;  %v2822_v50 = vmul.f32 0.0078125, %v2812_v10  ;;  %2845 = vadd.xlane.f32.xlu0 %v2835_v48  ;;  %v3633_v48 = vld [vmem:[%s5781_s7] ss:$0 sm:$0xff] }
 0x7e7   : > { %v2810_v35 = vpop.xlane.xlu0 %2809 }
 0x7e8   : > { %v5627_v7 = vsub.f32 %v5593_v59, %v2822_v50  ;;  %v2821_v37 = vmul.f32 0.0078125, %v2810_v35  ;;  %v2836_v54 = vmul.f32 %v5624_v20, %v5624_v20 }
 0x7e9   : > { %v2816_v46 = vpop.xlane.xlu1 %2815 }
 0x7ea   : > { %v5632_v14 = vsub.f32 %v5597_v26, %v2821_v37  ;;  %v2824_v55 = vmul.f32 0.0078125, %v2816_v46  ;;  %2847 = vadd.xlane.f32.xlu1 %v2836_v54  ;;  %v2838_v25 = vmul.f32 %v5627_v7, %v5627_v7 }
 0x7eb   : > { %v2814_v62 = vpop.xlane.xlu0 %2813 }
 0x7ec   : > { %v5635_v61 = vsub.f32 %v5601_v51, %v2824_v55  ;;  %v2823_v5 = vmul.f32 0.0078125, %v2814_v62  ;;  %v2837_v52 = vmul.f32 %v5632_v14, %v5632_v14 }
 0x7ee   : > { %v5642_v6 = vsub.f32 %v5605_v57, %v2823_v5  ;;  %2849 = vadd.xlane.f32.xlu0 %v2837_v52  ;;  %2851 = vadd.xlane.f32.xlu1 %v2838_v25  ;;  %v2840_v41 = vmul.f32 %v5635_v61, %v5635_v61 }
 0x7f0   : > { %v2839_v47 = vmul.f32 %v5642_v6, %v5642_v6 }
 0x7f2   : > { %2853 = vadd.xlane.f32.xlu0 %v2839_v47  ;;  %2855 = vadd.xlane.f32.xlu1 %v2840_v41 }
 0x86f   : > { %v2842_v39 = vpop.xlane.xlu0 %2841 }
 0x870   : > { %v2857_v49 = vmul.f32 0.0078125, %v2842_v39 }
 0x871   : > { %v2844_v17 = vpop.xlane.xlu1 %2843 }
 0x872   : > { %v2865_v31 = vadd.f32 1e-05, %v2857_v49  ;;  %v2858_v8 = vmul.f32 0.0078125, %v2844_v17 }
 0x873   : > { %v2846_v18 = vpop.xlane.xlu0 %2845 }
 0x874   : > { %4381 = vrsqrt.f32 %v2865_v31  ;;  %v2866_v29 = vadd.f32 1e-05, %v2858_v8  ;;  %v2859_v0 = vmul.f32 0.0078125, %v2846_v18 }
 0x876   : > { %4383 = vrsqrt.f32 %v2866_v29  ;;  %v2867_v32 = vadd.f32 1e-05, %v2859_v0 }
 0x877   : > { %v2848_v22 = vpop.xlane.xlu1 %2847 }
 0x878   : > { %4385 = vrsqrt.f32 %v2867_v32  ;;  %v2860_v12 = vmul.f32 0.0078125, %v2848_v22 }
 0x87a   : > { %v2868_v23 = vadd.f32 1e-05, %v2860_v12 }
 0x87b   : > { %v2850_v36 = vpop.xlane.xlu0 %2849  ;;  %v2852_v24 = vpop.xlane.xlu1 %2851 }
 0x87c   : > { %4387 = vrsqrt.f32 %v2868_v23  ;;  %v2861_v11 = vmul.f32 0.0078125, %v2850_v36  ;;  %v2862_v53 = vmul.f32 0.0078125, %v2852_v24 }
 0x87e   : > { %v4382_v42 = vpop.eup %4381  ;;  %v2869_v10 = vadd.f32 1e-05, %v2861_v11  ;;  %v2870_v50 = vadd.f32 1e-05, %v2862_v53  ;;  %v4225_v53 = vld [vmem:[#allocation10 + $0x50] sm:$0xff]  }
 0x87f   : > { %v2881_v35 = vmul.f32 %v4382_v42, %v5609_v63  ;;  %v2854_v37 = vpop.xlane.xlu0 %2853  ;;  %v2856_v54 = vpop.xlane.xlu1 %2855  ;;  %v4226_v42 = vld [vmem:[#allocation10 + $0x10] sm:$0xff]  }
 0x880   : > { %v4384_v46 = vpop.eup %4383  ;;  %4389 = vrsqrt.f32 %v2869_v10  ;;  %v2863_v55 = vmul.f32 0.0078125, %v2854_v37  ;;  %v2864_v62 = vmul.f32 0.0078125, %v2856_v54  ;;  %v4227_v10 = vld [vmem:[#allocation10 + $0x58] sm:$0xff]   ;;  %v4234_v37 = vld [vmem:[#allocation10 + $0x30] sm:$0xff]  }
 0x881   : > { %v2895_v5 = vmul.f32 %v3633_v48, %v2881_v35  ;;  %v2882_v52 = vmul.f32 %v4384_v46, %v5612_v34  ;;  %4391 = vrsqrt.f32 %v2870_v50  ;;  %v4228_v50 = vld [vmem:[#allocation10 + $0x18] sm:$0xff]   ;;  %v4232_v35 = vld [vmem:[#allocation10 + $0x28] sm:$0xff]  }
 0x882   : > { %v4386_v25 = vpop.eup %4385  ;;  %v2871_v47 = vadd.f32 1e-05, %v2863_v55  ;;  %v2872_v41 = vadd.f32 1e-05, %v2864_v62  ;;  %v4235_v54 = vld [vmem:[#allocation10 + $0x78] sm:$0xff]  }
 0x883   : > { %v2896_v44 = vmul.f32 %v3633_v48, %v2882_v52  ;;  %v2909_v63 = vadd.f32 %v3634_v38, %v2895_v5  ;;  %v2883_v60 = vmul.f32 %v4386_v25, %v5617_v40  ;;  %v4236_v46 = vld [vmem:[#allocation10 + $0x38] sm:$0xff]   ;;  %v2937_v55 = vld [vmem:[%s5821_s17] sm:$0x3]  ;;  %s4585_s17 = scalar_lea.vmem %s4584_s3, 2048 }
 0x884   : > { %4393 = vrsqrt.f32 %v2871_v47  ;;  %v5670_v62 = vrot.slane %v2937_v55, %v688_v2  ;;  %v5674_v5 = vrot.slane %v2937_v55, %v692_v4  ;;  %p4587_p2 = scmp.lt.s32.totalorder %s4585_s17, %s4579_s29 }
 0x885   : > { %v2910_v15 = vadd.f32 %v3634_v38, %v2896_v44  ;;  %4395 = vrsqrt.f32 %v2872_v41  ;;  %v2897_v21 = vmul.f32 %v3633_v48, %v2883_v60 }
 0x886   : > { %v4388_v33 = vpop.eup %4387  ;;  %p4588_p1 = por %p4587_p2, %p4586_p12 }
 0x887   : > { %v2917_v3 = vpack.c.bf16 %v2910_v15, %v2909_v63  ;;  %v2884_v34 = vmul.f32 %v4388_v33, %v5624_v20  ;;  %v2911_v17 = vadd.f32 %v3634_v38, %v2897_v21 }
 0x888   : > { %p4589_p13 = pnand %p4588_p1, %p4582_p7 }
 0x889   : > { %3062 = vmatmul.mubr.bf16.vlgmr.msra.gmra.mrb[44].mxu1 %v2917_v3  ;;  %v2898_v43 = vmul.f32 %v3633_v48, %v2884_v34 }
 0x88a   : > { %v4390_v19 = vpop.eup %4389  ;;  %3071 = vmatprep.mubr.bf16.mxu1 %v4666_v56  ;;  %3779 = vmatpush3.bf16.msra.mxu1 %v4222_v30 }
 0x88b   : > { %v4392_v13 = vpop.eup %4391  ;;  %v2912_v39 = vadd.f32 %v3634_v38, %v2898_v43  ;;  %v2885_v49 = vmul.f32 %v4390_v19, %v5632_v14  ;;  %3780 = vmatprep.subr.bf16.mxu1 %v4223_v27 }
 0x88c   : > { %v2886_v40 = vmul.f32 %v4392_v13, %v5627_v7 }
 0x88d   : > { %v2918_v20 = vpack.c.bf16 %v2912_v39, %v2911_v17  ;;  %v2899_v8 = vmul.f32 %v3633_v48, %v2885_v49 }
 0x88e   : > { %3781 = vmatpush3.bf16.msra.mxu1 %v4224_v16  ;;  %v4394_v31 = vpop.eup %4393  ;;  %v2900_v18 = vmul.f32 %v3633_v48, %v2886_v40 }
 0x88f   : > { %v4396_v29 = vpop.eup %4395  ;;  %v2913_v0 = vadd.f32 %v3634_v38, %v2899_v8  ;;  %v2887_v22 = vmul.f32 %v4394_v31, %v5642_v6  ;;  %3782 = vmatprep.subr.bf16.mxu1 %v4225_v53  ;;  %v4229_v6 = vld [vmem:[#allocation10 + $0x60] sm:$0xff]  }
 0x890   : > { %v2914_v32 = vadd.f32 %v3634_v38, %v2900_v18  ;;  %v2888_v12 = vmul.f32 %v4396_v29, %v5635_v61  ;;  %v4230_v61 = vld [vmem:[#allocation10 + $0x20] sm:$0xff]  }
 0x891   : > { %3072 = vmatmul.mubr.bf16.gmra.mrb[48].mxu1 %v2918_v20  ;;  %v2901_v23 = vmul.f32 %v3633_v48, %v2887_v22 }
 0x892   : > { %3081 = vmatprep.mubr.bf16.mxu1 %v4666_v56  ;;  %v2919_v14 = vpack.c.bf16 %v2914_v32, %v2913_v0  ;;  %v2902_v36 = vmul.f32 %v3633_v48, %v2888_v12  ;;  %3783 = vmatpush3.bf16.msra.mxu1 %v4226_v42  ;;  %v4231_v48 = vld [vmem:[#allocation10 + $0x68] sm:$0xff]  }
 0x893   : > { %v2915_v7 = vadd.f32 %v3634_v38, %v2901_v23  ;;  %3784 = vmatprep.subr.bf16.mxu1 %v4227_v10 }
 0x894   : > { %v2916_v24 = vadd.f32 %v3634_v38, %v2902_v36 }
 0x896   : > { %v2920_v11 = vpack.c.bf16 %v2916_v24, %v2915_v7  ;;  %3785 = vmatpush3.bf16.msra.mxu1 %v4228_v50 }
 0x897   : > { %3786 = vmatprep.subr.bf16.mxu1 %v4229_v6 }
 0x899   : > { %3082 = vmatmul.mubr.bf16.gmra.mrb[52].mxu1 %v2919_v14 }
 0x89a   : > { %3091 = vmatprep.mubr.bf16.mxu1 %v4666_v56  ;;  %3787 = vmatpush3.bf16.msra.mxu1 %v4230_v61  ;;  %v4233_v56 = vld [vmem:[#allocation10 + $0x70] sm:$0xff]  }
 0x89b   : > { %3788 = vmatprep.subr.bf16.mxu1 %v4231_v48 }
 0x89e   : > { %3789 = vmatpush3.bf16.msra.mxu1 %v4232_v35 }
 0x89f   : > { %3790 = vmatprep.subr.bf16.mxu1 %v4233_v56 }
 0x8a1   : > { %3092 = vmatmul.mubr.bf16.gmra.mrb[56].mxu1 %v2920_v11 }
 0x8a2   : > { %3791 = vmatpush3.bf16.msra.mxu1 %v4234_v37 }
 0x8a3   : > { %3792 = vmatprep.subr.bf16.mxu1 %v4235_v54 }
 0x8a6   : > { %3793 = vmatpush3.bf16.msra.mxu1 %v4236_v46 }
 0x95c   : > { %v3063_v52 = vpop.f32.mrb[44].mxu1 }
 0x95d   : > { %v3064_v25 = vadd.f32 %v3063_v52, %v5670_v62  ;;  %v3065_v47 = vpop.f32.mrb[45].mxu1 }
 0x95e   : > { %v3066_v41 = vadd.f32 %v3065_v47, %v5674_v5  ;;  %v3067_v38 = vpop.f32.mrb[46].mxu1 }
 0x95f   : > { %v3118_v44 = vmul.f32 0.70710677, %v3064_v25  ;;  %v3068_v63 = vadd.f32 %v3067_v38, %v5670_v62  ;;  %v3069_v15 = vpop.f32.mrb[47].mxu1  ;;  %v3102_v22 = vmul.f32 0.5, %v3064_v25 }
 0x960   : > { %v3119_v60 = vmul.f32 0.70710677, %v3066_v41  ;;  %v3070_v33 = vadd.f32 %v3069_v15, %v5674_v5  ;;  %v3103_v7 = vmul.f32 0.5, %v3066_v41 }
 0x961   : > { %4397 = verf.f32 %v3118_v44  ;;  %v3120_v2 = vmul.f32 0.70710677, %v3068_v63  ;;  %v3104_v12 = vmul.f32 0.5, %v3068_v63 }
 0x962   : > { %4399 = verf.f32 %v3119_v60  ;;  %v3121_v1 = vmul.f32 0.70710677, %v3070_v33  ;;  %v3105_v24 = vmul.f32 0.5, %v3070_v33 }
 0x963   : > { %4401 = verf.f32 %v3120_v2 }
 0x964   : > { %4403 = verf.f32 %v3121_v1  ;;  %v3073_v4 = vpop.f32.mrb[48].mxu1 }
 0x965   : > { %v3074_v30 = vadd.f32 %v3073_v4, %v5670_v62  ;;  %v3075_v3 = vpop.f32.mrb[49].mxu1 }
 0x966   : > { %v3076_v34 = vadd.f32 %v3075_v3, %v5674_v5  ;;  %v3077_v27 = vpop.f32.mrb[50].mxu1 }
 0x967   : > { %v3122_v21 = vmul.f32 0.70710677, %v3074_v30  ;;  %v3078_v43 = vadd.f32 %v3077_v27, %v5670_v62  ;;  %v3079_v19 = vpop.f32.mrb[51].mxu1  ;;  %v3106_v33 = vmul.f32 0.5, %v3074_v30 }
 0x968   : > { %v3123_v16 = vmul.f32 0.70710677, %v3076_v34  ;;  %v3080_v13 = vadd.f32 %v3079_v19, %v5674_v5  ;;  %v3107_v27 = vmul.f32 0.5, %v3076_v34 }
 0x969   : > { %4405 = verf.f32 %v3122_v21  ;;  %v3124_v39 = vmul.f32 0.70710677, %v3078_v43  ;;  %v3108_v2 = vmul.f32 0.5, %v3078_v43 }
 0x96a   : > { %4407 = verf.f32 %v3123_v16  ;;  %v3125_v49 = vmul.f32 0.70710677, %v3080_v13  ;;  %v3109_v21 = vmul.f32 0.5, %v3080_v13 }
 0x96b   : > { %v4398_v40 = vpop.eup %4397  ;;  %4409 = verf.f32 %v3124_v39 }
 0x96c   : > { %v4400_v17 = vpop.eup %4399  ;;  %v3150_v31 = vadd.f32 1.0, %v4398_v40  ;;  %4411 = verf.f32 %v3125_v49  ;;  %v3083_v20 = vpop.f32.mrb[52].mxu1 }
 0x96d   : > { %v4402_v8 = vpop.eup %4401  ;;  %v3151_v18 = vadd.f32 1.0, %v4400_v17  ;;  %v5685_v29 = vadd.f32 %v3083_v20, %v5670_v62  ;;  %v3085_v0 = vpop.f32.mrb[53].mxu1 }
 0x96e   : > { %v4404_v32 = vpop.eup %4403  ;;  %v3152_v14 = vadd.f32 1.0, %v4402_v8  ;;  %v5688_v23 = vadd.f32 %v3085_v0, %v5674_v5  ;;  %v3087_v36 = vpop.f32.mrb[54].mxu1  ;;  %v3166_v10 = vmul.f32 %v3150_v31, %v3102_v22 }
 0x96f   : > { %v3153_v11 = vadd.f32 1.0, %v4404_v32  ;;  %v3126_v53 = vmul.f32 0.70710677, %v5685_v29  ;;  %v3089_v42 = vpop.f32.mrb[55].mxu1  ;;  %v3088_v61 = vadd.f32 %v3087_v36, %v5670_v62  ;;  %v3167_v48 = vmul.f32 %v3151_v18, %v3103_v7 }
 0x970   : > { %v3168_v50 = vmul.f32 %v3152_v14, %v3104_v12  ;;  %v3127_v6 = vmul.f32 0.70710677, %v5688_v23  ;;  %v3090_v56 = vadd.f32 %v3089_v42, %v5674_v5  ;;  %v3110_v36 = vmul.f32 0.5, %v5685_v29 }
 0x971   : > { %v3169_v35 = vmul.f32 %v3153_v11, %v3105_v24  ;;  %4413 = verf.f32 %v3126_v53  ;;  %v3128_v54 = vmul.f32 0.70710677, %v3088_v61  ;;  %v3112_v7 = vmul.f32 0.5, %v3088_v61 }
 0x972   : > { %v3182_v37 = vpack.c.bf16 %v3168_v50, %v3166_v10  ;;  %4415 = verf.f32 %v3127_v6  ;;  %v3129_v55 = vmul.f32 0.70710677, %v3090_v56  ;;  %v3113_v11 = vmul.f32 0.5, %v3090_v56 }
 0x973   : > { %v4406_v46 = vpop.eup %4405  ;;  %v3183_v52 = vpack.c.bf16 %v3169_v35, %v3167_v48  ;;  %4417 = verf.f32 %v3128_v54 }
 0x974   : > { %v4408_v25 = vpop.eup %4407  ;;  %v3154_v47 = vadd.f32 1.0, %v4406_v46  ;;  %v3093_v41 = vpop.f32.mrb[56].mxu1  ;;  %4419 = verf.f32 %v3129_v55 }
 0x975   : > { %v4410_v38 = vpop.eup %4409  ;;  %v3155_v44 = vadd.f32 1.0, %v4408_v25  ;;  %v3094_v63 = vadd.f32 %v3093_v41, %v5670_v62  ;;  %v3095_v15 = vpop.f32.mrb[57].mxu1  ;;  %3357 = vmatprep.mubr.bf16.mxu1 %v3183_v52 }
 0x976   : > { %v4412_v60 = vpop.eup %4411  ;;  %v3156_v1 = vadd.f32 1.0, %v4410_v38  ;;  %v3096_v4 = vadd.f32 %v3095_v15, %v5674_v5  ;;  %v3097_v3 = vpop.f32.mrb[58].mxu1  ;;  %3358 = vmatmul.mubr.bf16.vlgmr.msra.gmra.mrb[60].mxu1 %v3182_v37  ;;  %v3170_v49 = vmul.f32 %v3154_v47, %v3106_v33 }
 0x977   : > { %v3157_v19 = vadd.f32 1.0, %v4412_v60  ;;  %v3130_v16 = vmul.f32 0.70710677, %v3094_v63  ;;  %v3099_v39 = vpop.f32.mrb[59].mxu1  ;;  %v3098_v31 = vadd.f32 %v3097_v3, %v5670_v62  ;;  %v3171_v20 = vmul.f32 %v3155_v44, %v3107_v27 }
 0x978   : > { %v3172_v40 = vmul.f32 %v3156_v1, %v3108_v2  ;;  %v3131_v17 = vmul.f32 0.70710677, %v3096_v4  ;;  %v3100_v30 = vadd.f32 %v3099_v39, %v5674_v5  ;;  %v3111_v5 = vmul.f32 0.5, %v5688_v23 }
 0x979   : > { %v3173_v8 = vmul.f32 %v3157_v19, %v3109_v21  ;;  %4421 = verf.f32 %v3130_v16  ;;  %v3132_v43 = vmul.f32 0.70710677, %v3098_v31  ;;  %v3114_v29 = vmul.f32 0.5, %v3094_v63  ;;  %v3651_v63 = vld [vmem:[%s5822_s10] ss:$0 sm:$0xff] }
 0x97a   : > { %4423 = verf.f32 %v3131_v17  ;;  %v3184_v18 = vpack.c.bf16 %v3172_v40, %v3170_v49  ;;  %v3133_v32 = vmul.f32 0.70710677, %v3100_v30  ;;  %v3116_v61 = vmul.f32 0.5, %v3098_v31 }
 0x97b   : > { %v4414_v0 = vpop.eup %4413  ;;  %v3185_v34 = vpack.c.bf16 %v3173_v8, %v3171_v20  ;;  %4425 = verf.f32 %v3132_v43  ;;  %v3115_v23 = vmul.f32 0.5, %v3096_v4  ;;  %v3117_v56 = vmul.f32 0.5, %v3100_v30 }
 0x97c   : > { %v4416_v13 = vpop.eup %4415  ;;  %v3158_v22 = vadd.f32 1.0, %v4414_v0  ;;  %4427 = verf.f32 %v3133_v32 }
 0x97d   : > { %3365 = vmatprep.mubr.bf16.mxu1 %v3185_v34  ;;  %v4418_v12 = vpop.eup %4417  ;;  %v3159_v14 = vadd.f32 1.0, %v4416_v13 }
 0x97e   : > { %3366 = vmatmul.mubr.bf16.gmra.mrb[64].mxu1 %v3184_v18  ;;  %v4420_v62 = vpop.eup %4419  ;;  %v3160_v24 = vadd.f32 1.0, %v4418_v12  ;;  %v3174_v42 = vmul.f32 %v3158_v22, %v3110_v36 }
 0x97f   : > { %v3161_v53 = vadd.f32 1.0, %v4420_v62  ;;  %v3175_v50 = vmul.f32 %v3159_v14, %v3111_v5 }
 0x980   : > { %v3176_v10 = vmul.f32 %v3160_v24, %v3112_v7 }
 0x981   : > { %v3177_v6 = vmul.f32 %v3161_v53, %v3113_v11 }
 0x982   : > { %v3186_v35 = vpack.c.bf16 %v3176_v10, %v3174_v42 }
 0x983   : > { %v4422_v48 = vpop.eup %4421  ;;  %v3187_v54 = vpack.c.bf16 %v3177_v6, %v3175_v50 }
 0x984   : > { %v4424_v37 = vpop.eup %4423  ;;  %v3162_v46 = vadd.f32 1.0, %v4422_v48 }
 0x985   : > { %v4426_v55 = vpop.eup %4425  ;;  %v3163_v52 = vadd.f32 1.0, %v4424_v37  ;;  %3373 = vmatprep.mubr.bf16.mxu1 %v3187_v54 }
 0x986   : > { %v4428_v25 = vpop.eup %4427  ;;  %v3164_v47 = vadd.f32 1.0, %v4426_v55  ;;  %3374 = vmatmul.mubr.bf16.gmra.mrb[68].mxu1 %v3186_v35  ;;  %v3178_v38 = vmul.f32 %v3162_v46, %v3114_v29 }
 0x987   : > { %v3165_v41 = vadd.f32 1.0, %v4428_v25  ;;  %v3179_v15 = vmul.f32 %v3163_v52, %v3115_v23 }
 0x988   : > { %v3180_v44 = vmul.f32 %v3164_v47, %v3116_v61 }
 0x989   : > { %v3181_v60 = vmul.f32 %v3165_v41, %v3117_v56 }
 0x98a   : > { %v3188_v33 = vpack.c.bf16 %v3180_v44, %v3178_v38 }
 0x98b   : > { %v3189_v2 = vpack.c.bf16 %v3181_v60, %v3179_v15 }
 0x98d   : > { %3381 = vmatprep.mubr.bf16.mxu1 %v3189_v2 }
 0x98e   : > { %3382 = vmatmul.mubr.bf16.gmra.mrb[72].mxu1 %v3188_v33 }
 0xa49   : > { %v3794_v1 = vpop.f32.mrb[60].mxu1 }
 0xa4a   : > { %v3795_v3 = vpop.f32.mrb[61].mxu1 }
 0xa4b   : > { %v3796_v27 = vadd.f32 %v3795_v3, %v3794_v1  ;;  %v3797_v21 = vpop.f32.mrb[62].mxu1 }
 0xa4c   : > { %v3798_v4 = vpop.f32.mrb[63].mxu1 }
 0xa4d   : > { %v3360_v19 = vadd.f32 %v3796_v27, %v3651_v63  ;;  %v3799_v16 = vadd.f32 %v3798_v4, %v3797_v21 }
 0xa4f   : > { %v3390_v39 = vadd.f32 %v3360_v19, %v5577_v58  ;;  %v3363_v49 = vadd.f32 %v3799_v16, %v3651_v63 }
 0xa51   : > { %3398 = vst [vmem:[%s5706_s23] sm:$0xff] %v3390_v39  ;;  %v3391_v40 = vadd.f32 %v3363_v49, %v5581_v28  ;;  %v3800_v17 = vpop.f32.mrb[64].mxu1 }
 0xa52   : > { %v3801_v31 = vpop.f32.mrb[65].mxu1 }
 0xa53   : > { %3399 = vst [vmem:[%s5706_s23 + $0x8] sm:$0xff] %v3391_v40  ;;  %v3802_v20 = vadd.f32 %v3801_v31, %v3800_v17  ;;  %v3803_v8 = vpop.f32.mrb[66].mxu1 }
 0xa54   : > { %v3804_v30 = vpop.f32.mrb[67].mxu1 }
 0xa55   : > { %v3368_v43 = vadd.f32 %v3802_v20, %v3651_v63  ;;  %v3805_v58 = vadd.f32 %v3804_v30, %v3803_v8 }
 0xa57   : > { %v3392_v18 = vadd.f32 %v3368_v43, %v5585_v45  ;;  %v3371_v0 = vadd.f32 %v3805_v58, %v3651_v63 }
 0xa59   : > { %3400 = vst [vmem:[%s5706_s23 + $0x10] sm:$0xff] %v3392_v18  ;;  %v3393_v32 = vadd.f32 %v3371_v0, %v5589_v9  ;;  %v3806_v34 = vpop.f32.mrb[68].mxu1 }
 0xa5a   : > { %v3807_v13 = vpop.f32.mrb[69].mxu1 }
 0xa5b   : > { %3401 = vst [vmem:[%s5706_s23 + $0x18] sm:$0xff] %v3393_v32  ;;  %v3808_v28 = vadd.f32 %v3807_v13, %v3806_v34  ;;  %v3809_v22 = vpop.f32.mrb[70].mxu1 }
 0xa5c   : > { %v3810_v12 = vpop.f32.mrb[71].mxu1 }
 0xa5d   : > { %v3376_v14 = vadd.f32 %v3808_v28, %v3651_v63  ;;  %v3811_v62 = vadd.f32 %v3810_v12, %v3809_v22 }
 0xa5f   : > { %v3394_v36 = vadd.f32 %v3376_v14, %v5597_v26  ;;  %v3379_v7 = vadd.f32 %v3811_v62, %v3651_v63 }
 0xa61   : > { %3402 = vst [vmem:[%s5706_s23 + $0x20] sm:$0xff] %v3394_v36  ;;  %v3395_v45 = vadd.f32 %v3379_v7, %v5593_v59  ;;  %v3812_v24 = vpop.f32.mrb[72].mxu1 }
 0xa62   : > { %v3813_v9 = vpop.f32.mrb[73].mxu1 }
 0xa63   : > { %3403 = vst [vmem:[%s5706_s23 + $0x28] sm:$0xff] %v3395_v45  ;;  %v3814_v5 = vadd.f32 %v3813_v9, %v3812_v24  ;;  %v3815_v11 = vpop.f32.mrb[74].mxu1 }
 0xa64   : > { %v3816_v53 = vpop.f32.mrb[75].mxu1 }
 0xa65   : > { %v3384_v42 = vadd.f32 %v3814_v5, %v3651_v63  ;;  %v3817_v10 = vadd.f32 %v3816_v53, %v3815_v11 }
 0xa67   : > { %v3396_v26 = vadd.f32 %v3384_v42, %v5605_v57  ;;  %v3387_v50 = vadd.f32 %v3817_v10, %v3651_v63 }
 0xa69   : > { %3404 = vst [vmem:[%s5706_s23 + $0x30] sm:$0xff] %v3396_v26  ;;  %v3397_v59 = vadd.f32 %v3387_v50, %v5601_v51 }
 0xa6b   : > { %3405 = vst [vmem:[%s5706_s23 + $0x38] sm:$0xff] %v3397_v59 }
 0xa6c   : > { %4592 = shalt.err (!%p4589_p13)
}
 0xa6d   : > { %s4593_s30 = scalar_lea.hbm %s5725_s16, 1024  ;;  %s4597_s23 = scalar_lea.hbm %s5823_s14, 2048 }
 0xa6e   : > { %p4594_p9 = scmp.ne.s32.totalorder %s5725_s16, %s4593_s30  ;;  %p4598_p4 = scmp.lt.u32.totalorder %s5725_s16, %s5823_s14 }
 0xa6f   : > { %p4599_p8 = scmp.lt.u32.totalorder %s4597_s23, %s4593_s30  ;;  %p4601_p3 = scmp.lt.u32.totalorder %s4593_s30, %s5725_s16 }
 0xa70   : > { %p4595_p0 = pnand %p4594_p9, %p4902_p10 }
 0xa71   : > { %p4600_p6 = por %p4599_p8, %p4598_p4 }
 0xa72   : > { %p4596_p11 = pneg %p4595_p0 }
 0xa73   : > { %p4602_p5 = por %p4601_p3, %p4600_p6 }
 0xa75   : > { %p4603_p7 = pnand %p4602_p5, %p4596_p11 }
 0xa77   : > { %4606 = shalt.err (!%p4603_p7)
}
 0xa78   : > { %s4671_s25 = smov 128   ;;  %s4672_s29 = smov 8  }
 0xa79   : > { %4076 = dma.vmem_to_hbm [thread:$0]  (%p4902_p10), %s5727_s19, 1024, %s5725_s16, %s3407_s22, %s4671_s25, %s4671_s25, %s4672_s29  }
 0xa7a PF: > { %s5824_s21 = sld [smem:[#allocation16_spill]]  ;;  %s5825_s3 = sld [smem:[#allocation17_spill]] }
 0xa7b   : > { %p5827_p2 = scmp.ge.s32.totalorder %s4653_s28, 2 }
 0xa80   : > { %s3436_s17 = sand.u32 1, %s5824_s21   ;;  %p5826_p12 = scmp.ne.s32.totalorder %s5825_s3, 0 }
 0xa81   : > { %s3437_s30 = scalar_lea.sflag [#allocation4], %s3436_s17 }
 0xa82   : > { %p4096_p1 = pnand %p5827_p2, %p5826_p12 }
 0xa84   : > { %4636 = dma.done.wait (!%p4096_p1), %s3437_s30, 1024  }
 0xa85   : > { %4638 = vsyncadd (!%p4096_p1), %s3437_s30, 4294966272  ;;  %p28_p13 = scmp.ge.s32.totalorder %s4892_s15, 4   ;;  %s5828_s25 = smov %s4645_s26 }
 0xa86   : > { %s5829_s26 = smov %s4649_s27  ;;  %s5830_s27 = smov %s4908_s24 }
 0xa87   : > { %s5831_s28 = smov %s4892_s15  ;;  %30 = sbr.rel (!%p28_p13) target bundleno = 13 (0xd), region = 133 }
 0xa8e   :  { %3442 = vsyncpa [#allocation3], 1 }
 0xa8f   :  { %3444 = vsyncpa [#allocation3 + $0x1], 1 }
 0xa90   :  { %3445 = vsyncpa [#allocation6], 1 }
 0xa91   :  { %3446 = vsyncpa [#allocation9], 1 }
 0xa92   :  { %3447 = vsyncpa [#allocation4], 1 }
 0xa93   :  { %3449 = vsyncpa [#allocation4 + $0x1], 1 }

// kernel: tpu_custom_call.1
= control target key start
LH: loop header
LB: loop body
LE: loop exit
PB: predicated region body
PF: predicated region fallthrough
CT: control target
= control target key end

     0   :  { %s5774_s0 = inlined_call_operand.hbm [shape: f32[4,32,128], index: 0, kind: input, shape index: {}]   ;;  %s5775_s1 = inlined_call_operand.vmem [shape: f32[1,128], index: 1, kind: input, shape index: {}]   ;;  %s5776_s2 = inlined_call_operand.vmem [shape: f32[1,128], index: 2, kind: input, shape index: {}]   ;;  %s5777_s3 = inlined_call_operand.hbm [shape: bf16[128,384], index: 3, kind: input, shape index: {}]   ;;  %s5778_s4 = inlined_call_operand.vmem [shape: f32[1,384], index: 4, kind: input, shape index: {}]   ;;  %s5779_s5 = inlined_call_operand.hbm [shape: bf16[128,128], index: 5, kind: input, shape index: {}]   ;;  %s5780_s6 = inlined_call_operand.vmem [shape: f32[1,128], index: 6, kind: input, shape index: {}]   ;;  %s5781_s7 = inlined_call_operand.vmem [shape: f32[1,128], index: 7, kind: input, shape index: {}]   ;;  %s5782_s8 = inlined_call_operand.vmem [shape: f32[1,128], index: 8, kind: input, shape index: {}]   ;;  %s5783_s9 = inlined_call_operand.hbm [shape: bf16[128,256], index: 9, kind: input, shape index: {}]   ;;  %s5784_s10 = inlined_call_operand.vmem [shape: f32[1,256], index: 10, kind: input, shape index: {}]   ;;  %s5785_s11 = inlined_call_operand.hbm [shape: bf16[256,128], index: 11, kind: input, shape index: {}]   ;;  %s5786_s12 = inlined_call_operand.vmem [shape: f32[1,128], index: 12, kind: input, shape index: {}]   ;;  %s5787_s13 = inlined_call_operand.hbm [shape: f32[4,32,128], index: 13, kind: output, shape index: {}]  }
   0x1   :  { %5796 = sst [smem:[#allocation18_spill]] %s5777_s3 }
   0x2   :  { %5797 = sst [smem:[#allocation19_spill]] %s5782_s8 }
   0x3   :  { %5798 = sst [smem:[#allocation20_spill]] %s5784_s10 }
   0x4   :  { %5799 = sst [smem:[#allocation21_spill]] %s5786_s12 }
   0x5   :  { %5800 = sst [smem:[#allocation22_spill]] %s5787_s13 }
   0x6   :  { %18 = vsyncpa [#allocation3], 0 }
   0x7   :  { %20 = vsyncpa [#allocation3 + $0x1], 0 }
   0x8   :  { %21 = vsyncpa [#allocation6], 0 }
   0x9   :  { %22 = vsyncpa [#allocation9], 0 }
   0xa   :  { %23 = vsyncpa [#allocation4], 0 }
   0xb   :  { %25 = vsyncpa [#allocation4 + $0x1], 0  ;;  %s4743_s25 = smov 0   ;;  %s4745_s26 = smov 0  }
   0xc   :  { %s4747_s27 = smov 0   ;;  %s4749_s28 = smov 0  }
   0xd LB: > { %5801 = sst [smem:[#allocation16_spill]] %s4641_s25  ;;  %s4764_s29 = sadd.s32 4294967295, %s4653_s28   ;;  %s4653_s28 = sphi %s4749_s28, %s5831_s28   ;;  %s4649_s27 = sphi %s4747_s27, %s5830_s27   ;;  %s4645_s26 = sphi %s4745_s26, %s5829_s26   ;;  %s4641_s25 = sphi %s4743_s25, %s5828_s25  }
   0xe   : > { %s3532_s30 = sadd.s32 4294967294, %s4653_s28   ;;  %p51_p0 = scmp.ne.s32.totalorder %s4645_s26, %s4641_s25 }
   0xf   : > { %p5790_p1 = scmp.eq.s32.totalorder %s4764_s29, 0  ;;  %p333_p3 = scmp.eq.s32.totalorder %s3532_s30, 1 }
  0x10   : > { %p3533_p5 = scmp.ge.s32.totalorder %s4653_s28, 1  ;;  %p340_p7 = scmp.lt.s32.totalorder %s4653_s28, 3 }
  0x11   : > { %p4773_p4 = por %p5790_p1, %p51_p0  ;;  %p4778_p6 = por %p333_p3, %p51_p0 }
  0x12   : > { %p4783_p8 = pnand %p3533_p5, %p340_p7  ;;  %s4655_s17 = smov [#allocation5]  }
  0x13   : > { %s5802_s14 = scalar_select %p4773_p4, 1, 0 }
  0x14   : > { %s5803_s15 = scalar_select %p4778_p6, 1, 0 }
  0x15   : > { %s5805_s16 = scalar_select %p4783_p8, 1, 0 }
  0x16   : > { %5804 = sst [smem:[#allocation17_spill]] %s5803_s15  ;;  %s358_s18 = sshll.u32 %s4655_s17, 4  ;;  %s4787_s18 = int_to_ptr.vmem [resolvable:$true] %s358_s18 }
  0x17   : > { %p4078_p9 = pneg %p4783_p8  ;;  %s4656_s20 = smov [#allocation8]  }
  0x18   : > { %s396_s21 = sshll.u32 %s4656_s20, 4  ;;  %s5807_s3 = sld [smem:[#allocation18_spill]]  ;;  %s4798_s21 = int_to_ptr.vmem [resolvable:$true] %s396_s21 }
  0x19   : > { %p4794_p11 = pnand %p4078_p9, %p5790_p1 }
  0x1b   : > { %p4808_p13 = pneg %p4794_p11 }
  0x1e   : > { %s4437_s24 = scalar_lea.hbm %s5807_s3, 3072 }
  0x1f   : > { %p4438_p12 = scmp.ne.s32.totalorder %s5807_s3, %s4437_s24  ;;  %p4444_p5 = scmp.lt.u32.totalorder %s4437_s24, %s5807_s3 }
  0x21   : > { %p4440_p0 = pnand %p4808_p13, %p4438_p12 }
  0x23   : > { %p4441_p3 = pneg %p4440_p0 }
  0x25   : > { %p4446_p7 = pnand %p4444_p5, %p4441_p3 }
  0x27   : > { %4449 = shalt.err (!%p4446_p7)
}
  0x28   : > { %s4450_s22 = scalar_lea.vmem %s4787_s18, 3072  ;;  %p4458_p2 = scmp.lt.s32.totalorder %s4787_s18, %s4787_s18 }
  0x29   : > { %p4451_p9 = scmp.ne.s32.totalorder %s4787_s18, %s4450_s22  ;;  %p4459_p6 = scmp.lt.s32.totalorder %s4450_s22, %s4450_s22 }
  0x2b   : > { %p4453_p10 = pnand %p4451_p9, %p4808_p13  ;;  %p4460_p12 = por %p4459_p6, %p4458_p2 }
  0x2d   : > { %p4454_p1 = pneg %p4453_p10 }
  0x2f   : > { %p4461_p0 = pnand %p4460_p12, %p4454_p1 }
  0x31   : > { %4464 = shalt.err (!%p4461_p0)
}
  0x32   : > { %s4657_s23 = smov 192   ;;  %s4658_s25 = smov 12  }
  0x33   : > { %4081 = dma.hbm_to_vmem [thread:$0]  (!%p4794_p11), %s5807_s3, 3072, %s4787_s18, [#allocation6], %s4657_s23, %s4657_s23, %s4658_s25  }
  0x34   : > { %s4465_s13 = scalar_lea.hbm %s5783_s9, 2048 }
  0x35   : > { %p4466_p2 = scmp.ne.s32.totalorder %s5783_s9, %s4465_s13  ;;  %p4472_p10 = scmp.lt.u32.totalorder %s4465_s13, %s5783_s9 }
  0x37   : > { %p4468_p1 = pnand %p4466_p2, %p4808_p13 }
  0x39   : > { %p4469_p6 = pneg %p4468_p1 }
  0x3b   : > { %p4474_p3 = pnand %p4472_p10, %p4469_p6 }
  0x3d   : > { %4477 = shalt.err (!%p4474_p3)
}
  0x3e   : > { %s4478_s18 = scalar_lea.vmem %s4798_s21, 2048  ;;  %p4486_p12 = scmp.lt.s32.totalorder %s4798_s21, %s4798_s21 }
  0x3f   : > { %p4479_p5 = scmp.ne.s32.totalorder %s4798_s21, %s4478_s18  ;;  %p4487_p0 = scmp.lt.s32.totalorder %s4478_s18, %s4478_s18 }
  0x41   : > { %p4481_p7 = pnand %p4479_p5, %p4808_p13  ;;  %p4488_p2 = por %p4487_p0, %p4486_p12 }
  0x43   : > { %p4482_p9 = pneg %p4481_p7 }
  0x45   : > { %p4489_p1 = pnand %p4488_p2, %p4482_p9 }
  0x47   : > { %4492 = shalt.err (!%p4489_p1)
}
  0x48   : > { %s5794_s10 = smov 128   ;;  %s5795_s8 = smov 8  }
  0x49   : > { %4087 = dma.hbm_to_vmem [thread:$0]  (!%p4794_p11), %s5783_s9, 2048, %s4798_s21, [#allocation9], %s5794_s10, %s5794_s10, %s5795_s8  }
  0x4a   : > { %s4661_s23 = smov [#allocation7]   ;;  %s4493_s17 = scalar_lea.hbm %s5779_s5, 1024 }
  0x4b   : > { %s374_s25 = sshll.u32 %s4661_s23, 4  ;;  %p4494_p6 = scmp.ne.s32.totalorder %s5779_s5, %s4493_s17  ;;  %s375_s25 = int_to_ptr.vmem [resolvable:$true] %s374_s25 }
  0x4c   : > { %p4500_p5 = scmp.lt.u32.totalorder %s4493_s17, %s5779_s5 }
  0x4d   : > { %p4496_p10 = pnand %p4494_p6, %p4808_p13 }
  0x4f   : > { %p4497_p3 = pneg %p4496_p10 }
  0x51   : > { %p4502_p7 = pnand %p4500_p5, %p4497_p3 }
  0x53   : > { %4505 = shalt.err (!%p4502_p7)
}
  0x54   : > { %s4506_s21 = scalar_lea.vmem %s375_s25, 1024  ;;  %p4514_p2 = scmp.lt.s32.totalorder %s375_s25, %s375_s25 }
  0x55   : > { %p4507_p9 = scmp.ne.s32.totalorder %s375_s25, %s4506_s21  ;;  %p4515_p1 = scmp.lt.s32.totalorder %s4506_s21, %s4506_s21 }
  0x57   : > { %p4509_p12 = pnand %p4507_p9, %p4808_p13  ;;  %p4516_p4 = por %p4515_p1, %p4514_p2 }
  0x59   : > { %p4510_p0 = pneg %p4509_p12 }
  0x5b   : > { %p4517_p8 = pnand %p4516_p4, %p4510_p0 }
  0x5d   : > { %4520 = shalt.err (!%p4517_p8)
}
  0x5e   : > { %s4662_s12 = smov 64   ;;  %s4663_s13 = smov 4  }
  0x5f   : > { %4084 = dma.hbm_to_vmem [thread:$0]  (!%p4794_p11), %s5779_s5, 1024, %s375_s25, [#allocation6], %s4662_s12, %s4662_s12, %s4663_s13  }
  0x60   : > { %s4664_s24 = smov [#allocation10]   ;;  %s4521_s22 = scalar_lea.hbm %s5785_s11, 2048 }
  0x61   : > { %s412_s30 = sshll.u32 %s4664_s24, 4  ;;  %p4522_p4 = scmp.ne.s32.totalorder %s5785_s11, %s4521_s22  ;;  %s413_s30 = int_to_ptr.vmem [resolvable:$true] %s412_s30 }
  0x62   : > { %p4528_p10 = scmp.lt.u32.totalorder %s4521_s22, %s5785_s11 }
  0x63   : > { %p4524_p8 = pnand %p4522_p4, %p4808_p13 }
  0x65   : > { %p4525_p6 = pneg %p4524_p8 }
  0x67   : > { %p4530_p3 = pnand %p4528_p10, %p4525_p6 }
  0x69   : > { %4533 = shalt.err (!%p4530_p3)
}
  0x6a   : > { %s4534_s25 = scalar_lea.vmem %s413_s30, 2048  ;;  %p4542_p12 = scmp.lt.s32.totalorder %s413_s30, %s413_s30 }
  0x6b   : > { %p4535_p5 = scmp.ne.s32.totalorder %s413_s30, %s4534_s25  ;;  %p4543_p0 = scmp.lt.s32.totalorder %s4534_s25, %s4534_s25 }
  0x6d   : > { %p4537_p7 = pnand %p4535_p5, %p4808_p13  ;;  %p4544_p2 = por %p4543_p0, %p4542_p12 }
  0x6f   : > { %p4538_p9 = pneg %p4537_p7 }
  0x71   : > { %p4545_p1 = pnand %p4544_p2, %p4538_p9 }
  0x73   : > { %4548 = shalt.err (!%p4545_p1)
}
  0x74   : > { %4090 = dma.hbm_to_vmem [thread:$0]  (!%p4794_p11), %s5785_s11, 2048, %s413_s30, [#allocation9], %s4662_s12, %s4662_s12, %s4663_s13  }
  0x75   : > { %s4892_s15 = sadd.s32 1, %s4653_s28   ;;  %s38_s10 = sadd.s32 1, %s4649_s27 }
  0x76   : > { %s35_s19 = ssub.s32 %s4653_s28, %s4892_s15  ;;  %p45_p13 = scmp.ne.s32.totalorder %s4649_s27, %s4645_s26 }
  0x77   : > { %p36_p4 = scmp.eq.s32.totalorder %s35_s19, 0  ;;  %p46_p8 = scmp.eq.s32.totalorder %s4653_s28, 0 }
  0x78   : > { %p5809_p6 = scmp.eq.s32.totalorder %s4764_s29, 1  ;;  %p4103_p3 = scmp.lt.s32.totalorder %s4653_s28, 2 }
  0x79   : > { %s4908_s24 = scalar_select %p36_p4, %s4649_s27, %s38_s10  }
  0x7a   : > { %p4902_p10 = por %p5809_p6, %p45_p13  ;;  %p47_p5 = por %p46_p8, %p45_p13 }
  0x7b   : > { %s429_s17 = sand.u32 1, %s4649_s27   ;;  %s3675_s12 = sshll.u32 %s4653_s28, 10 }
  0x7c   : > { %s3539_s20 = sshll.u32 %s429_s17, 6  ;;  %s4915_s22 = scalar_lea.hbm %s5774_s0, %s3675_s12 }
  0x7d   : > { %s433_s18 = scalar_lea.vmem [#allocation2], %s3539_s20  ;;  %p4919_p11 = pnand %p4103_p3, %p47_p5 }
  0x7e   : > { %s441_s21 = sshll.u32 %s433_s18, 4  ;;  %s4923_s3 = scalar_lea.sflag [#allocation3], %s429_s17  ;;  %s4917_s21 = int_to_ptr.vmem [resolvable:$true] %s441_s21 }
  0x7f   : > { %s4549_s23 = scalar_lea.hbm %s4915_s22, 1024  ;;  %p4551_p9 = pneg %p4919_p11 }
  0x80   : > { %p4550_p7 = scmp.ne.s32.totalorder %s4915_s22, %s4549_s23  ;;  %s4554_s20 = scalar_lea.hbm %s5774_s0, 2048 }
  0x81   : > { %p4555_p2 = scmp.lt.u32.totalorder %s4915_s22, %s5774_s0  ;;  %p4556_p1 = scmp.lt.u32.totalorder %s4554_s20, %s4549_s23 }
  0x82   : > { %p4552_p12 = pnand %p4551_p9, %p4550_p7  ;;  %p4558_p4 = scmp.lt.u32.totalorder %s4549_s23, %s4915_s22 }
  0x83   : > { %p4557_p13 = por %p4556_p1, %p4555_p2 }
  0x84   : > { %p4553_p0 = pneg %p4552_p12 }
  0x85   : > { %p4559_p8 = por %p4558_p4, %p4557_p13 }
  0x87   : > { %p4560_p6 = pnand %p4559_p8, %p4553_p0 }
  0x89   : > { %4563 = shalt.err (!%p4560_p6)
}
  0x8a   : > { %s4564_s17 = scalar_lea.vmem %s4917_s21, 1024  ;;  %s4665_s30 = smov [#allocation2]  }
  0x8b   : > { %p4565_p3 = scmp.ne.s32.totalorder %s4917_s21, %s4564_s17  ;;  %s4569_s18 = sshll.u32 %s4665_s30, 4  ;;  %s4570_s18 = int_to_ptr.vmem [resolvable:$false] %s4569_s18 }
  0x8c   : > { %s4571_s10 = scalar_lea.vmem %s4570_s18, 2048  ;;  %p4572_p12 = scmp.lt.s32.totalorder %s4917_s21, %s4570_s18 }
  0x8d   : > { %p4567_p5 = pnand %p4565_p3, %p4551_p9  ;;  %p4573_p2 = scmp.lt.s32.totalorder %s4571_s10, %s4564_s17 }
  0x8f   : > { %p4568_p7 = pneg %p4567_p5  ;;  %p4574_p1 = por %p4573_p2, %p4572_p12 }
  0x91   : > { %p4575_p13 = pnand %p4574_p1, %p4568_p7 }
  0x93   : > { %4578 = shalt.err (!%p4575_p13)
}
  0x94   : > { %s5812_s23 = smov 8   ;;  %s5813_s19 = smov 128  }
  0x95   : > { %4094 = dma.hbm_to_vmem [thread:$0]  (!%p4919_p11), %s4915_s22, 1024, %s4917_s21, %s4923_s3, %s5813_s19, %s5813_s19, %s5812_s23  }
  0x96   : > { %p5814_p9 = scmp.ne.s32.totalorder %s5805_s16, 0 }
  0x97   : > { %s4957_s20 = sand.u32 (!%p5814_p9), 1, %s4645_s26   ;;  %p5815_p0 = scmp.ne.s32.totalorder (!%p5814_p9), %s5802_s14, 0 }
  0x98   : > { %453 = sbr.rel (%p5814_p9) target bundleno = 2682 (0xa7a), region = 72  ;;  %s3544_s12 = sshll.u32 (!%p5814_p9), %s4957_s20, 6 }
  0x99   : > { %s456_s13 = scalar_lea.sflag (!%p5814_p9), [#allocation3], %s4957_s20  ;;  %s4963_s25 = scalar_lea.vmem (!%p5814_p9), [#allocation2], %s3544_s12 }
  0x9f   : > { %4624 = dma.done.wait (%p5815_p0), %s456_s13, 1024  }
  0xa0   : > { %4626 = vsyncadd (%p5815_p0), %s456_s13, 4294966272  ;;  %p5816_p11 = scmp.eq.s32.totalorder %s4764_s29, 0 }
  0xa2   : > { %4628 = dma.done.wait (%p5816_p11), [#allocation6], 4096   ;;  %p5817_p4 = pmov %p5816_p11 }
  0xa4   : > { %4630 = vsyncadd (%p5817_p4), [#allocation6], 4294963200  ;;  %p5818_p8 = pmov %p5817_p4 }
  0xa5   : > { %p5819_p6 = pmov %p5817_p4 }
  0xa6   : > { %4632 = dma.done.wait (%p5818_p8), [#allocation9], 4096  }
  0xa7   : > { %4634 = vsyncadd (%p5819_p6), [#allocation9], 4294963200  ;;  %v521_v0 = vld [vmem:[%s4963_s25] sm:$0xff]  ;;  %v523_v1 = vld [vmem:[%s4963_s25 + $0x10] sm:$0xff]  ;;  %v4666_v56 = vmov 0   ;;  %vm1075_vm0 = vcmask 261120  }
  0xa8   : > { %531 = vadd.xlane.f32.xlu0 %v521_v0  ;;  %535 = vadd.xlane.f32.xlu1 %v523_v1  ;;  %v522_v2 = vld [vmem:[%s4963_s25 + $0x8] sm:$0xff]  ;;  %v524_v3 = vld [vmem:[%s4963_s25 + $0x18] sm:$0xff]  ;;  %v525_v4 = vld [vmem:[%s4963_s25 + $0x20] sm:$0xff]  ;;  %s4667_s30 = smov 96   ;;  %s4668_s18 = smov 64  }
  0xa9   : > { %v526_v5 = vld [vmem:[%s4963_s25 + $0x28] sm:$0xff]  ;;  %v527_v6 = vld [vmem:[%s4963_s25 + $0x30] sm:$0xff]  ;;  %v528_v7 = vld [vmem:[%s4963_s25 + $0x38] sm:$0xff]  ;;  %861 = vmatprep.mubr.bf16.mxu0 %v4666_v56  ;;  %s4669_s10 = smov 32   ;;  %s5820_s22 = sld [smem:[#allocation19_spill]] }
  0xaa   : > { %v4157_v8 = vld [vmem:[#allocation5 + $0x4] ss:$12 sps:$4 sm:$0xff]   ;;  %v4159_v9 = vld [vmem:[#allocation5] ss:$12 sps:$4 sm:$0xff]   ;;  %v4160_v10 = vld [vmem:[#allocation5 + $0x1c] ss:$12 sps:$4 sm:$0xff]  }
  0xab   : > { %829 = vmatprep.subr.bf16.mxu0 %v4157_v8  ;;  %v4162_v43 = vld [vmem:[#allocation5 + $0x18] ss:$12 sps:$4 sm:$0xff]   ;;  %v4163_v44 = vld [vmem:[#allocation5 + $0x34] ss:$12 sps:$4 sm:$0xff]   ;;  %v4165_v45 = vld [vmem:[#allocation5 + $0x30] ss:$12 sps:$4 sm:$0xff]  }
  0xac   : > { %533 = vadd.xlane.f32.xlu0 %v522_v2  ;;  %537 = vadd.xlane.f32.xlu1 %v524_v3  ;;  %v4166_v46 = vld [vmem:[#allocation5 + $0x4c] ss:$12 sps:$4 sm:$0xff]   ;;  %v4168_v47 = vld [vmem:[#allocation5 + $0x48] ss:$12 sps:$4 sm:$0xff]   ;;  %v4169_v48 = vld [vmem:[#allocation5 + $0x64] ss:$12 sps:$4 sm:$0xff]  }
  0xad   : > { %830 = vmatpush1.bf16.msra.mxu0 %v4159_v9  ;;  %v4171_v49 = vld [vmem:[#allocation5 + $0x60] ss:$12 sps:$4 sm:$0xff]   ;;  %v4172_v50 = vld [vmem:[#allocation5 + $0x7c] ss:$12 sps:$4 sm:$0xff]   ;;  %v4174_v51 = vld [vmem:[#allocation5 + $0x78] ss:$12 sps:$4 sm:$0xff]  }
  0xae   : > { %831 = vmatprep.subr.bf16.mxu0 %v4160_v10  ;;  %v4175_v52 = vld [vmem:[#allocation5 + $0x94] ss:$12 sps:$4 sm:$0xff]   ;;  %v4177_v53 = vld [vmem:[#allocation5 + $0x90] ss:$12 sps:$4 sm:$0xff]   ;;  %v4178_v54 = vld [vmem:[#allocation5 + $0xac] ss:$12 sps:$4 sm:$0xff]  }
  0xaf   : > { %v4180_v55 = vld [vmem:[#allocation5 + $0xa8] ss:$12 sps:$4 sm:$0xff]   ;;  %s5821_s17 = sld [smem:[#allocation20_spill]]  ;;  %s5706_s23 = scalar_lea.vmem [#allocation11], %s3544_s12 }
  0xb0   : > { %539 = vadd.xlane.f32.xlu0 %v525_v4  ;;  %541 = vadd.xlane.f32.xlu1 %v526_v5  ;;  %v4181_v57 = vld [vmem:[#allocation5 + $0x8] ss:$12 sps:$4 sm:$0xff]   ;;  %s3677_s12 = sshll.u32 %s4764_s29, 10  ;;  %s3421_s19 = sshll.u32 %s5706_s23, 4  ;;  %s5727_s19 = int_to_ptr.vmem [resolvable:$true] %s3421_s19 }
  0xb1   : > { %832 = vmatpush1.bf16.msra.mxu0 %v4162_v43  ;;  %s5823_s14 = sld [smem:[#allocation22_spill]]  ;;  %s4579_s29 = scalar_lea.vmem %s5727_s19, 1024 }
  0xb2   : > { %833 = vmatprep.subr.bf16.mxu0 %v4163_v44  ;;  %p4580_p3 = scmp.ne.s32.totalorder %s5727_s19, %s4579_s29  ;;  %s4670_s21 = smov [#allocation11]  }
  0xb3   : > { %s4583_s3 = sshll.u32 %s4670_s21, 4  ;;  %s4584_s3 = int_to_ptr.vmem [resolvable:$false] %s4583_s3 }
  0xb4   : > { %543 = vadd.xlane.f32.xlu0 %v527_v6  ;;  %545 = vadd.xlane.f32.xlu1 %v528_v7  ;;  %p4581_p5 = pnand %p4580_p3, %p4902_p10  ;;  %p4586_p12 = scmp.lt.s32.totalorder %s5727_s19, %s4584_s3 }
  0xb5   : > { %834 = vmatpush1.bf16.msra.mxu0 %v4165_v45  ;;  %v4183_v45 = vld [vmem:[#allocation5 + $0x38] ss:$12 sps:$4 sm:$0xff]  }
  0xb6   : > { %835 = vmatprep.subr.bf16.mxu0 %v4166_v46  ;;  %p4582_p7 = pneg %p4581_p5 }
  0xb7   : > { %s5725_s16 = scalar_lea.hbm %s5823_s14, %s3677_s12 }
  0xb9   : > { %836 = vmatpush1.bf16.msra.mxu0 %v4168_v47 }
  0xba   : > { %837 = vmatprep.subr.bf16.mxu0 %v4169_v48  ;;  %v4184_v48 = vld [vmem:[#allocation5 + $0x50] ss:$12 sps:$4 sm:$0xff]  }
  0xbd   : > { %838 = vmatpush1.bf16.msra.mxu0 %v4171_v49 }
  0xbe   : > { %839 = vmatprep.subr.bf16.mxu0 %v4172_v50 }
  0xc1   : > { %840 = vmatpush1.bf16.msra.mxu0 %v4174_v51 }
  0xc2   : > { %841 = vmatprep.subr.bf16.mxu0 %v4175_v52 }
  0xc5   : > { %842 = vmatpush1.bf16.msra.mxu0 %v4177_v53 }
  0xc6   : > { %843 = vmatprep.subr.bf16.mxu0 %v4178_v54  ;;  %v4185_v54 = vld [vmem:[#allocation5 + $0x68] ss:$12 sps:$4 sm:$0xff]  }
  0xc9   : > { %844 = vmatpush1.bf16.msra.mxu0 %v4180_v55 }
  0xca   : > { %3818 = vmatprep.subr.bf16.mxu0 %v4181_v57 }
 0x135   : > { %v532_v11 = vpop.xlane.xlu0 %531  ;;  %v536_v12 = vpop.xlane.xlu1 %535 }
 0x136   : > { %v548_v13 = vmul.f32 0.0078125, %v532_v11  ;;  %v550_v14 = vmul.f32 0.0078125, %v536_v12 }
 0x138   : > { %v4985_v15 = vsub.f32 %v521_v0, %v548_v13  ;;  %v4987_v16 = vsub.f32 %v523_v1, %v550_v14 }
 0x139   : > { %v534_v17 = vpop.xlane.xlu0 %533  ;;  %v538_v18 = vpop.xlane.xlu1 %537 }
 0x13a   : > { %v549_v19 = vmul.f32 0.0078125, %v534_v17  ;;  %v564_v20 = vmul.f32 %v4985_v15, %v4985_v15  ;;  %v551_v21 = vmul.f32 0.0078125, %v538_v18  ;;  %v566_v22 = vmul.f32 %v4987_v16, %v4987_v16 }
 0x13c   : > { %572 = vadd.xlane.f32.xlu0 %v564_v20  ;;  %v4993_v23 = vsub.f32 %v522_v2, %v549_v19  ;;  %v4995_v24 = vsub.f32 %v524_v3, %v551_v21  ;;  %v3550_v19 = vld [vmem:[%s5775_s1] ss:$0 sm:$0xff] }
 0x13d   : > { %v540_v25 = vpop.xlane.xlu0 %539  ;;  %v542_v26 = vpop.xlane.xlu1 %541 }
 0x13e   : > { %v552_v27 = vmul.f32 0.0078125, %v540_v25  ;;  %v565_v28 = vmul.f32 %v4993_v23, %v4993_v23  ;;  %v553_v29 = vmul.f32 0.0078125, %v542_v26  ;;  %v567_v30 = vmul.f32 %v4995_v24, %v4995_v24 }
 0x140   : > { %576 = vadd.xlane.f32.xlu0 %v566_v22  ;;  %574 = vadd.xlane.f32.xlu1 %v565_v28  ;;  %v5001_v31 = vsub.f32 %v525_v4, %v552_v27  ;;  %v5003_v32 = vsub.f32 %v526_v5, %v553_v29  ;;  %v3551_v28 = vld [vmem:[%s5776_s2] ss:$0 sm:$0xff] }
 0x141   : > { %v544_v33 = vpop.xlane.xlu0 %543  ;;  %v546_v34 = vpop.xlane.xlu1 %545 }
 0x142   : > { %v554_v35 = vmul.f32 0.0078125, %v544_v33  ;;  %v568_v36 = vmul.f32 %v5001_v31, %v5001_v31  ;;  %v555_v37 = vmul.f32 0.0078125, %v546_v34  ;;  %v569_v38 = vmul.f32 %v5003_v32, %v5003_v32 }
 0x144   : > { %578 = vadd.xlane.f32.xlu1 %v567_v30  ;;  %580 = vadd.xlane.f32.xlu0 %v568_v36  ;;  %v5009_v39 = vsub.f32 %v527_v6, %v554_v35  ;;  %v5011_v40 = vsub.f32 %v528_v7, %v555_v37 }
 0x146   : > { %v570_v41 = vmul.f32 %v5009_v39, %v5009_v39  ;;  %v571_v42 = vmul.f32 %v5011_v40, %v5011_v40 }
 0x148   : > { %582 = vadd.xlane.f32.xlu1 %v569_v38  ;;  %584 = vadd.xlane.f32.xlu0 %v570_v41  ;;  %v4182_v38 = vld [vmem:[#allocation5 + $0x20] ss:$12 sps:$4 sm:$0xff]  }
 0x14c   : > { %586 = vadd.xlane.f32.xlu1 %v571_v42 }
 0x1c9   : > { %v573_v58 = vpop.xlane.xlu0 %572 }
 0x1ca   : > { %v588_v59 = vmul.f32 0.0078125, %v573_v58  ;;  %v4186_v58 = vld [vmem:[#allocation5 + $0x80] ss:$12 sps:$4 sm:$0xff]  }
 0x1cc   : > { %v596_v60 = vadd.f32 1e-05, %v588_v59 }
 0x1cd   : > { %v575_v61 = vpop.xlane.xlu1 %574  ;;  %v577_v62 = vpop.xlane.xlu0 %576 }
 0x1ce   : > { %4237 = vrsqrt.f32 %v596_v60  ;;  %v589_v63 = vmul.f32 0.0078125, %v575_v61  ;;  %v590_v0 = vmul.f32 0.0078125, %v577_v62  ;;  %v4187_v62 = vld [vmem:[#allocation5 + $0x98] ss:$12 sps:$4 sm:$0xff]  }
 0x1d0   : > { %v597_v1 = vadd.f32 1e-05, %v589_v63  ;;  %v598_v2 = vadd.f32 1e-05, %v590_v0 }
 0x1d1   : > { %v579_v3 = vpop.xlane.xlu1 %578  ;;  %v581_v4 = vpop.xlane.xlu0 %580 }
 0x1d2   : > { %4239 = vrsqrt.f32 %v597_v1  ;;  %v591_v5 = vmul.f32 0.0078125, %v579_v3  ;;  %v592_v7 = vmul.f32 0.0078125, %v581_v4  ;;  %v5041_v3 = vld [vmem:[%s5778_s4] sm:$0x7] }
 0x1d3   : > { %4241 = vrsqrt.f32 %v598_v2 }
 0x1d4   : > { %v599_v6 = vadd.f32 1e-05, %v591_v5  ;;  %v600_v11 = vadd.f32 1e-05, %v592_v7 }
 0x1d5   : > { %v583_v8 = vpop.xlane.xlu1 %582  ;;  %v585_v13 = vpop.xlane.xlu0 %584 }
 0x1d6   : > { %4243 = vrsqrt.f32 %v599_v6  ;;  %v593_v9 = vmul.f32 0.0078125, %v583_v8  ;;  %v594_v21 = vmul.f32 0.0078125, %v585_v13 }
 0x1d8   : > { %v4238_v10 = vpop.eup %4237  ;;  %v601_v12 = vadd.f32 1e-05, %v593_v9  ;;  %v602_v30 = vadd.f32 1e-05, %v594_v21 }
 0x1d9   : > { %v587_v14 = vpop.xlane.xlu1 %586  ;;  %v612_v17 = vmul.f32 %v4238_v10, %v4985_v15 }
 0x1da   : > { %4245 = vrsqrt.f32 %v601_v12  ;;  %v595_v18 = vmul.f32 0.0078125, %v587_v14 }
 0x1db   : > { %4247 = vrsqrt.f32 %v600_v11  ;;  %v626_v25 = vmul.f32 %v3550_v19, %v612_v17 }
 0x1dc   : > { %v4240_v20 = vpop.eup %4239  ;;  %v603_v27 = vadd.f32 1e-05, %v595_v18 }
 0x1dd   : > { %v613_v22 = vmul.f32 %v4240_v20, %v4993_v23  ;;  %v4242_v26 = vpop.eup %4241  ;;  %v640_v33 = vadd.f32 %v3551_v28, %v626_v25 }
 0x1de   : > { %v614_v35 = vmul.f32 %v4242_v26, %v4987_v16  ;;  %4249 = vrsqrt.f32 %v603_v27 }
 0x1df   : > { %v627_v29 = vmul.f32 %v3550_v19, %v613_v22  ;;  %4251 = vrsqrt.f32 %v602_v30 }
 0x1e0   : > { %v4244_v15 = vpop.eup %4243  ;;  %v628_v42 = vmul.f32 %v3550_v19, %v614_v35 }
 0x1e1   : > { %v641_v34 = vadd.f32 %v3551_v28, %v627_v29  ;;  %v615_v36 = vmul.f32 %v4244_v15, %v4995_v24 }
 0x1e2   : > { %v642_v16 = vadd.f32 %v3551_v28, %v628_v42 }
 0x1e3   : > { %v648_v37 = vpack.c.bf16 %v641_v34, %v640_v33  ;;  %v629_v23 = vmul.f32 %v3550_v19, %v615_v36 }
 0x1e4   : > { %v4246_v41 = vpop.eup %4245 }
 0x1e5   : > { %862 = vmatmul.mubr.bf16.vlgmr.msra.gmra.mrb[0].mxu0 %v648_v37  ;;  %v4248_v43 = vpop.eup %4247  ;;  %v643_v44 = vadd.f32 %v3551_v28, %v629_v23  ;;  %v617_v46 = vmul.f32 %v4246_v41, %v5003_v32 }
 0x1e6   : > { %3819 = vmatpush3.bf16.msra.mxu0 %v4181_v57  ;;  %871 = vmatprep.mubr.bf16.mxu0 %v4666_v56  ;;  %v616_v24 = vmul.f32 %v4248_v43, %v5001_v31 }
 0x1e7   : > { %3820 = vmatprep.subr.bf16.mxu0 %v4182_v38  ;;  %v649_v47 = vpack.c.bf16 %v643_v44, %v642_v16  ;;  %v631_v49 = vmul.f32 %v3550_v19, %v617_v46 }
 0x1e8   : > { %v4250_v50 = vpop.eup %4249  ;;  %v630_v51 = vmul.f32 %v3550_v19, %v616_v24 }
 0x1e9   : > { %v4252_v52 = vpop.eup %4251  ;;  %v645_v53 = vadd.f32 %v3551_v28, %v631_v49  ;;  %v619_v32 = vmul.f32 %v4250_v50, %v5011_v40  ;;  %v4188_v40 = vld [vmem:[#allocation5 + $0xb0] ss:$12 sps:$4 sm:$0xff]  }
 0x1ea   : > { %3821 = vmatpush3.bf16.msra.mxu0 %v4182_v38  ;;  %v644_v55 = vadd.f32 %v3551_v28, %v630_v51  ;;  %v618_v31 = vmul.f32 %v4252_v52, %v5009_v39  ;;  %v686_v39 = vlaneseq }
 0x1eb   : > { %3822 = vmatprep.subr.bf16.mxu0 %v4183_v45  ;;  %v633_v59 = vmul.f32 %v3550_v19, %v619_v32 }
 0x1ec   : > { %v650_v57 = vpack.c.bf16 %v645_v53, %v644_v55  ;;  %v632_v60 = vmul.f32 %v3550_v19, %v618_v31  ;;  %v5035_v1 = vshrl.u32 %v686_v39, 7 }
 0x1ed   : > { %872 = vmatmul.mubr.bf16.gmra.mrb[4].mxu0 %v649_v47  ;;  %v647_v61 = vadd.f32 %v3551_v28, %v633_v59 }
 0x1ee   : > { %3823 = vmatpush3.bf16.msra.mxu0 %v4183_v45  ;;  %881 = vmatprep.mubr.bf16.mxu0 %v4666_v56  ;;  %v646_v63 = vadd.f32 %v3551_v28, %v632_v60  ;;  %v688_v2 = vsub.s32 0, %v5035_v1  ;;  %v692_v4 = vsub.s32 1, %v5035_v1  ;;  %v696_v50 = vsub.s32 2, %v5035_v1 }
 0x1ef   : > { %3824 = vmatprep.subr.bf16.mxu0 %v4184_v48 }
 0x1f0   : > { %v651_v0 = vpack.c.bf16 %v647_v61, %v646_v63  ;;  %v689_v5 = vrot.slane %v5041_v3, %v688_v2  ;;  %v693_v7 = vrot.slane %v5041_v3, %v692_v4  ;;  %v697_v32 = vrot.slane %v5041_v3, %v696_v50 }
 0x1f2   : > { %3825 = vmatpush3.bf16.msra.mxu0 %v4184_v48 }
 0x1f3   : > { %3826 = vmatprep.subr.bf16.mxu0 %v4185_v54 }
 0x1f5   : > { %882 = vmatmul.mubr.bf16.gmra.mrb[8].mxu0 %v650_v57 }
 0x1f6   : > { %3827 = vmatpush3.bf16.msra.mxu0 %v4185_v54  ;;  %891 = vmatprep.mubr.bf16.mxu0 %v4666_v56 }
 0x1f7   : > { %3828 = vmatprep.subr.bf16.mxu0 %v4186_v58 }
 0x1fa   : > { %3829 = vmatpush3.bf16.msra.mxu0 %v4186_v58 }
 0x1fb   : > { %3830 = vmatprep.subr.bf16.mxu0 %v4187_v62 }
 0x1fd   : > { %892 = vmatmul.mubr.bf16.gmra.mrb[12].mxu0 %v651_v0 }
 0x1fe   : > { %3831 = vmatpush3.bf16.msra.mxu0 %v4187_v62  ;;  %3834 = vmatprep.mubr.bf16.mxu0 %v648_v37 }
 0x1ff   : > { %3832 = vmatprep.subr.bf16.mxu0 %v4188_v40 }
 0x202   : > { %3833 = vmatpush3.bf16.msra.mxu0 %v4188_v40 }
 0x205   : > { %3835 = vmatmul.mubr.bf16.vlgmr.msra.gmra.mrb[16].mxu0 %v649_v47 }
 0x206   : > { %3838 = vmatprep.mubr.bf16.mxu0 %v650_v57 }
 0x20d   : > { %3839 = vmatmul.mubr.bf16.gmra.mrb[20].mxu0 %v651_v0 }
 0x2b8   : > { %v863_v6 = vpop.f32.mrb[0].mxu0 }
 0x2b9   : > { %v865_v8 = vpop.f32.mrb[1].mxu0  ;;  %v864_v10 = vadd.f32 %v863_v6, %v689_v5 }
 0x2ba   : > { %v867_v9 = vpop.f32.mrb[2].mxu0  ;;  %v866_v13 = vadd.f32 %v865_v8, %v693_v7 }
 0x2bb   : > { %v868_v11 = vadd.f32 %v867_v9, %v689_v5  ;;  %v869_v12 = vpop.f32.mrb[3].mxu0 }
 0x2bc   : > { %v870_v14 = vadd.f32 %v869_v12, %v693_v7 }
 0x2bd   : > { %v5050_v17 = vpack.c.bf16 %v868_v11, %v864_v10 }
 0x2be   : > { %v5052_v18 = vpack.c.bf16 %v870_v14, %v866_v13 }
 0x2bf   : > { %3846 = vmatprep.mubr.msk.bf16.mxu1 %vm1075_vm0, %v5050_v17 }
 0x2c0   : > { %1011 = vrot.lane.b32.xlu0 %v5052_v18, %s4667_s30  ;;  %v873_v19 = vpop.f32.mrb[4].mxu0  ;;  %4042 = vmatprep.subr.msk.bf16.mxu1 %vm1075_vm0, %v5052_v18  ;;  %v1083_v20 = vsel %vm1075_vm0, %v5052_v18, 0 }
 0x2c1   : > { %v875_v21 = vpop.f32.mrb[5].mxu0  ;;  %3843 = vmatpush3.bf16.xpose.msra.mxu1 %v1083_v20  ;;  %v874_v25 = vadd.f32 %v873_v19, %v689_v5 }
 0x2c2   : > { %v877_v22 = vpop.f32.mrb[6].mxu0  ;;  %v876_v28 = vadd.f32 %v875_v21, %v693_v7 }
 0x2c3   : > { %v878_v26 = vadd.f32 %v877_v22, %v689_v5  ;;  %v879_v27 = vpop.f32.mrb[7].mxu0 }
 0x2c4   : > { %v880_v29 = vadd.f32 %v879_v27, %v693_v7 }
 0x2c5   : > { %v5062_v15 = vpack.c.bf16 %v878_v26, %v874_v25 }
 0x2c6   : > { %v5064_v30 = vpack.c.bf16 %v880_v29, %v876_v28 }
 0x2c7   : > { %985 = vrot.lane.b32.xlu0 %v5062_v15, %s4667_s30 }
 0x2c8   : > { %1013 = vrot.lane.b32.xlu1 %v5064_v30, %s4667_s30  ;;  %v883_v33 = vpop.f32.mrb[8].mxu0  ;;  %4043 = vmatprep.subr.msk.bf16.mxu1 %vm1075_vm0, %v5064_v30  ;;  %v1086_v34 = vsel %vm1075_vm0, %v5064_v30, 0 }
 0x2c9   : > { %v885_v35 = vpop.f32.mrb[9].mxu0  ;;  %3845 = vmatpush3.bf16.xpose.msra.mxu1 %v1086_v34  ;;  %v884_v37 = vadd.f32 %v883_v33, %v689_v5 }
 0x2ca   : > { %v887_v36 = vpop.f32.mrb[10].mxu0  ;;  %v886_v41 = vadd.f32 %v885_v35, %v693_v7 }
 0x2cb   : > { %v888_v38 = vadd.f32 %v887_v36, %v689_v5  ;;  %v889_v23 = vpop.f32.mrb[11].mxu0 }
 0x2cc   : > { %v890_v42 = vadd.f32 %v889_v23, %v693_v7 }
 0x2cd   : > { %v5074_v43 = vpack.c.bf16 %v888_v38, %v884_v37 }
 0x2ce   : > { %v974_v44 = vpack.c.bf16 %v890_v42, %v886_v41 }
 0x2cf   : > { %3854 = vmatprep.mubr.msk.bf16.mxu0 %vm1075_vm0, %v5074_v43 }
 0x2d0   : > { %3847 = vmatmul.mubr.msk.bf16.vlgmr.msra.gmra.mrb[0].mxu1 %vm1075_vm0, %v5062_v15  ;;  %1015 = vrot.lane.b32.xlu1 %v974_v44, %s4667_s30  ;;  %v893_v45 = vpop.f32.mrb[12].mxu0  ;;  %v1144_v46 = vsel %vm1075_vm0, %v974_v44, 0 }
 0x2d1   : > { %4044 = vmatprep.subr.msk.bf16.mxu0 %vm1075_vm0, %v974_v44  ;;  %v895_v16 = vpop.f32.mrb[13].mxu0  ;;  %v894_v47 = vadd.f32 %v893_v45, %v689_v5 }
 0x2d2   : > { %3851 = vmatpush3.bf16.xpose.msra.mxu0 %v1144_v46  ;;  %v897_v24 = vpop.f32.mrb[14].mxu0  ;;  %v896_v51 = vadd.f32 %v895_v16, %v693_v7 }
 0x2d3   : > { %v898_v48 = vadd.f32 %v897_v24, %v689_v5  ;;  %v899_v49 = vpop.f32.mrb[15].mxu0 }
 0x2d4   : > { %v900_v52 = vadd.f32 %v899_v49, %v693_v7  ;;  %983 = vrot.lane.b32.xlu1 %v5050_v17, %s4667_s30 }
 0x2d5   : > { %v976_v53 = vpack.c.bf16 %v898_v48, %v894_v47 }
 0x2d6   : > { %v977_v54 = vpack.c.bf16 %v900_v52, %v896_v51 }
 0x2d8   : > { %1019 = vrot.lane.b32.xlu1 %v5052_v18, %s4668_s18  ;;  %v3836_v55 = vpop.f32.mrb[16].mxu0  ;;  %1017 = vrot.lane.b32.xlu0 %v977_v54, %s4667_s30  ;;  %v1147_v31 = vsel %vm1075_vm0, %v977_v54, 0 }
 0x2d9   : > { %4045 = vmatprep.subr.msk.bf16.mxu0 %vm1075_vm0, %v977_v54  ;;  %v936_v57 = vpop.f32.mrb[17].mxu0  ;;  %v945_v59 = vadd.f32 %v3836_v55, %v697_v32 }
 0x2da   : > { %3853 = vmatpush3.bf16.xpose.msra.mxu0 %v1147_v31  ;;  %v3837_v58 = vpop.f32.mrb[18].mxu0  ;;  %v937_v62 = vadd.f32 %v936_v57, %v697_v32 }
 0x2db   : > { %v948_v60 = vadd.f32 %v3837_v58, %v697_v32  ;;  %v939_v61 = vpop.f32.mrb[19].mxu0 }
 0x2dc   : > { %v940_v63 = vadd.f32 %v939_v61, %v697_v32  ;;  %987 = vrot.lane.b32.xlu1 %v5074_v43, %s4667_s30  ;;  %1021 = vrot.lane.b32.xlu0 %v5064_v30, %s4668_s18 }
 0x2dd   : > { %v5096_v0 = vpack.c.bf16 %v948_v60, %v945_v59 }
 0x2de   : > { %v5098_v40 = vpack.c.bf16 %v940_v63, %v937_v62 }
 0x2e0   : > { %1023 = vrot.lane.b32.xlu1 %v974_v44, %s4668_s18  ;;  %v3840_v39 = vpop.f32.mrb[20].mxu0  ;;  %989 = vrot.lane.b32.xlu0 %v976_v53, %s4667_s30 }
 0x2e1   : > { %3855 = vmatmul.mubr.msk.bf16.vlgmr.msra.gmra.mrb[24].mxu0 %vm1075_vm0, %v976_v53  ;;  %v952_v3 = vpop.f32.mrb[21].mxu0  ;;  %v961_v6 = vadd.f32 %v3840_v39, %v697_v32 }
 0x2e2   : > { %v3841_v5 = vpop.f32.mrb[22].mxu0  ;;  %v953_v9 = vadd.f32 %v952_v3, %v697_v32 }
 0x2e3   : > { %v964_v7 = vadd.f32 %v3841_v5, %v697_v32  ;;  %v955_v8 = vpop.f32.mrb[23].mxu0 }
 0x2e4   : > { %v956_v10 = vadd.f32 %v955_v8, %v697_v32  ;;  %991 = vrot.lane.b32.xlu1 %v5050_v17, %s4668_s18  ;;  %993 = vrot.lane.b32.xlu0 %v5062_v15, %s4668_s18 }
 0x2e5   : > { %v5107_v11 = vpack.c.bf16 %v964_v7, %v961_v6 }
 0x2e6   : > { %v5109_v12 = vpack.c.bf16 %v956_v10, %v953_v9 }
 0x2e8   : > { %1025 = vrot.lane.b32.xlu1 %v977_v54, %s4668_s18  ;;  %1027 = vrot.lane.b32.xlu0 %v5052_v18, %s4669_s10 }
 0x2ec   : > { %995 = vrot.lane.b32.xlu1 %v5074_v43, %s4668_s18  ;;  %997 = vrot.lane.b32.xlu0 %v976_v53, %s4668_s18 }
 0x2f0   : > { %1029 = vrot.lane.b32.xlu1 %v5064_v30, %s4669_s10  ;;  %999 = vrot.lane.b32.xlu0 %v5050_v17, %s4669_s10 }
 0x2f4   : > { %1001 = vrot.lane.b32.xlu1 %v5062_v15, %s4669_s10  ;;  %1031 = vrot.lane.b32.xlu0 %v974_v44, %s4669_s10 }
 0x2f8   : > { %1033 = vrot.lane.b32.xlu1 %v977_v54, %s4669_s10  ;;  %1003 = vrot.lane.b32.xlu0 %v5074_v43, %s4669_s10 }
 0x2fc   : > { %1005 = vrot.lane.b32.xlu1 %v976_v53, %s4669_s10  ;;  %1039 = vrot.lane.b32.xlu0 %v5098_v40, %s4667_s30 }
 0x300   : > { %1041 = vrot.lane.b32.xlu1 %v5096_v0, %s4667_s30  ;;  %1051 = vrot.lane.b32.xlu0 %v5098_v40, %s4668_s18 }
 0x304   : > { %1053 = vrot.lane.b32.xlu1 %v5096_v0, %s4668_s18  ;;  %1045 = vrot.lane.b32.xlu0 %v5107_v11, %s4667_s30 }
 0x308   : > { %1043 = vrot.lane.b32.xlu0 %v5109_v12, %s4667_s30 }
 0x332   : > { %v1012_v13 = vpop.permute.xlu0 %1011 }
 0x333   : > { %4046 = vmatprep.subr.msk.bf16.mxu1 %vm1075_vm0, %v1012_v13  ;;  %v1205_v14 = vsel %vm1075_vm0, %v1012_v13, 0 }
 0x334   : > { %3859 = vmatpush3.bf16.xpose.msra.mxu1 %v1205_v14 }
 0x339   : > { %v986_v21 = vpop.permute.xlu0 %985 }
 0x33a   : > { %v1014_v17 = vpop.permute.xlu1 %1013 }
 0x33b   : > { %4047 = vmatprep.subr.msk.bf16.mxu1 %vm1075_vm0, %v1014_v17  ;;  %v1208_v18 = vsel %vm1075_vm0, %v1014_v17, 0 }
 0x33c   : > { %3861 = vmatpush3.bf16.xpose.msra.mxu1 %v1208_v18 }
 0x342   : > { %v1016_v19 = vpop.permute.xlu1 %1015 }
 0x343   : > { %4048 = vmatprep.subr.msk.bf16.mxu0 %vm1075_vm0, %v1016_v19  ;;  %v1266_v20 = vsel %vm1075_vm0, %v1016_v19, 0 }
 0x344   : > { %3867 = vmatpush3.bf16.xpose.msra.mxu0 %v1266_v20 }
 0x346   : > { %v984_v22 = vpop.permute.xlu1 %983 }
 0x347   : > { %3862 = vmatprep.mubr.msk.bf16.mxu1 %vm1075_vm0, %v984_v22 }
 0x348   : > { %3863 = vmatmul.mubr.msk.bf16.vlgmr.msra.gmra.mrb[4].mxu1 %vm1075_vm0, %v986_v21 }
 0x34a   : > { %v1020_v25 = vpop.permute.xlu1 %1019  ;;  %v1018_v26 = vpop.permute.xlu0 %1017 }
 0x34b   : > { %4049 = vmatprep.subr.msk.bf16.mxu0 %vm1075_vm0, %v1018_v26  ;;  %4050 = vmatprep.subr.msk.bf16.mxu1 %vm1075_vm0, %v1020_v25  ;;  %v1269_v27 = vsel %vm1075_vm0, %v1018_v26, 0  ;;  %v1327_v28 = vsel %vm1075_vm0, %v1020_v25, 0 }
 0x34c   : > { %3869 = vmatpush3.bf16.xpose.msra.mxu0 %v1269_v27  ;;  %3875 = vmatpush3.bf16.xpose.msra.mxu1 %v1327_v28 }
 0x34e   : > { %v988_v29 = vpop.permute.xlu1 %987  ;;  %v1022_v15 = vpop.permute.xlu0 %1021 }
 0x34f   : > { %3870 = vmatprep.mubr.msk.bf16.mxu0 %vm1075_vm0, %v988_v29  ;;  %4051 = vmatprep.subr.msk.bf16.mxu1 %vm1075_vm0, %v1022_v15  ;;  %v1330_v34 = vsel %vm1075_vm0, %v1022_v15, 0 }
 0x352   : > { %v1024_v30 = vpop.permute.xlu1 %1023  ;;  %v990_v33 = vpop.permute.xlu0 %989 }
 0x353   : > { %3871 = vmatmul.mubr.msk.bf16.vlgmr.msra.gmra.mrb[28].mxu0 %vm1075_vm0, %v990_v33  ;;  %4052 = vmatprep.subr.msk.bf16.mxu0 %vm1075_vm0, %v1024_v30  ;;  %v1388_v35 = vsel %vm1075_vm0, %v1024_v30, 0 }
 0x354   : > { %3877 = vmatpush3.bf16.xpose.msra.mxu1 %v1330_v34  ;;  %3883 = vmatpush3.bf16.xpose.msra.mxu0 %v1388_v35 }
 0x356   : > { %v992_v36 = vpop.permute.xlu1 %991  ;;  %v994_v37 = vpop.permute.xlu0 %993 }
 0x357   : > { %3878 = vmatprep.mubr.msk.bf16.mxu1 %vm1075_vm0, %v992_v36 }
 0x35a   : > { %v1026_v38 = vpop.permute.xlu1 %1025  ;;  %v1028_v23 = vpop.permute.xlu0 %1027 }
 0x35b   : > { %3879 = vmatmul.mubr.msk.bf16.vlgmr.msra.gmra.mrb[8].mxu1 %vm1075_vm0, %v994_v37  ;;  %4053 = vmatprep.subr.msk.bf16.mxu0 %vm1075_vm0, %v1026_v38  ;;  %v1391_v41 = vsel %vm1075_vm0, %v1026_v38, 0  ;;  %v1449_v42 = vsel %vm1075_vm0, %v1028_v23, 0 }
 0x35c   : > { %4054 = vmatprep.subr.msk.bf16.mxu1 %vm1075_vm0, %v1028_v23  ;;  %3885 = vmatpush3.bf16.xpose.msra.mxu0 %v1391_v41 }
 0x35d   : > { %3891 = vmatpush3.bf16.xpose.msra.mxu1 %v1449_v42 }
 0x35e   : > { %v996_v43 = vpop.permute.xlu1 %995  ;;  %v998_v44 = vpop.permute.xlu0 %997 }
 0x35f   : > { %3886 = vmatprep.mubr.msk.bf16.mxu0 %vm1075_vm0, %v996_v43 }
 0x362   : > { %v1030_v45 = vpop.permute.xlu1 %1029  ;;  %v1000_v46 = vpop.permute.xlu0 %999 }
 0x363   : > { %v1452_v16 = vsel %vm1075_vm0, %v1030_v45, 0  ;;  %3887 = vmatmul.mubr.msk.bf16.vlgmr.msra.gmra.mrb[32].mxu0 %vm1075_vm0, %v998_v44  ;;  %4055 = vmatprep.subr.msk.bf16.mxu1 %vm1075_vm0, %v1030_v45 }
 0x364   : > { %3894 = vmatprep.mubr.msk.bf16.mxu1 %vm1075_vm0, %v1000_v46 }
 0x365   : > { %3893 = vmatpush3.bf16.xpose.msra.mxu1 %v1452_v16 }
 0x366   : > { %3906 = vmatprep.subr.bf16.mxu1 %v5098_v40  ;;  %v1002_v24 = vpop.permute.xlu1 %1001  ;;  %v1032_v47 = vpop.permute.xlu0 %1031 }
 0x367   : > { %v1510_v48 = vsel %vm1075_vm0, %v1032_v47, 0  ;;  %4056 = vmatprep.subr.msk.bf16.mxu0 %vm1075_vm0, %v1032_v47 }
 0x368   : > { %3899 = vmatpush3.bf16.xpose.msra.mxu0 %v1510_v48 }
 0x36a   : > { %v1034_v49 = vpop.permute.xlu1 %1033  ;;  %v1004_v50 = vpop.permute.xlu0 %1003 }
 0x36b   : > { %4057 = vmatprep.subr.msk.bf16.mxu0 %vm1075_vm0, %v1034_v49  ;;  %3902 = vmatprep.mubr.msk.bf16.mxu0 %vm1075_vm0, %v1004_v50  ;;  %v1513_v51 = vsel %vm1075_vm0, %v1034_v49, 0 }
 0x36c   : > { %3895 = vmatmul.mubr.msk.bf16.vlgmr.msra.gmra.mrb[12].mxu1 %vm1075_vm0, %v1002_v24 }
 0x36d   : > { %3907 = vmatpush3.bf16.msra.mxu1 %v5098_v40 }
 0x36e   : > { %3908 = vmatprep.subr.bf16.mxu1 %v5096_v0  ;;  %v1040_v52 = vpop.permute.xlu0 %1039  ;;  %v1006_v53 = vpop.permute.xlu1 %1005 }
 0x370   : > { %3901 = vmatpush3.bf16.xpose.msra.mxu0 %v1513_v51 }
 0x371   : > { %3909 = vmatpush3.bf16.msra.mxu1 %v5096_v0  ;;  %3922 = vmatprep.subr.bf16.mxu0 %v1040_v52 }
 0x372   : > { %3914 = vmatprep.subr.bf16.mxu1 %v5109_v12  ;;  %v1042_v54 = vpop.permute.xlu1 %1041  ;;  %v5181_v32 = vpop.permute.xlu0 %1051 }
 0x376   : > { %v5238_v27 = vpop.permute.xlu0 %1045  ;;  %v5262_v42 = vpop.permute.xlu1 %1053 }
 0x377   : > { %3903 = vmatmul.mubr.msk.bf16.vlgmr.msra.gmra.mrb[36].mxu0 %vm1075_vm0, %v1006_v53 }
 0x378   : > { %3923 = vmatpush3.bf16.msra.mxu0 %v1040_v52 }
 0x379   : > { %3924 = vmatprep.subr.bf16.mxu0 %v1042_v54 }
 0x37a   : > { %v5246_v30 = vpop.permute.xlu0 %1043 }
 0x37c   : > { %3925 = vmatpush3.bf16.msra.mxu0 %v1042_v54 }
 0x37d   : > { %3938 = vmatprep.subr.bf16.mxu0 %v5181_v32 }
 0x3a3   : > { %v5184_v55 = vpop.f32.mrb[0].mxu1 }
 0x3a4   : > { %v5186_v31 = vpop.f32.mrb[1].mxu1  ;;  %v1570_v57 = vsel %vm1075_vm0, %v5184_v55, -inf }
 0x3a5   : > { %v5190_v58 = vpop.f32.mrb[2].mxu1  ;;  %1571 = vmax.xlane.f32.xlu0 %v1570_v57  ;;  %v1564_v61 = vsel %vm1075_vm0, %v5186_v31, -inf }
 0x3a6   : > { %v5192_v59 = vpop.f32.mrb[3].mxu1  ;;  %v1573_v62 = vsel %vm1075_vm0, %v5190_v58, -inf }
 0x3a7   : > { %v1567_v60 = vsel %vm1075_vm0, %v5192_v59, -inf }
 0x3a8   : > { %1568 = vmax.xlane.f32.xlu1 %v1567_v60 }
 0x3a9   : > { %1565 = vmax.xlane.f32.xlu0 %v1564_v61 }
 0x3ad   : > { %1574 = vmax.xlane.f32.xlu0 %v1573_v62 }
 0x3b4   : > { %v5200_v63 = vpop.f32.mrb[24].mxu0 }
 0x3b5   : > { %v5202_v39 = vpop.f32.mrb[25].mxu0  ;;  %v1582_v3 = vsel %vm1075_vm0, %v5200_v63, -inf }
 0x3b6   : > { %1583 = vmax.xlane.f32.xlu0 %v1582_v3  ;;  %v5206_v5 = vpop.f32.mrb[26].mxu0  ;;  %v1576_v8 = vsel %vm1075_vm0, %v5202_v39, -inf }
 0x3b7   : > { %v5208_v6 = vpop.f32.mrb[27].mxu0  ;;  %v1585_v7 = vsel %vm1075_vm0, %v5206_v5, -inf }
 0x3b8   : > { %1586 = vmax.xlane.f32.xlu1 %v1585_v7  ;;  %v1579_v9 = vsel %vm1075_vm0, %v5208_v6, -inf }
 0x3ba   : > { %1577 = vmax.xlane.f32.xlu0 %v1576_v8 }
 0x3bc   : > { %1580 = vmax.xlane.f32.xlu1 %v1579_v9 }
 0x41b   : > { %v5216_v10 = vpop.f32.mrb[4].mxu1 }
 0x41c   : > { %v5218_v13 = vpop.f32.mrb[5].mxu1  ;;  %v1594_v14 = vsel %vm1075_vm0, %v5216_v10, -inf }
 0x41d   : > { %1595 = vmax.xlane.f32.xlu0 %v1594_v14  ;;  %v5222_v17 = vpop.f32.mrb[6].mxu1  ;;  %v1588_v20 = vsel %vm1075_vm0, %v5218_v13, -inf }
 0x41e   : > { %v5224_v18 = vpop.f32.mrb[7].mxu1  ;;  %v1597_v19 = vsel %vm1075_vm0, %v5222_v17, -inf }
 0x41f   : > { %1598 = vmax.xlane.f32.xlu1 %v1597_v19  ;;  %v1591_v21 = vsel %vm1075_vm0, %v5224_v18, -inf }
 0x421   : > { %1589 = vmax.xlane.f32.xlu0 %v1588_v20 }
 0x423   : > { %1592 = vmax.xlane.f32.xlu1 %v1591_v21 }
 0x426   : > { %v5232_v22 = vpop.f32.mrb[28].mxu0 }
 0x427   : > { %v5234_v25 = vpop.f32.mrb[29].mxu0  ;;  %v1606_v26 = vsel %vm1075_vm0, %v5232_v22, -inf }
 0x428   : > { %1607 = vmax.xlane.f32.xlu0 %v1606_v26  ;;  %v5240_v28 = vpop.f32.mrb[30].mxu0  ;;  %v1600_v41 = vsel %vm1075_vm0, %v5234_v25, -inf }
 0x429   : > { %v5242_v29 = vpop.f32.mrb[31].mxu0  ;;  %v1609_v15 = vsel %vm1075_vm0, %v5240_v28, -inf }
 0x42a   : > { %1610 = vmax.xlane.f32.xlu1 %v1609_v15  ;;  %v1603_v43 = vsel %vm1075_vm0, %v5242_v29, -inf }
 0x42e   : > { %v5248_v33 = vpop.f32.mrb[8].mxu1 }
 0x42f   : > { %v5250_v34 = vpop.f32.mrb[9].mxu1  ;;  %v1618_v35 = vsel %vm1075_vm0, %v5248_v33, -inf }
 0x430   : > { %1619 = vmax.xlane.f32.xlu0 %v1618_v35  ;;  %v5254_v36 = vpop.f32.mrb[10].mxu1  ;;  %v1612_v24 = vsel %vm1075_vm0, %v5250_v34, -inf }
 0x431   : > { %v5256_v37 = vpop.f32.mrb[11].mxu1  ;;  %v1621_v38 = vsel %vm1075_vm0, %v5254_v36, -inf }
 0x432   : > { %1622 = vmax.xlane.f32.xlu1 %v1621_v38  ;;  %v1572_v23 = vpop.xlane.xlu0 %1571  ;;  %v1615_v49 = vsel %vm1075_vm0, %v5256_v37, -inf }
 0x433   : > { %v1662_v46 = vsub.f32 %v5184_v55, %v1572_v23 }
 0x434   : > { %1601 = vmax.xlane.f32.xlu0 %v1600_v41 }
 0x435   : > { %v1569_v50 = vpop.xlane.xlu1 %1568  ;;  %v1696_v52 = vmul.f32 1.442695, %v1662_v46 }
 0x436   : > { %1604 = vmax.xlane.f32.xlu1 %v1603_v43  ;;  %v5266_v44 = vpop.f32.mrb[32].mxu0  ;;  %v1566_v45 = vpop.xlane.xlu0 %1565  ;;  %v1661_v57 = vsub.f32 %v5192_v59, %v1569_v50 }
 0x437   : > { %v5269_v16 = vpop.f32.mrb[33].mxu0  ;;  %v1660_v53 = vsub.f32 %v5186_v31, %v1566_v45  ;;  %v1630_v55 = vsel %vm1075_vm0, %v5266_v44, -inf  ;;  %4253 = vpow2.f32 %v1696_v52 }
 0x438   : > { %1613 = vmax.xlane.f32.xlu0 %v1612_v24  ;;  %v5273_v47 = vpop.f32.mrb[34].mxu0  ;;  %v1624_v14 = vsel %vm1075_vm0, %v5269_v16, -inf }
 0x439   : > { %v5275_v48 = vpop.f32.mrb[35].mxu0  ;;  %v1633_v61 = vsel %vm1075_vm0, %v5273_v47, -inf  ;;  %v1692_v62 = vmul.f32 1.442695, %v1660_v53 }
 0x43a   : > { %1616 = vmax.xlane.f32.xlu1 %v1615_v49  ;;  %v1575_v51 = vpop.xlane.xlu0 %1574  ;;  %v1627_v19 = vsel %vm1075_vm0, %v5275_v48, -inf }
 0x43b   : > { %v1663_v54 = vsub.f32 %v5190_v58, %v1575_v51  ;;  %v1694_v58 = vmul.f32 1.442695, %v1661_v57 }
 0x43c   : > { %1631 = vmax.xlane.f32.xlu0 %v1630_v55 }
 0x43d   : > { %v1698_v60 = vmul.f32 1.442695, %v1663_v54 }
 0x43e   : > { %1634 = vmax.xlane.f32.xlu1 %v1633_v61 }
 0x43f   : > { %v5286_v3 = vpop.f32.mrb[12].mxu1  ;;  %4255 = vpow2.f32 %v1698_v60 }
 0x440   : > { %v5288_v7 = vpop.f32.mrb[13].mxu1  ;;  %v1642_v31 = vsel %vm1075_vm0, %v5286_v3, -inf  ;;  %4257 = vpow2.f32 %v1692_v62 }
 0x441   : > { %1643 = vmax.xlane.f32.xlu0 %v1642_v31  ;;  %v5292_v8 = vpop.f32.mrb[14].mxu1  ;;  %4259 = vpow2.f32 %v1694_v58  ;;  %v1636_v20 = vsel %vm1075_vm0, %v5288_v7, -inf  ;;  %v5304_v21 = vpop.eup %4253 }
 0x442   : > { %v5294_v59 = vpop.f32.mrb[15].mxu1  ;;  %v1645_v9 = vsel %vm1075_vm0, %v5292_v8, -inf  ;;  %v1762_v41 = vsel %vm1075_vm0, %v5304_v21, 0.0 }
 0x443   : > { %1646 = vmax.xlane.f32.xlu1 %v1645_v9  ;;  %v1639_v26 = vsel %vm1075_vm0, %v5294_v59, -inf  ;;  %v1584_v55 = vpop.xlane.xlu0 %1583 }
 0x444   : > { %v1666_v60 = vsub.f32 %v5200_v63, %v1584_v55 }
 0x445   : > { %1625 = vmax.xlane.f32.xlu0 %v1624_v14  ;;  %v1587_v57 = vpop.xlane.xlu1 %1586 }
 0x446   : > { %v1667_v62 = vsub.f32 %v5206_v5, %v1587_v57  ;;  %v1704_v58 = vmul.f32 1.442695, %v1666_v60 }
 0x447   : > { %1628 = vmax.xlane.f32.xlu1 %v1627_v19  ;;  %v1578_v61 = vpop.xlane.xlu0 %1577 }
 0x448   : > { %v1664_v9 = vsub.f32 %v5202_v39, %v1578_v61  ;;  %v1706_v14 = vmul.f32 1.442695, %v1667_v62  ;;  %4261 = vpow2.f32 %v1704_v58 }
 0x449   : > { %1637 = vmax.xlane.f32.xlu0 %v1636_v20  ;;  %v5310_v35 = vpop.eup %4255  ;;  %v1581_v31 = vpop.xlane.xlu1 %1580 }
 0x44a   : > { %v5308_v15 = vpop.f32.mrb[36].mxu0  ;;  %v5318_v43 = vpop.eup %4257  ;;  %v1765_v46 = vsel %vm1075_vm0, %v5310_v35, 0.0  ;;  %v1665_v19 = vsub.f32 %v5208_v6, %v1581_v31  ;;  %v1700_v20 = vmul.f32 1.442695, %v1664_v9  ;;  %4263 = vpow2.f32 %v1706_v14 }
 0x44b   : > { %1640 = vmax.xlane.f32.xlu1 %v1639_v26  ;;  %v5312_v38 = vpop.f32.mrb[37].mxu0  ;;  %v5324_v24 = vpop.eup %4259  ;;  %v1756_v49 = vsel %vm1075_vm0, %v5318_v43, 0.0  ;;  %v1654_v51 = vsel %vm1075_vm0, %v5308_v15, -inf }
 0x44c   : > { %v5314_v23 = vpop.f32.mrb[38].mxu0  ;;  %v1759_v50 = vsel %vm1075_vm0, %v5324_v24, 0.0  ;;  %v1648_v53 = vsel %vm1075_vm0, %v5312_v38, -inf  ;;  %v1702_v26 = vmul.f32 1.442695, %v1665_v19  ;;  %4265 = vpow2.f32 %v1700_v20 }
 0x44d   : > { %1763 = vadd.xlane.f32.xlu0 %v1762_v41  ;;  %v5320_v45 = vpop.f32.mrb[39].mxu0  ;;  %v1657_v52 = vsel %vm1075_vm0, %v5314_v23, -inf }
 0x44e   : > { %v1651_v54 = vsel %vm1075_vm0, %v5320_v45, -inf  ;;  %4267 = vpow2.f32 %v1702_v26 }
 0x44f   : > { %1766 = vadd.xlane.f32.xlu1 %v1765_v46 }
 0x451   : > { %1757 = vadd.xlane.f32.xlu0 %v1756_v49 }
 0x452   : > { %v5346_v41 = vpop.eup %4261 }
 0x453   : > { %1760 = vadd.xlane.f32.xlu1 %v1759_v50  ;;  %v1774_v63 = vsel %vm1075_vm0, %v5346_v41, 0.0 }
 0x454   : > { %v5348_v46 = vpop.eup %4263 }
 0x455   : > { %1655 = vmax.xlane.f32.xlu0 %v1654_v51  ;;  %v1777_v39 = vsel %vm1075_vm0, %v5348_v46, 0.0 }
 0x456   : > { %v5352_v5 = vpop.eup %4265 }
 0x457   : > { %1658 = vmax.xlane.f32.xlu1 %v1657_v52  ;;  %v1768_v49 = vsel %vm1075_vm0, %v5352_v5, 0.0 }
 0x458   : > { %v5356_v6 = vpop.eup %4267 }
 0x459   : > { %1649 = vmax.xlane.f32.xlu0 %v1648_v53  ;;  %v1771_v50 = vsel %vm1075_vm0, %v5356_v6, 0.0 }
 0x45b   : > { %1652 = vmax.xlane.f32.xlu1 %v1651_v54 }
 0x46c   : > { %1057 = vrot.lane.b32.xlu1 %v5107_v11, %s4668_s18 }
 0x46f   : > { %1055 = vrot.lane.b32.xlu0 %v5109_v12, %s4668_s18 }
 0x48e   : > { %1775 = vadd.xlane.f32.xlu0 %v1774_v63 }
 0x490   : > { %1778 = vadd.xlane.f32.xlu1 %v1777_v39 }
 0x492   : > { %1769 = vadd.xlane.f32.xlu0 %v1768_v49 }
 0x494   : > { %1772 = vadd.xlane.f32.xlu1 %v1771_v50 }
 0x4aa   : > { %v1596_v51 = vpop.xlane.xlu0 %1595 }
 0x4ab   : > { %v1670_v52 = vsub.f32 %v5216_v10, %v1596_v51 }
 0x4ac   : > { %v1599_v53 = vpop.xlane.xlu1 %1598 }
 0x4ad   : > { %v1712_v54 = vmul.f32 1.442695, %v1670_v52  ;;  %v1671_v55 = vsub.f32 %v5222_v17, %v1599_v53 }
 0x4ae   : > { %v1590_v57 = vpop.xlane.xlu0 %1589 }
 0x4af   : > { %4269 = vpow2.f32 %v1712_v54  ;;  %v1714_v60 = vmul.f32 1.442695, %v1671_v55  ;;  %v1668_v61 = vsub.f32 %v5218_v13, %v1590_v57 }
 0x4b0   : > { %v1593_v62 = vpop.xlane.xlu1 %1592 }
 0x4b1   : > { %4271 = vpow2.f32 %v1714_v60  ;;  %v1708_v31 = vmul.f32 1.442695, %v1668_v61  ;;  %v1669_v58 = vsub.f32 %v5224_v18, %v1593_v62 }
 0x4b3   : > { %4273 = vpow2.f32 %v1708_v31  ;;  %v1710_v9 = vmul.f32 1.442695, %v1669_v58 }
 0x4b5   : > { %4275 = vpow2.f32 %v1710_v9  ;;  %v1608_v14 = vpop.xlane.xlu0 %1607 }
 0x4b6   : > { %v1674_v10 = vsub.f32 %v5232_v22, %v1608_v14 }
 0x4b7   : > { %v1611_v19 = vpop.xlane.xlu1 %1610 }
 0x4b8   : > { %v1720_v20 = vmul.f32 1.442695, %v1674_v10  ;;  %v1675_v17 = vsub.f32 %v5240_v28, %v1611_v19 }
 0x4b9   : > { %v5368_v26 = vpop.eup %4269 }
 0x4ba   : > { %4277 = vpow2.f32 %v1720_v20  ;;  %v1722_v63 = vmul.f32 1.442695, %v1675_v17  ;;  %v1786_v13 = vsel %vm1075_vm0, %v5368_v26, 0.0 }
 0x4bb   : > { %v5372_v39 = vpop.eup %4271  ;;  %1787 = vadd.xlane.f32.xlu0 %v1786_v13 }
 0x4bc   : > { %4279 = vpow2.f32 %v1722_v63  ;;  %v1789_v18 = vsel %vm1075_vm0, %v5372_v39, 0.0 }
 0x4bd   : > { %v5376_v49 = vpop.eup %4273  ;;  %1790 = vadd.xlane.f32.xlu1 %v1789_v18  ;;  %v1620_v22 = vpop.xlane.xlu0 %1619 }
 0x4be   : > { %v1678_v28 = vsub.f32 %v5248_v33, %v1620_v22  ;;  %v1780_v50 = vsel %vm1075_vm0, %v5376_v49, 0.0 }
 0x4bf   : > { %v5381_v51 = vpop.eup %4275  ;;  %v1623_v52 = vpop.xlane.xlu1 %1622  ;;  %1781 = vadd.xlane.f32.xlu0 %v1780_v50 }
 0x4c0   : > { %v1728_v53 = vmul.f32 1.442695, %v1678_v28  ;;  %v1679_v54 = vsub.f32 %v5254_v36, %v1623_v52  ;;  %v1783_v55 = vsel %vm1075_vm0, %v5381_v51, 0.0 }
 0x4c1   : > { %1784 = vadd.xlane.f32.xlu1 %v1783_v55  ;;  %v1602_v57 = vpop.xlane.xlu0 %1601 }
 0x4c2   : > { %4281 = vpow2.f32 %v1728_v53  ;;  %v1730_v60 = vmul.f32 1.442695, %v1679_v54  ;;  %v1672_v61 = vsub.f32 %v5234_v25, %v1602_v57 }
 0x4c3   : > { %v1605_v33 = vpop.xlane.xlu1 %1604 }
 0x4c4   : > { %v5387_v62 = vpop.eup %4277  ;;  %4283 = vpow2.f32 %v1730_v60  ;;  %v1716_v31 = vmul.f32 1.442695, %v1672_v61  ;;  %v1673_v58 = vsub.f32 %v5242_v29, %v1605_v33 }
 0x4c5   : > { %v1614_v9 = vpop.xlane.xlu0 %1613  ;;  %v1798_v36 = vsel %vm1075_vm0, %v5387_v62, 0.0 }
 0x4c6   : > { %v5392_v14 = vpop.eup %4279  ;;  %4285 = vpow2.f32 %v1716_v31  ;;  %v1718_v10 = vmul.f32 1.442695, %v1673_v58  ;;  %v1676_v19 = vsub.f32 %v5250_v34, %v1614_v9  ;;  %1799 = vadd.xlane.f32.xlu0 %v1798_v36 }
 0x4c7   : > { %v1617_v20 = vpop.xlane.xlu1 %1616  ;;  %v1801_v25 = vsel %vm1075_vm0, %v5392_v14, 0.0 }
 0x4c8   : > { %4287 = vpow2.f32 %v1718_v10  ;;  %v1724_v17 = vmul.f32 1.442695, %v1676_v19  ;;  %v1677_v63 = vsub.f32 %v5256_v37, %v1617_v20  ;;  %1802 = vadd.xlane.f32.xlu1 %v1801_v25 }
 0x4c9   : > { %v1632_v29 = vpop.xlane.xlu0 %1631 }
 0x4ca   : > { %4289 = vpow2.f32 %v1724_v17  ;;  %v1726_v13 = vmul.f32 1.442695, %v1677_v63  ;;  %v1682_v18 = vsub.f32 %v5266_v44, %v1632_v29 }
 0x4cb   : > { %v1635_v22 = vpop.xlane.xlu1 %1634 }
 0x4cc   : > { %v5399_v28 = vpop.eup %4281  ;;  %4291 = vpow2.f32 %v1726_v13  ;;  %v1736_v34 = vmul.f32 1.442695, %v1682_v18  ;;  %v1683_v9 = vsub.f32 %v5273_v47, %v1635_v22 }
 0x4cd   : > { %v1810_v50 = vsel %vm1075_vm0, %v5399_v28, 0.0 }
 0x4ce   : > { %v5403_v52 = vpop.eup %4283  ;;  %4293 = vpow2.f32 %v1736_v34  ;;  %v1644_v53 = vpop.xlane.xlu0 %1643  ;;  %1811 = vadd.xlane.f32.xlu0 %v1810_v50  ;;  %v1738_v47 = vmul.f32 1.442695, %v1683_v9 }
 0x4cf   : > { %v1686_v37 = vsub.f32 %v5286_v3, %v1644_v53  ;;  %v1813_v54 = vsel %vm1075_vm0, %v5403_v52, 0.0 }
 0x4d0   : > { %v5408_v55 = vpop.eup %4285  ;;  %v1647_v44 = vpop.xlane.xlu1 %1646  ;;  %1814 = vadd.xlane.f32.xlu1 %v1813_v54 }
 0x4d1   : > { %v1744_v57 = vmul.f32 1.442695, %v1686_v37  ;;  %v1792_v60 = vsel %vm1075_vm0, %v5408_v55, 0.0  ;;  %v1687_v10 = vsub.f32 %v5292_v8, %v1647_v44 }
 0x4d2   : > { %v5412_v61 = vpop.eup %4287  ;;  %v1626_v33 = vpop.xlane.xlu0 %1625  ;;  %1793 = vadd.xlane.f32.xlu0 %v1792_v60 }
 0x4d3   : > { %4295 = vpow2.f32 %v1744_v57  ;;  %v1680_v31 = vsub.f32 %v5269_v16, %v1626_v33  ;;  %v1795_v3 = vsel %vm1075_vm0, %v5412_v61, 0.0  ;;  %v1746_v8 = vmul.f32 1.442695, %v1687_v10 }
 0x4d4   : > { %v5417_v58 = vpop.eup %4289  ;;  %v1629_v36 = vpop.xlane.xlu1 %1628  ;;  %1796 = vadd.xlane.f32.xlu1 %v1795_v3 }
 0x4d5   : > { %v1732_v19 = vmul.f32 1.442695, %v1680_v31  ;;  %v1804_v20 = vsel %vm1075_vm0, %v5417_v58, 0.0 }
 0x4d6   : > { %v5423_v25 = vpop.eup %4291  ;;  %v1638_v17 = vpop.xlane.xlu0 %1637  ;;  %1805 = vadd.xlane.f32.xlu0 %v1804_v20 }
 0x4d7   : > { %4297 = vpow2.f32 %v1732_v19  ;;  %v1684_v16 = vsub.f32 %v5288_v7, %v1638_v17  ;;  %v1807_v63 = vsel %vm1075_vm0, %v5423_v25, 0.0  ;;  %v1681_v7 = vsub.f32 %v5275_v48, %v1629_v36 }
 0x4d8   : > { %v5428_v29 = vpop.eup %4293  ;;  %v1641_v13 = vpop.xlane.xlu1 %1640  ;;  %1808 = vadd.xlane.f32.xlu1 %v1807_v63 }
 0x4d9   : > { %v1740_v18 = vmul.f32 1.442695, %v1684_v16  ;;  %v1822_v22 = vsel %vm1075_vm0, %v5428_v29, 0.0  ;;  %v1734_v60 = vmul.f32 1.442695, %v1681_v7  ;;  %v1685_v33 = vsub.f32 %v5294_v59, %v1641_v13 }
 0x4da   : > { %v1764_v34 = vpop.xlane.xlu0 %1763  ;;  %1823 = vadd.xlane.f32.xlu0 %v1822_v22 }
 0x4db   : > { %4299 = vpow2.f32 %v1740_v18  ;;  %v1742_v10 = vmul.f32 1.442695, %v1685_v33 }
 0x4dc   : > { %4301 = vpow2.f32 %v1738_v47  ;;  %v1767_v50 = vpop.xlane.xlu1 %1766 }
 0x4dd   : > { %v5432_v53 = vpop.eup %4295  ;;  %4303 = vpow2.f32 %v1746_v8 }
 0x4de   : > { %4305 = vrcp.f32 %v1767_v50  ;;  %v1758_v37 = vpop.xlane.xlu0 %1757  ;;  %v1834_v54 = vsel %vm1075_vm0, %v5432_v53, 0.0 }
 0x4df   : > { %4307 = vrcp.f32 %v1758_v37  ;;  %1835 = vadd.xlane.f32.xlu1 %v1834_v54 }
 0x4e0   : > { %4309 = vrcp.f32 %v1764_v34  ;;  %v1761_v44 = vpop.xlane.xlu1 %1760 }
 0x4e1   : > { %v5437_v57 = vpop.eup %4297  ;;  %4311 = vrcp.f32 %v1761_v44 }
 0x4e2   : > { %v1656_v31 = vpop.xlane.xlu0 %1655  ;;  %v1816_v3 = vsel %vm1075_vm0, %v5437_v57, 0.0  ;;  %4313 = vpow2.f32 %v1734_v60 }
 0x4e3   : > { %v1690_v48 = vsub.f32 %v5308_v15, %v1656_v31  ;;  %1817 = vadd.xlane.f32.xlu0 %v1816_v3 }
 0x4e4   : > { %v1659_v9 = vpop.xlane.xlu1 %1658 }
 0x4e5   : > { %v5443_v36 = vpop.eup %4299  ;;  %v1752_v19 = vmul.f32 1.442695, %v1690_v48  ;;  %v1691_v20 = vsub.f32 %v5314_v23, %v1659_v9 }
 0x4e6   : > { %v5446_v17 = vpop.eup %4301  ;;  %v1650_v16 = vpop.xlane.xlu0 %1649  ;;  %v1828_v59 = vsel %vm1075_vm0, %v5443_v36, 0.0 }
 0x4e7   : > { %v5450_v63 = vpop.eup %4303  ;;  %4315 = vpow2.f32 %v1752_v19  ;;  %v1754_v47 = vmul.f32 1.442695, %v1691_v20  ;;  %v1688_v15 = vsub.f32 %v5312_v38, %v1650_v16  ;;  %1829 = vadd.xlane.f32.xlu1 %v1828_v59  ;;  %v1825_v50 = vsel %vm1075_vm0, %v5446_v17, 0.0 }
 0x4e8   : > { %v4306_v13 = vpop.eup %4305  ;;  %v1653_v8 = vpop.xlane.xlu1 %1652  ;;  %4317 = vpow2.f32 %v1742_v10 }
 0x4e9   : > { %v4308_v18 = vpop.eup %4307  ;;  %v1748_v22 = vmul.f32 1.442695, %v1688_v15  ;;  %v1689_v23 = vsub.f32 %v5320_v45, %v1653_v8  ;;  %4319 = vpow2.f32 %v1754_v47  ;;  %v1887_v37 = vmul.f32 %v4306_v13, %v5310_v35 }
 0x4ea   : > { %v4310_v34 = vpop.eup %4309  ;;  %v1884_v38 = vmul.f32 %v4308_v18, %v5318_v43  ;;  %v1837_v45 = vsel %vm1075_vm0, %v5450_v63, 0.0  ;;  %v5500_v47 = vpop.permute.xlu0 %1055 }
 0x4eb   : > { %v4312_v7 = vpop.eup %4311  ;;  %v1750_v54 = vmul.f32 1.442695, %v1689_v23  ;;  %1826 = vadd.xlane.f32.xlu1 %v1825_v50  ;;  %v1886_v60 = vmul.f32 %v4310_v34, %v5304_v21  ;;  %4321 = vpow2.f32 %v1748_v22 }
 0x4ec   : > { %v1885_v44 = vmul.f32 %v4312_v7, %v5324_v24  ;;  %v5462_v31 = vpop.eup %4313  ;;  %v5502_v15 = vpop.permute.xlu1 %1057 }
 0x4ed   : > { %4323 = vpow2.f32 %v1750_v54  ;;  %v1917_v3 = vpack.c.bf16 %v1887_v37, %v1886_v60  ;;  %v1819_v21 = vsel %vm1075_vm0, %v5462_v31, 0.0 }
 0x4ee   : > { %v1916_v33 = vpack.c.bf16 %v1885_v44, %v1884_v38 }
 0x4ef   : > { %1838 = vadd.xlane.f32.xlu1 %v1837_v45 }
 0x4f0   : > { %3910 = vmatprep.mubr.msk.bf16.mxu1 %vm1075_vm0, %v1916_v33 }
 0x4f1   : > { %v5465_v35 = vpop.eup %4315  ;;  %3911 = vmatmul.mubr.msk.bf16.vlgmr.msra.gmra.mrb[16].mxu1 %vm1075_vm0, %v1917_v3 }
 0x4f2   : > { %3915 = vmatpush3.bf16.msra.mxu1 %v5109_v12  ;;  %v1846_v43 = vsel %vm1075_vm0, %v5465_v35, 0.0  ;;  %v5473_v24 = vpop.eup %4317 }
 0x4f3   : > { %3916 = vmatprep.subr.bf16.mxu1 %v5107_v11  ;;  %1820 = vadd.xlane.f32.xlu1 %v1819_v21  ;;  %v5476_v48 = vpop.eup %4319  ;;  %v1831_v9 = vsel %vm1075_vm0, %v5473_v24, 0.0 }
 0x4f4   : > { %1847 = vadd.xlane.f32.xlu0 %v1846_v43  ;;  %v1849_v19 = vsel %vm1075_vm0, %v5476_v48, 0.0 }
 0x4f5   : > { %v5481_v10 = vpop.eup %4321 }
 0x4f6   : > { %3917 = vmatpush3.bf16.msra.mxu1 %v5107_v11  ;;  %v1840_v16 = vsel %vm1075_vm0, %v5481_v10, 0.0 }
 0x4f7   : > { %3930 = vmatprep.subr.bf16.mxu1 %v5246_v30  ;;  %1832 = vadd.xlane.f32.xlu1 %v1831_v9  ;;  %v5486_v20 = vpop.eup %4323 }
 0x4f8   : > { %1850 = vadd.xlane.f32.xlu0 %v1849_v19  ;;  %v1843_v59 = vsel %vm1075_vm0, %v5486_v20, 0.0 }
 0x4fb   : > { %1841 = vadd.xlane.f32.xlu1 %v1840_v16 }
 0x4fc   : > { %1844 = vadd.xlane.f32.xlu0 %v1843_v59 }
 0x50c   : > { %1065 = vrot.lane.b32.xlu1 %v5096_v0, %s4669_s10 }
 0x510   : > { %1067 = vrot.lane.b32.xlu1 %v5109_v12, %s4669_s10 }
 0x512   : > { %1063 = vrot.lane.b32.xlu0 %v5098_v40, %s4669_s10 }
 0x514   : > { %1069 = vrot.lane.b32.xlu1 %v5107_v11, %s4669_s10  ;;  %s5822_s10 = sld [smem:[#allocation21_spill]] }
 0x51b   : > { %v1776_v13 = vpop.xlane.xlu0 %1775 }
 0x51d   : > { %v1779_v8 = vpop.xlane.xlu1 %1778 }
 0x51e   : > { %4325 = vrcp.f32 %v1779_v8 }
 0x51f   : > { %v1770_v18 = vpop.xlane.xlu0 %1769 }
 0x520   : > { %4327 = vrcp.f32 %v1770_v18 }
 0x521   : > { %4329 = vrcp.f32 %v1776_v13  ;;  %v1773_v0 = vpop.xlane.xlu1 %1772 }
 0x522   : > { %4331 = vrcp.f32 %v1773_v0 }
 0x528   : > { %v4326_v22 = vpop.eup %4325 }
 0x529   : > { %v1891_v40 = vmul.f32 %v4326_v22, %v5348_v46 }
 0x52a   : > { %v4328_v12 = vpop.eup %4327 }
 0x52b   : > { %v4330_v23 = vpop.eup %4329  ;;  %v1888_v11 = vmul.f32 %v4328_v12, %v5352_v5 }
 0x52c   : > { %v4332_v34 = vpop.eup %4331  ;;  %v1890_v7 = vmul.f32 %v4330_v23, %v5346_v41 }
 0x52d   : > { %v1889_v50 = vmul.f32 %v4332_v34, %v5356_v6 }
 0x52e   : > { %v1919_v54 = vpack.c.bf16 %v1891_v40, %v1890_v7 }
 0x52f   : > { %v1918_v37 = vpack.c.bf16 %v1889_v50, %v1888_v11 }
 0x531   : > { %3918 = vmatprep.mubr.msk.bf16.mxu1 %vm1075_vm0, %v1918_v37 }
 0x532   : > { %3919 = vmatmul.mubr.msk.bf16.vlgmr.msra.gmra.mrb[20].mxu1 %vm1075_vm0, %v1919_v54 }
 0x533   : > { %3931 = vmatpush3.bf16.msra.mxu1 %v5246_v30 }
 0x534   : > { %3932 = vmatprep.subr.bf16.mxu1 %v5238_v27 }
 0x537   : > { %3933 = vmatpush3.bf16.msra.mxu1 %v5238_v27 }
 0x538   : > { %3946 = vmatprep.subr.bf16.mxu1 %v5500_v47 }
 0x548   : > { %v1788_v46 = vpop.xlane.xlu0 %1787 }
 0x54a   : > { %v1791_v5 = vpop.xlane.xlu1 %1790 }
 0x54b   : > { %4333 = vrcp.f32 %v1791_v5 }
 0x54c   : > { %v1782_v6 = vpop.xlane.xlu0 %1781 }
 0x54d   : > { %4335 = vrcp.f32 %v1782_v6 }
 0x54e   : > { %4337 = vrcp.f32 %v1788_v46  ;;  %v1785_v41 = vpop.xlane.xlu1 %1784 }
 0x54f   : > { %4339 = vrcp.f32 %v1785_v41 }
 0x553   : > { %v1800_v60 = vpop.xlane.xlu0 %1799 }
 0x555   : > { %v4334_v38 = vpop.eup %4333  ;;  %v1803_v3 = vpop.xlane.xlu1 %1802 }
 0x556   : > { %v1895_v30 = vmul.f32 %v4334_v38, %v5372_v39  ;;  %4341 = vrcp.f32 %v1803_v3 }
 0x557   : > { %v4336_v44 = vpop.eup %4335 }
 0x558   : > { %v4338_v45 = vpop.eup %4337  ;;  %v1892_v27 = vmul.f32 %v4336_v44, %v5376_v49 }
 0x559   : > { %v4340_v33 = vpop.eup %4339  ;;  %v1894_v43 = vmul.f32 %v4338_v45, %v5368_v26 }
 0x55a   : > { %v1893_v21 = vmul.f32 %v4340_v33, %v5381_v51 }
 0x55b   : > { %v1812_v9 = vpop.xlane.xlu0 %1811  ;;  %v1921_v59 = vpack.c.bf16 %v1895_v30, %v1894_v43 }
 0x55c   : > { %v1920_v19 = vpack.c.bf16 %v1893_v21, %v1892_v27 }
 0x55d   : > { %v1815_v16 = vpop.xlane.xlu1 %1814 }
 0x55e   : > { %3926 = vmatprep.mubr.msk.bf16.mxu0 %vm1075_vm0, %v1920_v19 }
 0x55f   : > { %3927 = vmatmul.mubr.msk.bf16.vlgmr.msra.gmra.mrb[40].mxu0 %vm1075_vm0, %v1921_v59  ;;  %v1794_v13 = vpop.xlane.xlu0 %1793 }
 0x560   : > { %3939 = vmatpush3.bf16.msra.mxu0 %v5181_v32  ;;  %4343 = vrcp.f32 %v1794_v13  ;;  %v4342_v51 = vpop.eup %4341 }
 0x561   : > { %4345 = vrcp.f32 %v1800_v60  ;;  %3940 = vmatprep.subr.bf16.mxu0 %v5262_v42  ;;  %v1797_v39 = vpop.xlane.xlu1 %1796  ;;  %v1899_v32 = vmul.f32 %v4342_v51, %v5392_v14 }
 0x562   : > { %4347 = vrcp.f32 %v1797_v39 }
 0x563   : > { %4349 = vrcp.f32 %v1815_v16  ;;  %v1806_v26 = vpop.xlane.xlu0 %1805 }
 0x564   : > { %3941 = vmatpush3.bf16.msra.mxu0 %v5262_v42  ;;  %4351 = vrcp.f32 %v1806_v26 }
 0x565   : > { %4353 = vrcp.f32 %v1812_v9  ;;  %v1809_v49 = vpop.xlane.xlu1 %1808 }
 0x566   : > { %4355 = vrcp.f32 %v1809_v49 }
 0x56a   : > { %v4344_v8 = vpop.eup %4343 }
 0x56b   : > { %v4346_v18 = vpop.eup %4345  ;;  %v1896_v12 = vmul.f32 %v4344_v8, %v5408_v55  ;;  %v4189_v8 = vld [vmem:[#allocation7] sm:$0xff]  }
 0x56c   : > { %v4348_v0 = vpop.eup %4347  ;;  %v1898_v40 = vmul.f32 %v4346_v18, %v5387_v62  ;;  %v1836_v37 = vpop.xlane.xlu1 %1835 }
 0x56d   : > { %v4350_v22 = vpop.eup %4349  ;;  %v1897_v23 = vmul.f32 %v4348_v0, %v5412_v61 }
 0x56e   : > { %v4352_v34 = vpop.eup %4351  ;;  %v1903_v7 = vmul.f32 %v4350_v22, %v5403_v52  ;;  %v1923_v54 = vpack.c.bf16 %v1899_v32, %v1898_v40  ;;  %v1824_v52 = vpop.xlane.xlu0 %1823  ;;  %v4190_v40 = vld [vmem:[#allocation7 + $0x8] sm:$0xff]  }
 0x56f   : > { %v4354_v11 = vpop.eup %4353  ;;  %v1922_v42 = vpack.c.bf16 %v1897_v23, %v1896_v12  ;;  %v1900_v46 = vmul.f32 %v4352_v34, %v5417_v58 }
 0x570   : > { %v4356_v50 = vpop.eup %4355  ;;  %v1902_v55 = vmul.f32 %v4354_v11, %v5399_v28 }
 0x571   : > { %3934 = vmatprep.mubr.msk.bf16.mxu1 %vm1075_vm0, %v1922_v42  ;;  %v1901_v14 = vmul.f32 %v4356_v50, %v5423_v25 }
 0x572   : > { %3935 = vmatmul.mubr.msk.bf16.vlgmr.msra.gmra.mrb[24].mxu1 %vm1075_vm0, %v1923_v54  ;;  %v1925_v5 = vpack.c.bf16 %v1903_v7, %v1902_v55  ;;  %v1818_v25 = vpop.xlane.xlu0 %1817  ;;  %v4195_v55 = vld [vmem:[#allocation7 + $0x30] sm:$0xff]  }
 0x573   : > { %3947 = vmatpush3.bf16.msra.mxu1 %v5500_v47  ;;  %v1924_v62 = vpack.c.bf16 %v1901_v14, %v1900_v46  ;;  %v4193_v46 = vld [vmem:[#allocation7 + $0x20] sm:$0xff]   ;;  %v4194_v14 = vld [vmem:[#allocation7 + $0x28] sm:$0xff]  }
 0x574   : > { %v1830_v61 = vpop.xlane.xlu1 %1829  ;;  %3948 = vmatprep.subr.bf16.mxu1 %v5502_v15 }
 0x575   : > { %3942 = vmatprep.mubr.msk.bf16.mxu0 %vm1075_vm0, %v1924_v62 }
 0x576   : > { %3943 = vmatmul.mubr.msk.bf16.vlgmr.msra.gmra.mrb[44].mxu0 %vm1075_vm0, %v1925_v5 }
 0x577   : > { %3949 = vmatpush3.bf16.msra.mxu1 %v5502_v15 }
 0x578   : > { %v1827_v58 = vpop.xlane.xlu1 %1826 }
 0x579   : > { %4357 = vrcp.f32 %v1827_v58 }
 0x57a   : > { %4359 = vrcp.f32 %v1818_v25 }
 0x57b   : > { %4361 = vrcp.f32 %v1824_v52 }
 0x57c   : > { %v1839_v6 = vpop.xlane.xlu1 %1838 }
 0x580   : > { %v1821_v28 = vpop.xlane.xlu1 %1820 }
 0x581   : > { %4363 = vrcp.f32 %v1821_v28  ;;  %v1848_v47 = vpop.xlane.xlu0 %1847 }
 0x582   : > { %4365 = vrcp.f32 %v1830_v61 }
 0x583   : > { %4367 = vrcp.f32 %v1839_v6  ;;  %v4358_v44 = vpop.eup %4357 }
 0x584   : > { %4369 = vrcp.f32 %v1836_v37  ;;  %v1833_v41 = vpop.xlane.xlu1 %1832  ;;  %v4360_v60 = vpop.eup %4359  ;;  %v1907_v3 = vmul.f32 %v4358_v44, %v5446_v17 }
 0x585   : > { %4371 = vrcp.f32 %v1833_v41  ;;  %v1851_v38 = vpop.xlane.xlu0 %1850  ;;  %v4362_v33 = vpop.eup %4361  ;;  %v1904_v43 = vmul.f32 %v4360_v60, %v5437_v57 }
 0x586   : > { %4373 = vrcp.f32 %v1851_v38  ;;  %v1906_v16 = vmul.f32 %v4362_v33, %v5428_v29 }
 0x587   : > { %4375 = vrcp.f32 %v1848_v47 }
 0x588   : > { %v1842_v15 = vpop.xlane.xlu1 %1841  ;;  %v1927_v49 = vpack.c.bf16 %v1907_v3, %v1906_v16 }
 0x589   : > { %4377 = vrcp.f32 %v1842_v15  ;;  %v1845_v45 = vpop.xlane.xlu0 %1844 }
 0x58a   : > { %4379 = vrcp.f32 %v1845_v45 }
 0x58b   : > { %v4364_v30 = vpop.eup %4363 }
 0x58c   : > { %v4366_v27 = vpop.eup %4365  ;;  %v1066_v21 = vpop.permute.xlu1 %1065  ;;  %v1905_v9 = vmul.f32 %v4364_v30, %v5462_v31 }
 0x58d   : > { %v4368_v19 = vpop.eup %4367  ;;  %v1064_v59 = vpop.permute.xlu0 %1063  ;;  %v1908_v57 = vmul.f32 %v4366_v27, %v5443_v36 }
 0x58e   : > { %v4370_v13 = vpop.eup %4369  ;;  %3954 = vmatprep.subr.bf16.mxu0 %v1064_v59  ;;  %v1926_v39 = vpack.c.bf16 %v1905_v9, %v1904_v43  ;;  %v1911_v51 = vmul.f32 %v4368_v19, %v5450_v63  ;;  %v4191_v63 = vld [vmem:[#allocation7 + $0x10] sm:$0xff]  }
 0x58f   : > { %v4372_v26 = vpop.eup %4371  ;;  %3955 = vmatpush3.bf16.msra.mxu0 %v1064_v59  ;;  %v1910_v0 = vmul.f32 %v4370_v13, %v5432_v53  ;;  %v4196_v59 = vld [vmem:[#allocation7 + $0x38] sm:$0xff]  }
 0x590   : > { %3956 = vmatprep.subr.bf16.mxu0 %v1066_v21  ;;  %v1068_v17 = vpop.permute.xlu1 %1067  ;;  %3950 = vmatprep.mubr.msk.bf16.mxu1 %vm1075_vm0, %v1926_v39  ;;  %v1909_v31 = vmul.f32 %v4372_v26, %v5473_v24  ;;  %v4374_v18 = vpop.eup %4373 }
 0x591   : > { %3951 = vmatmul.mubr.msk.bf16.vlgmr.msra.gmra.mrb[28].mxu1 %vm1075_vm0, %v1927_v49  ;;  %3962 = vmatprep.subr.bf16.mxu1 %v1068_v17  ;;  %v4376_v29 = vpop.eup %4375  ;;  %v1915_v23 = vmul.f32 %v4374_v18, %v5476_v48  ;;  %v1929_v36 = vpack.c.bf16 %v1911_v51, %v1910_v0 }
 0x592   : > { %3963 = vmatpush3.bf16.msra.mxu1 %v1068_v17  ;;  %v1928_v32 = vpack.c.bf16 %v1909_v31, %v1908_v57  ;;  %v1914_v53 = vmul.f32 %v4376_v29, %v5465_v35 }
 0x593   : > { %v4378_v22 = vpop.eup %4377  ;;  %3957 = vmatpush3.bf16.msra.mxu0 %v1066_v21 }
 0x594   : > { %v4380_v12 = vpop.eup %4379  ;;  %v1070_v34 = vpop.permute.xlu1 %1069  ;;  %3958 = vmatprep.mubr.msk.bf16.mxu0 %vm1075_vm0, %v1928_v32  ;;  %v1912_v24 = vmul.f32 %v4378_v22, %v5481_v10  ;;  %3982 = vmatprep.subr.bf16.mxu0 %v4189_v8  ;;  %v1931_v48 = vpack.c.bf16 %v1915_v23, %v1914_v53  ;;  %v4192_v10 = vld [vmem:[#allocation7 + $0x18] sm:$0xff]  }
 0x595   : > { %3964 = vmatprep.subr.bf16.mxu1 %v1070_v34  ;;  %v1913_v11 = vmul.f32 %v4380_v12, %v5486_v20 }
 0x596   : > { %3959 = vmatmul.mubr.msk.bf16.vlgmr.msra.gmra.mrb[48].mxu0 %vm1075_vm0, %v1929_v36  ;;  %3965 = vmatpush3.bf16.msra.mxu1 %v1070_v34 }
 0x597   : > { %v1930_v42 = vpack.c.bf16 %v1913_v11, %v1912_v24  ;;  %3983 = vmatpush3.bf16.msra.mxu0 %v4189_v8  ;;  %3970 = vmatprep.subr.bf16.mxu1 %v4191_v63 }
 0x598   : > { %3984 = vmatprep.subr.bf16.mxu0 %v4190_v40 }
 0x599   : > { %3966 = vmatprep.mubr.msk.bf16.mxu1 %vm1075_vm0, %v1930_v42 }
 0x59a   : > { %3967 = vmatmul.mubr.msk.bf16.vlgmr.msra.gmra.mrb[32].mxu1 %vm1075_vm0, %v1931_v48 }
 0x59b   : > { %3985 = vmatpush3.bf16.msra.mxu0 %v4190_v40  ;;  %3971 = vmatpush3.bf16.msra.mxu1 %v4191_v63 }
 0x59c   : > { %3972 = vmatprep.subr.bf16.mxu1 %v4192_v10  ;;  %3994 = vmatprep.subr.bf16.mxu0 %v4193_v46 }
 0x59f   : > { %3973 = vmatpush3.bf16.msra.mxu1 %v4192_v10 }
 0x5c4   : > { %v3912_v20 = vpop.f32.mrb[16].mxu1 }
 0x5c5   : > { %v1972_v50 = vpop.f32.mrb[17].mxu1 }
 0x5c6   : > { %v3913_v35 = vpop.f32.mrb[18].mxu1 }
 0x5c7   : > { %v2373_v7 = vpack.c.bf16 %v3913_v35, %v3912_v20  ;;  %v1975_v37 = vpop.f32.mrb[19].mxu1  ;;  %v3632_v35 = vld [vmem:[%s5780_s6] ss:$0 sm:$0xff] }
 0x5c8   : > { %v2372_v54 = vpack.c.bf16 %v1975_v37, %v1972_v50 }
 0x5ca   : > { %3986 = vmatprep.mubr.msk.bf16.mxu0 %vm1075_vm0, %v2372_v54 }
 0x5cb   : > { %3987 = vmatmul.mubr.msk.bf16.vlgmr.msra.gmra.mrb[52].mxu0 %vm1075_vm0, %v2373_v7 }
 0x5cc   : > { %3995 = vmatpush3.bf16.msra.mxu0 %v4193_v46 }
 0x5cd   : > { %3996 = vmatprep.subr.bf16.mxu0 %v4194_v14 }
 0x5d0   : > { %3997 = vmatpush3.bf16.msra.mxu0 %v4194_v14 }
 0x5d1   : > { %4006 = vmatprep.subr.bf16.mxu0 %v4195_v55 }
 0x605   : > { %v3920_v62 = vpop.f32.mrb[20].mxu1 }
 0x606   : > { %v2027_v61 = vpop.f32.mrb[21].mxu1 }
 0x607   : > { %v3921_v5 = vpop.f32.mrb[22].mxu1 }
 0x608   : > { %v2375_v52 = vpack.c.bf16 %v3921_v5, %v3920_v62  ;;  %v2030_v58 = vpop.f32.mrb[23].mxu1 }
 0x609   : > { %v2374_v25 = vpack.c.bf16 %v2030_v58, %v2027_v61 }
 0x60b   : > { %3990 = vmatprep.mubr.msk.bf16.mxu0 %vm1075_vm0, %v2374_v25 }
 0x60c   : > { %3991 = vmatmul.mubr.msk.bf16.gmra.mrb[56].mxu0 %vm1075_vm0, %v2375_v52  ;;  %v4429_v52 = vld [vmem:[%s4963_s25] sm:$0xff] }
 0x632   : > { %v3928_v6 = vpop.f32.mrb[40].mxu0 }
 0x633   : > { %v2082_v28 = vpop.f32.mrb[41].mxu0 }
 0x634   : > { %v3929_v47 = vpop.f32.mrb[42].mxu0 }
 0x635   : > { %v2377_v41 = vpack.c.bf16 %v3929_v47, %v3928_v6  ;;  %v2085_v38 = vpop.f32.mrb[43].mxu0  ;;  %v4430_v6 = vld [vmem:[%s4963_s25 + $0x8] sm:$0xff] }
 0x636   : > { %v2376_v44 = vpack.c.bf16 %v2085_v38, %v2082_v28 }
 0x638   : > { %3974 = vmatprep.mubr.msk.bf16.mxu1 %vm1075_vm0, %v2376_v44 }
 0x639   : > { %3975 = vmatmul.mubr.msk.bf16.vlgmr.msra.gmra.mrb[36].mxu1 %vm1075_vm0, %v2377_v41 }
 0x645   : > { %v3936_v15 = vpop.f32.mrb[24].mxu1 }
 0x646   : > { %v2137_v60 = vpop.f32.mrb[25].mxu1 }
 0x647   : > { %v3937_v45 = vpop.f32.mrb[26].mxu1 }
 0x648   : > { %v2379_v33 = vpack.c.bf16 %v3937_v45, %v3936_v15  ;;  %v2140_v30 = vpop.f32.mrb[27].mxu1 }
 0x649   : > { %v2378_v3 = vpack.c.bf16 %v2140_v30, %v2137_v60  ;;  %v3944_v27 = vpop.f32.mrb[44].mxu0  ;;  %v4431_v60 = vld [vmem:[%s4963_s25 + $0x10] sm:$0xff] }
 0x64a   : > { %v2192_v21 = vpop.f32.mrb[45].mxu0 }
 0x64b   : > { %v3945_v43 = vpop.f32.mrb[46].mxu0  ;;  %3978 = vmatprep.mubr.msk.bf16.mxu1 %vm1075_vm0, %v2378_v3 }
 0x64c   : > { %v2381_v9 = vpack.c.bf16 %v3945_v43, %v3944_v27  ;;  %v2195_v19 = vpop.f32.mrb[47].mxu0  ;;  %3979 = vmatmul.mubr.msk.bf16.gmra.mrb[40].mxu1 %vm1075_vm0, %v2379_v33  ;;  %v4432_v43 = vld [vmem:[%s4963_s25 + $0x18] sm:$0xff] }
 0x64d   : > { %v2380_v16 = vpack.c.bf16 %v2195_v19, %v2192_v21  ;;  %3061 = vmatprep.mubr.bf16.mxu1 %v4666_v56 }
 0x64f   : > { %3998 = vmatprep.mubr.msk.bf16.mxu0 %vm1075_vm0, %v2380_v16  ;;  %v4433_v16 = vld [vmem:[%s4963_s25 + $0x28] sm:$0xff] }
 0x650   : > { %3999 = vmatmul.mubr.msk.bf16.vlgmr.msra.gmra.mrb[52].mxu0 %vm1075_vm0, %v2381_v9 }
 0x651   : > { %4007 = vmatpush3.bf16.msra.mxu0 %v4195_v55 }
 0x652   : > { %4008 = vmatprep.subr.bf16.mxu0 %v4196_v59 }
 0x655   : > { %4009 = vmatpush3.bf16.msra.mxu0 %v4196_v59 }
 0x664   : > { %v3952_v13 = vpop.f32.mrb[28].mxu1 }
 0x665   : > { %v2247_v39 = vpop.f32.mrb[29].mxu1 }
 0x666   : > { %v3953_v26 = vpop.f32.mrb[30].mxu1 }
 0x667   : > { %v2383_v49 = vpack.c.bf16 %v3953_v26, %v3952_v13  ;;  %v2250_v51 = vpop.f32.mrb[31].mxu1 }
 0x668   : > { %v2382_v17 = vpack.c.bf16 %v2250_v51, %v2247_v39  ;;  %v4434_v39 = vld [vmem:[%s4963_s25 + $0x20] sm:$0xff] }
 0x669   : > { %v3960_v57 = vpop.f32.mrb[48].mxu0 }
 0x66a   : > { %v2302_v31 = vpop.f32.mrb[49].mxu0  ;;  %4002 = vmatprep.mubr.msk.bf16.mxu0 %vm1075_vm0, %v2382_v17  ;;  %v4436_v17 = vld [vmem:[%s4963_s25 + $0x30] sm:$0xff] }
 0x66b   : > { %v3961_v8 = vpop.f32.mrb[50].mxu0  ;;  %4003 = vmatmul.mubr.msk.bf16.gmra.mrb[56].mxu0 %vm1075_vm0, %v2383_v49  ;;  %v4435_v49 = vld [vmem:[%s4963_s25 + $0x38] sm:$0xff] }
 0x66c   : > { %v2385_v18 = vpack.c.bf16 %v3961_v8, %v3960_v57  ;;  %v2305_v29 = vpop.f32.mrb[51].mxu0  ;;  %v4199_v8 = vld [vmem:[#allocation8 + $0x4] ss:$8 sps:$4 sm:$0xff]  }
 0x66d   : > { %v2384_v0 = vpack.c.bf16 %v2305_v29, %v2302_v31  ;;  %v3968_v32 = vpop.f32.mrb[32].mxu1  ;;  %v4197_v31 = vld [vmem:[#allocation8] ss:$8 sps:$4 sm:$0xff]   ;;  %3029 = vmatprep.subr.bf16.mxu1 %v4199_v8  ;;  %v4200_v29 = vld [vmem:[#allocation8 + $0x10] ss:$8 sps:$4 sm:$0xff]  }
 0x66e   : > { %v2357_v22 = vpop.f32.mrb[33].mxu1  ;;  %3030 = vmatpush1.bf16.msra.mxu1 %v4197_v31 }
 0x66f   : > { %v3969_v63 = vpop.f32.mrb[34].mxu1  ;;  %4010 = vmatprep.mubr.msk.bf16.mxu0 %vm1075_vm0, %v2384_v0 }
 0x670   : > { %v2387_v12 = vpack.c.bf16 %v3969_v63, %v3968_v32  ;;  %v2360_v23 = vpop.f32.mrb[35].mxu1 }
 0x671   : > { %v2386_v34 = vpack.c.bf16 %v2360_v23, %v2357_v22 }
 0x673   : > { %4011 = vmatmul.mubr.msk.bf16.vlgmr.msra.gmra.mrb[52].mxu0 %vm1075_vm0, %v2385_v18  ;;  %v4202_v18 = vld [vmem:[#allocation8 + $0x14] ss:$8 sps:$4 sm:$0xff]  }
 0x674   : > { %4014 = vmatprep.mubr.msk.bf16.mxu0 %vm1075_vm0, %v2386_v34  ;;  %3031 = vmatprep.subr.bf16.mxu1 %v4202_v18 }
 0x675   : > { %3032 = vmatpush1.bf16.msra.mxu1 %v4200_v29 }
 0x67b   : > { %4015 = vmatmul.mubr.msk.bf16.gmra.mrb[56].mxu0 %vm1075_vm0, %v2387_v12 }
 0x70c   : > { %v3976_v36 = vpop.f32.mrb[36].mxu1 }
 0x70d   : > { %v2462_v24 = vpop.f32.mrb[37].mxu1 }
 0x70e   : > { %v3977_v40 = vpop.f32.mrb[38].mxu1 }
 0x70f   : > { %v2465_v11 = vpop.f32.mrb[39].mxu1 }
 0x71f   : > { %v3980_v53 = vpop.f32.mrb[40].mxu1 }
 0x720   : > { %v2478_v42 = vpop.f32.mrb[41].mxu1 }
 0x721   : > { %v3981_v48 = vpop.f32.mrb[42].mxu1 }
 0x722   : > { %v2481_v10 = vpop.f32.mrb[43].mxu1 }
 0x746   : > { %v4012_v20 = vpop.f32.mrb[52].mxu0 }
 0x747   : > { %v4018_v50 = vadd.f32 %v4012_v20, %v3976_v36  ;;  %v2737_v7 = vpop.f32.mrb[53].mxu0 }
 0x748   : > { %v4019_v37 = vadd.f32 %v2737_v7, %v2462_v24  ;;  %v4013_v54 = vpop.f32.mrb[54].mxu0 }
 0x749   : > { %v4020_v46 = vadd.f32 %v4013_v54, %v3977_v40  ;;  %v2740_v14 = vpop.f32.mrb[55].mxu0  ;;  %v2785_v61 = vadd.f32 %v4018_v50, %v3632_v35 }
 0x74a   : > { %v2783_v55 = vadd.f32 %v4019_v37, %v3632_v35  ;;  %v4021_v62 = vadd.f32 %v2740_v14, %v2465_v11 }
 0x74b   : > { %v2786_v38 = vadd.f32 %v4020_v46, %v3632_v35  ;;  %v5585_v45 = vadd.f32 %v4431_v60, %v2785_v61  ;;  %v4206_v60 = vld [vmem:[#allocation8 + $0x30] ss:$8 sps:$4 sm:$0xff]  }
 0x74c   : > { %v2784_v5 = vadd.f32 %v4021_v62, %v3632_v35  ;;  %v5577_v58 = vadd.f32 %v4429_v52, %v2783_v55 }
 0x74d   : > { %v5589_v9 = vadd.f32 %v4432_v43, %v2786_v38  ;;  %v4205_v38 = vld [vmem:[#allocation8 + $0x24] ss:$8 sps:$4 sm:$0xff]   ;;  %v4215_v43 = vld [vmem:[#allocation8 + $0x60] ss:$8 sps:$4 sm:$0xff]  }
 0x74e   : > { %2801 = vadd.xlane.f32.xlu0 %v5577_v58  ;;  %v4016_v25 = vpop.f32.mrb[56].mxu0  ;;  %v5581_v28 = vadd.f32 %v4430_v6, %v2784_v5  ;;  %3033 = vmatprep.subr.bf16.mxu1 %v4205_v38  ;;  %v3634_v38 = vld [vmem:[%s5820_s22] ss:$0 sm:$0xff]  ;;  %s3407_s22 = scalar_lea.sflag [#allocation4], %s4957_s20 }
 0x74f   : > { %v4022_v47 = vadd.f32 %v4016_v25, %v3980_v53  ;;  %v2753_v41 = vpop.f32.mrb[57].mxu0 }
 0x750   : > { %v4023_v44 = vadd.f32 %v2753_v41, %v2478_v42  ;;  %2803 = vadd.xlane.f32.xlu1 %v5581_v28  ;;  %v4017_v15 = vpop.f32.mrb[58].mxu0 }
 0x751   : > { %v4024_v33 = vadd.f32 %v4017_v15, %v3981_v48  ;;  %v2756_v30 = vpop.f32.mrb[59].mxu0  ;;  %v2789_v13 = vadd.f32 %v4022_v47, %v3632_v35  ;;  %v4208_v15 = vld [vmem:[#allocation8 + $0x34] ss:$8 sps:$4 sm:$0xff]  }
 0x752   : > { %v4025_v3 = vadd.f32 %v2756_v30, %v2481_v10  ;;  %2805 = vadd.xlane.f32.xlu0 %v5585_v45  ;;  %v2787_v27 = vadd.f32 %v4023_v44, %v3632_v35  ;;  %v4203_v44 = vld [vmem:[#allocation8 + $0x20] ss:$8 sps:$4 sm:$0xff]  }
 0x753   : > { %v2790_v19 = vadd.f32 %v4024_v33, %v3632_v35  ;;  %v5605_v57 = vadd.f32 %v4436_v17, %v2789_v13  ;;  %3034 = vmatpush1.bf16.msra.mxu1 %v4203_v44  ;;  %v4211_v33 = vld [vmem:[#allocation8 + $0x44] ss:$8 sps:$4 sm:$0xff]   ;;  %v4209_v30 = vld [vmem:[#allocation8 + $0x40] ss:$8 sps:$4 sm:$0xff]  }
 0x754   : > { %v2788_v21 = vadd.f32 %v4025_v3, %v3632_v35  ;;  %v5597_v26 = vadd.f32 %v4434_v39, %v2787_v27  ;;  %3035 = vmatprep.subr.bf16.mxu1 %v4208_v15  ;;  %v4214_v3 = vld [vmem:[#allocation8 + $0x54] ss:$8 sps:$4 sm:$0xff]   ;;  %v4212_v27 = vld [vmem:[#allocation8 + $0x50] ss:$8 sps:$4 sm:$0xff]   ;;  %v4221_v13 = vld [vmem:[#allocation10 + $0x40] sm:$0xff]  }
 0x755   : > { %v5601_v51 = vadd.f32 %v4435_v49, %v2790_v19  ;;  %v4220_v19 = vld [vmem:[#allocation8 + $0x74] ss:$8 sps:$4 sm:$0xff]  }
 0x756   : > { %2807 = vadd.xlane.f32.xlu0 %v5589_v9  ;;  %v5593_v59 = vadd.f32 %v4433_v16, %v2788_v21  ;;  %v4217_v21 = vld [vmem:[#allocation8 + $0x64] ss:$8 sps:$4 sm:$0xff]   ;;  %v4218_v16 = vld [vmem:[#allocation8 + $0x70] ss:$8 sps:$4 sm:$0xff]  }
 0x757   : > { %3036 = vmatpush1.bf16.msra.mxu1 %v4206_v60 }
 0x758   : > { %2811 = vadd.xlane.f32.xlu1 %v5593_v59  ;;  %3037 = vmatprep.subr.bf16.mxu1 %v4211_v33 }
 0x75a   : > { %2809 = vadd.xlane.f32.xlu0 %v5597_v26 }
 0x75b   : > { %3038 = vmatpush1.bf16.msra.mxu1 %v4209_v30  ;;  %v4222_v30 = vld [vmem:[#allocation10] sm:$0xff]  }
 0x75c   : > { %2815 = vadd.xlane.f32.xlu1 %v5601_v51  ;;  %3039 = vmatprep.subr.bf16.mxu1 %v4214_v3 }
 0x75e   : > { %2813 = vadd.xlane.f32.xlu0 %v5605_v57 }
 0x75f   : > { %3040 = vmatpush1.bf16.msra.mxu1 %v4212_v27  ;;  %v4223_v27 = vld [vmem:[#allocation10 + $0x48] sm:$0xff]  }
 0x760   : > { %3041 = vmatprep.subr.bf16.mxu1 %v4217_v21 }
 0x763   : > { %3042 = vmatpush1.bf16.msra.mxu1 %v4215_v43 }
 0x764   : > { %3043 = vmatprep.subr.bf16.mxu1 %v4220_v19 }
 0x767   : > { %3044 = vmatpush1.bf16.msra.mxu1 %v4218_v16  ;;  %v4224_v16 = vld [vmem:[#allocation10 + $0x8] sm:$0xff]  }
 0x768   : > { %3778 = vmatprep.subr.bf16.mxu1 %v4221_v13 }
 0x7db   : > { %v2802_v0 = vpop.xlane.xlu0 %2801 }
 0x7dc   : > { %v2817_v32 = vmul.f32 0.0078125, %v2802_v0 }
 0x7dd   : > { %v2804_v22 = vpop.xlane.xlu1 %2803 }
 0x7de   : > { %v5609_v63 = vsub.f32 %v5577_v58, %v2817_v32  ;;  %v2818_v12 = vmul.f32 0.0078125, %v2804_v22 }
 0x7df   : > { %v2806_v23 = vpop.xlane.xlu0 %2805 }
 0x7e0   : > { %v5612_v34 = vsub.f32 %v5581_v28, %v2818_v12  ;;  %v2819_v36 = vmul.f32 0.0078125, %v2806_v23  ;;  %v2833_v24 = vmul.f32 %v5609_v63, %v5609_v63 }
 0x7e2   : > { %v5617_v40 = vsub.f32 %v5585_v45, %v2819_v36  ;;  %2841 = vadd.xlane.f32.xlu0 %v2833_v24  ;;  %v2834_v11 = vmul.f32 %v5612_v34, %v5612_v34 }
 0x7e3   : > { %v2808_v53 = vpop.xlane.xlu0 %2807 }
 0x7e4   : > { %v2820_v42 = vmul.f32 0.0078125, %v2808_v53  ;;  %2843 = vadd.xlane.f32.xlu1 %v2834_v11  ;;  %v2835_v48 = vmul.f32 %v5617_v40, %v5617_v40 }
 0x7e5   : > { %v2812_v10 = vpop.xlane.xlu1 %2811 }
 0x7e6   : > { %v5624_v20 = vsub.f32 %v5589_v9, %v2820_v42  ;;  %v2822_v50 = vmul.f32 0.0078125, %v2812_v10  ;;  %2845 = vadd.xlane.f32.xlu0 %v2835_v48  ;;  %v3633_v48 = vld [vmem:[%s5781_s7] ss:$0 sm:$0xff] }
 0x7e7   : > { %v2810_v35 = vpop.xlane.xlu0 %2809 }
 0x7e8   : > { %v5627_v7 = vsub.f32 %v5593_v59, %v2822_v50  ;;  %v2821_v37 = vmul.f32 0.0078125, %v2810_v35  ;;  %v2836_v54 = vmul.f32 %v5624_v20, %v5624_v20 }
 0x7e9   : > { %v2816_v46 = vpop.xlane.xlu1 %2815 }
 0x7ea   : > { %v5632_v14 = vsub.f32 %v5597_v26, %v2821_v37  ;;  %v2824_v55 = vmul.f32 0.0078125, %v2816_v46  ;;  %2847 = vadd.xlane.f32.xlu1 %v2836_v54  ;;  %v2838_v25 = vmul.f32 %v5627_v7, %v5627_v7 }
 0x7eb   : > { %v2814_v62 = vpop.xlane.xlu0 %2813 }
 0x7ec   : > { %v5635_v61 = vsub.f32 %v5601_v51, %v2824_v55  ;;  %v2823_v5 = vmul.f32 0.0078125, %v2814_v62  ;;  %v2837_v52 = vmul.f32 %v5632_v14, %v5632_v14 }
 0x7ee   : > { %v5642_v6 = vsub.f32 %v5605_v57, %v2823_v5  ;;  %2849 = vadd.xlane.f32.xlu0 %v2837_v52  ;;  %2851 = vadd.xlane.f32.xlu1 %v2838_v25  ;;  %v2840_v41 = vmul.f32 %v5635_v61, %v5635_v61 }
 0x7f0   : > { %v2839_v47 = vmul.f32 %v5642_v6, %v5642_v6 }
 0x7f2   : > { %2853 = vadd.xlane.f32.xlu0 %v2839_v47  ;;  %2855 = vadd.xlane.f32.xlu1 %v2840_v41 }
 0x86f   : > { %v2842_v39 = vpop.xlane.xlu0 %2841 }
 0x870   : > { %v2857_v49 = vmul.f32 0.0078125, %v2842_v39 }
 0x871   : > { %v2844_v17 = vpop.xlane.xlu1 %2843 }
 0x872   : > { %v2865_v31 = vadd.f32 1e-05, %v2857_v49  ;;  %v2858_v8 = vmul.f32 0.0078125, %v2844_v17 }
 0x873   : > { %v2846_v18 = vpop.xlane.xlu0 %2845 }
 0x874   : > { %4381 = vrsqrt.f32 %v2865_v31  ;;  %v2866_v29 = vadd.f32 1e-05, %v2858_v8  ;;  %v2859_v0 = vmul.f32 0.0078125, %v2846_v18 }
 0x876   : > { %4383 = vrsqrt.f32 %v2866_v29  ;;  %v2867_v32 = vadd.f32 1e-05, %v2859_v0 }
 0x877   : > { %v2848_v22 = vpop.xlane.xlu1 %2847 }
 0x878   : > { %4385 = vrsqrt.f32 %v2867_v32  ;;  %v2860_v12 = vmul.f32 0.0078125, %v2848_v22 }
 0x87a   : > { %v2868_v23 = vadd.f32 1e-05, %v2860_v12 }
 0x87b   : > { %v2850_v36 = vpop.xlane.xlu0 %2849  ;;  %v2852_v24 = vpop.xlane.xlu1 %2851 }
 0x87c   : > { %4387 = vrsqrt.f32 %v2868_v23  ;;  %v2861_v11 = vmul.f32 0.0078125, %v2850_v36  ;;  %v2862_v53 = vmul.f32 0.0078125, %v2852_v24 }
 0x87e   : > { %v4382_v42 = vpop.eup %4381  ;;  %v2869_v10 = vadd.f32 1e-05, %v2861_v11  ;;  %v2870_v50 = vadd.f32 1e-05, %v2862_v53  ;;  %v4225_v53 = vld [vmem:[#allocation10 + $0x50] sm:$0xff]  }
 0x87f   : > { %v2881_v35 = vmul.f32 %v4382_v42, %v5609_v63  ;;  %v2854_v37 = vpop.xlane.xlu0 %2853  ;;  %v2856_v54 = vpop.xlane.xlu1 %2855  ;;  %v4226_v42 = vld [vmem:[#allocation10 + $0x10] sm:$0xff]  }
 0x880   : > { %v4384_v46 = vpop.eup %4383  ;;  %4389 = vrsqrt.f32 %v2869_v10  ;;  %v2863_v55 = vmul.f32 0.0078125, %v2854_v37  ;;  %v2864_v62 = vmul.f32 0.0078125, %v2856_v54  ;;  %v4227_v10 = vld [vmem:[#allocation10 + $0x58] sm:$0xff]   ;;  %v4234_v37 = vld [vmem:[#allocation10 + $0x30] sm:$0xff]  }
 0x881   : > { %v2895_v5 = vmul.f32 %v3633_v48, %v2881_v35  ;;  %v2882_v52 = vmul.f32 %v4384_v46, %v5612_v34  ;;  %4391 = vrsqrt.f32 %v2870_v50  ;;  %v4228_v50 = vld [vmem:[#allocation10 + $0x18] sm:$0xff]   ;;  %v4232_v35 = vld [vmem:[#allocation10 + $0x28] sm:$0xff]  }
 0x882   : > { %v4386_v25 = vpop.eup %4385  ;;  %v2871_v47 = vadd.f32 1e-05, %v2863_v55  ;;  %v2872_v41 = vadd.f32 1e-05, %v2864_v62  ;;  %v4235_v54 = vld [vmem:[#allocation10 + $0x78] sm:$0xff]  }
 0x883   : > { %v2896_v44 = vmul.f32 %v3633_v48, %v2882_v52  ;;  %v2909_v63 = vadd.f32 %v3634_v38, %v2895_v5  ;;  %v2883_v60 = vmul.f32 %v4386_v25, %v5617_v40  ;;  %v4236_v46 = vld [vmem:[#allocation10 + $0x38] sm:$0xff]   ;;  %v2937_v55 = vld [vmem:[%s5821_s17] sm:$0x3]  ;;  %s4585_s17 = scalar_lea.vmem %s4584_s3, 2048 }
 0x884   : > { %4393 = vrsqrt.f32 %v2871_v47  ;;  %v5670_v62 = vrot.slane %v2937_v55, %v688_v2  ;;  %v5674_v5 = vrot.slane %v2937_v55, %v692_v4  ;;  %p4587_p2 = scmp.lt.s32.totalorder %s4585_s17, %s4579_s29 }
 0x885   : > { %v2910_v15 = vadd.f32 %v3634_v38, %v2896_v44  ;;  %4395 = vrsqrt.f32 %v2872_v41  ;;  %v2897_v21 = vmul.f32 %v3633_v48, %v2883_v60 }
 0x886   : > { %v4388_v33 = vpop.eup %4387  ;;  %p4588_p1 = por %p4587_p2, %p4586_p12 }
 0x887   : > { %v2917_v3 = vpack.c.bf16 %v2910_v15, %v2909_v63  ;;  %v2884_v34 = vmul.f32 %v4388_v33, %v5624_v20  ;;  %v2911_v17 = vadd.f32 %v3634_v38, %v2897_v21 }
 0x888   : > { %p4589_p13 = pnand %p4588_p1, %p4582_p7 }
 0x889   : > { %3062 = vmatmul.mubr.bf16.vlgmr.msra.gmra.mrb[44].mxu1 %v2917_v3  ;;  %v2898_v43 = vmul.f32 %v3633_v48, %v2884_v34 }
 0x88a   : > { %v4390_v19 = vpop.eup %4389  ;;  %3071 = vmatprep.mubr.bf16.mxu1 %v4666_v56  ;;  %3779 = vmatpush3.bf16.msra.mxu1 %v4222_v30 }
 0x88b   : > { %v4392_v13 = vpop.eup %4391  ;;  %v2912_v39 = vadd.f32 %v3634_v38, %v2898_v43  ;;  %v2885_v49 = vmul.f32 %v4390_v19, %v5632_v14  ;;  %3780 = vmatprep.subr.bf16.mxu1 %v4223_v27 }
 0x88c   : > { %v2886_v40 = vmul.f32 %v4392_v13, %v5627_v7 }
 0x88d   : > { %v2918_v20 = vpack.c.bf16 %v2912_v39, %v2911_v17  ;;  %v2899_v8 = vmul.f32 %v3633_v48, %v2885_v49 }
 0x88e   : > { %3781 = vmatpush3.bf16.msra.mxu1 %v4224_v16  ;;  %v4394_v31 = vpop.eup %4393  ;;  %v2900_v18 = vmul.f32 %v3633_v48, %v2886_v40 }
 0x88f   : > { %v4396_v29 = vpop.eup %4395  ;;  %v2913_v0 = vadd.f32 %v3634_v38, %v2899_v8  ;;  %v2887_v22 = vmul.f32 %v4394_v31, %v5642_v6  ;;  %3782 = vmatprep.subr.bf16.mxu1 %v4225_v53  ;;  %v4229_v6 = vld [vmem:[#allocation10 + $0x60] sm:$0xff]  }
 0x890   : > { %v2914_v32 = vadd.f32 %v3634_v38, %v2900_v18  ;;  %v2888_v12 = vmul.f32 %v4396_v29, %v5635_v61  ;;  %v4230_v61 = vld [vmem:[#allocation10 + $0x20] sm:$0xff]  }
 0x891   : > { %3072 = vmatmul.mubr.bf16.gmra.mrb[48].mxu1 %v2918_v20  ;;  %v2901_v23 = vmul.f32 %v3633_v48, %v2887_v22 }
 0x892   : > { %3081 = vmatprep.mubr.bf16.mxu1 %v4666_v56  ;;  %v2919_v14 = vpack.c.bf16 %v2914_v32, %v2913_v0  ;;  %v2902_v36 = vmul.f32 %v3633_v48, %v2888_v12  ;;  %3783 = vmatpush3.bf16.msra.mxu1 %v4226_v42  ;;  %v4231_v48 = vld [vmem:[#allocation10 + $0x68] sm:$0xff]  }
 0x893   : > { %v2915_v7 = vadd.f32 %v3634_v38, %v2901_v23  ;;  %3784 = vmatprep.subr.bf16.mxu1 %v4227_v10 }
 0x894   : > { %v2916_v24 = vadd.f32 %v3634_v38, %v2902_v36 }
 0x896   : > { %v2920_v11 = vpack.c.bf16 %v2916_v24, %v2915_v7  ;;  %3785 = vmatpush3.bf16.msra.mxu1 %v4228_v50 }
 0x897   : > { %3786 = vmatprep.subr.bf16.mxu1 %v4229_v6 }
 0x899   : > { %3082 = vmatmul.mubr.bf16.gmra.mrb[52].mxu1 %v2919_v14 }
 0x89a   : > { %3091 = vmatprep.mubr.bf16.mxu1 %v4666_v56  ;;  %3787 = vmatpush3.bf16.msra.mxu1 %v4230_v61  ;;  %v4233_v56 = vld [vmem:[#allocation10 + $0x70] sm:$0xff]  }
 0x89b   : > { %3788 = vmatprep.subr.bf16.mxu1 %v4231_v48 }
 0x89e   : > { %3789 = vmatpush3.bf16.msra.mxu1 %v4232_v35 }
 0x89f   : > { %3790 = vmatprep.subr.bf16.mxu1 %v4233_v56 }
 0x8a1   : > { %3092 = vmatmul.mubr.bf16.gmra.mrb[56].mxu1 %v2920_v11 }
 0x8a2   : > { %3791 = vmatpush3.bf16.msra.mxu1 %v4234_v37 }
 0x8a3   : > { %3792 = vmatprep.subr.bf16.mxu1 %v4235_v54 }
 0x8a6   : > { %3793 = vmatpush3.bf16.msra.mxu1 %v4236_v46 }
 0x95c   : > { %v3063_v52 = vpop.f32.mrb[44].mxu1 }
 0x95d   : > { %v3064_v25 = vadd.f32 %v3063_v52, %v5670_v62  ;;  %v3065_v47 = vpop.f32.mrb[45].mxu1 }
 0x95e   : > { %v3066_v41 = vadd.f32 %v3065_v47, %v5674_v5  ;;  %v3067_v38 = vpop.f32.mrb[46].mxu1 }
 0x95f   : > { %v3118_v44 = vmul.f32 0.70710677, %v3064_v25  ;;  %v3068_v63 = vadd.f32 %v3067_v38, %v5670_v62  ;;  %v3069_v15 = vpop.f32.mrb[47].mxu1  ;;  %v3102_v22 = vmul.f32 0.5, %v3064_v25 }
 0x960   : > { %v3119_v60 = vmul.f32 0.70710677, %v3066_v41  ;;  %v3070_v33 = vadd.f32 %v3069_v15, %v5674_v5  ;;  %v3103_v7 = vmul.f32 0.5, %v3066_v41 }
 0x961   : > { %4397 = verf.f32 %v3118_v44  ;;  %v3120_v2 = vmul.f32 0.70710677, %v3068_v63  ;;  %v3104_v12 = vmul.f32 0.5, %v3068_v63 }
 0x962   : > { %4399 = verf.f32 %v3119_v60  ;;  %v3121_v1 = vmul.f32 0.70710677, %v3070_v33  ;;  %v3105_v24 = vmul.f32 0.5, %v3070_v33 }
 0x963   : > { %4401 = verf.f32 %v3120_v2 }
 0x964   : > { %4403 = verf.f32 %v3121_v1  ;;  %v3073_v4 = vpop.f32.mrb[48].mxu1 }
 0x965   : > { %v3074_v30 = vadd.f32 %v3073_v4, %v5670_v62  ;;  %v3075_v3 = vpop.f32.mrb[49].mxu1 }
 0x966   : > { %v3076_v34 = vadd.f32 %v3075_v3, %v5674_v5  ;;  %v3077_v27 = vpop.f32.mrb[50].mxu1 }
 0x967   : > { %v3122_v21 = vmul.f32 0.70710677, %v3074_v30  ;;  %v3078_v43 = vadd.f32 %v3077_v27, %v5670_v62  ;;  %v3079_v19 = vpop.f32.mrb[51].mxu1  ;;  %v3106_v33 = vmul.f32 0.5, %v3074_v30 }
 0x968   : > { %v3123_v16 = vmul.f32 0.70710677, %v3076_v34  ;;  %v3080_v13 = vadd.f32 %v3079_v19, %v5674_v5  ;;  %v3107_v27 = vmul.f32 0.5, %v3076_v34 }
 0x969   : > { %4405 = verf.f32 %v3122_v21  ;;  %v3124_v39 = vmul.f32 0.70710677, %v3078_v43  ;;  %v3108_v2 = vmul.f32 0.5, %v3078_v43 }
 0x96a   : > { %4407 = verf.f32 %v3123_v16  ;;  %v3125_v49 = vmul.f32 0.70710677, %v3080_v13  ;;  %v3109_v21 = vmul.f32 0.5, %v3080_v13 }
 0x96b   : > { %v4398_v40 = vpop.eup %4397  ;;  %4409 = verf.f32 %v3124_v39 }
 0x96c   : > { %v4400_v17 = vpop.eup %4399  ;;  %v3150_v31 = vadd.f32 1.0, %v4398_v40  ;;  %4411 = verf.f32 %v3125_v49  ;;  %v3083_v20 = vpop.f32.mrb[52].mxu1 }
 0x96d   : > { %v4402_v8 = vpop.eup %4401  ;;  %v3151_v18 = vadd.f32 1.0, %v4400_v17  ;;  %v5685_v29 = vadd.f32 %v3083_v20, %v5670_v62  ;;  %v3085_v0 = vpop.f32.mrb[53].mxu1 }
 0x96e   : > { %v4404_v32 = vpop.eup %4403  ;;  %v3152_v14 = vadd.f32 1.0, %v4402_v8  ;;  %v5688_v23 = vadd.f32 %v3085_v0, %v5674_v5  ;;  %v3087_v36 = vpop.f32.mrb[54].mxu1  ;;  %v3166_v10 = vmul.f32 %v3150_v31, %v3102_v22 }
 0x96f   : > { %v3153_v11 = vadd.f32 1.0, %v4404_v32  ;;  %v3126_v53 = vmul.f32 0.70710677, %v5685_v29  ;;  %v3089_v42 = vpop.f32.mrb[55].mxu1  ;;  %v3088_v61 = vadd.f32 %v3087_v36, %v5670_v62  ;;  %v3167_v48 = vmul.f32 %v3151_v18, %v3103_v7 }
 0x970   : > { %v3168_v50 = vmul.f32 %v3152_v14, %v3104_v12  ;;  %v3127_v6 = vmul.f32 0.70710677, %v5688_v23  ;;  %v3090_v56 = vadd.f32 %v3089_v42, %v5674_v5  ;;  %v3110_v36 = vmul.f32 0.5, %v5685_v29 }
 0x971   : > { %v3169_v35 = vmul.f32 %v3153_v11, %v3105_v24  ;;  %4413 = verf.f32 %v3126_v53  ;;  %v3128_v54 = vmul.f32 0.70710677, %v3088_v61  ;;  %v3112_v7 = vmul.f32 0.5, %v3088_v61 }
 0x972   : > { %v3182_v37 = vpack.c.bf16 %v3168_v50, %v3166_v10  ;;  %4415 = verf.f32 %v3127_v6  ;;  %v3129_v55 = vmul.f32 0.70710677, %v3090_v56  ;;  %v3113_v11 = vmul.f32 0.5, %v3090_v56 }
 0x973   : > { %v4406_v46 = vpop.eup %4405  ;;  %v3183_v52 = vpack.c.bf16 %v3169_v35, %v3167_v48  ;;  %4417 = verf.f32 %v3128_v54 }
 0x974   : > { %v4408_v25 = vpop.eup %4407  ;;  %v3154_v47 = vadd.f32 1.0, %v4406_v46  ;;  %v3093_v41 = vpop.f32.mrb[56].mxu1  ;;  %4419 = verf.f32 %v3129_v55 }
 0x975   : > { %v4410_v38 = vpop.eup %4409  ;;  %v3155_v44 = vadd.f32 1.0, %v4408_v25  ;;  %v3094_v63 = vadd.f32 %v3093_v41, %v5670_v62  ;;  %v3095_v15 = vpop.f32.mrb[57].mxu1  ;;  %3357 = vmatprep.mubr.bf16.mxu1 %v3183_v52 }
 0x976   : > { %v4412_v60 = vpop.eup %4411  ;;  %v3156_v1 = vadd.f32 1.0, %v4410_v38  ;;  %v3096_v4 = vadd.f32 %v3095_v15, %v5674_v5  ;;  %v3097_v3 = vpop.f32.mrb[58].mxu1  ;;  %3358 = vmatmul.mubr.bf16.vlgmr.msra.gmra.mrb[60].mxu1 %v3182_v37  ;;  %v3170_v49 = vmul.f32 %v3154_v47, %v3106_v33 }
 0x977   : > { %v3157_v19 = vadd.f32 1.0, %v4412_v60  ;;  %v3130_v16 = vmul.f32 0.70710677, %v3094_v63  ;;  %v3099_v39 = vpop.f32.mrb[59].mxu1  ;;  %v3098_v31 = vadd.f32 %v3097_v3, %v5670_v62  ;;  %v3171_v20 = vmul.f32 %v3155_v44, %v3107_v27 }
 0x978   : > { %v3172_v40 = vmul.f32 %v3156_v1, %v3108_v2  ;;  %v3131_v17 = vmul.f32 0.70710677, %v3096_v4  ;;  %v3100_v30 = vadd.f32 %v3099_v39, %v5674_v5  ;;  %v3111_v5 = vmul.f32 0.5, %v5688_v23 }
 0x979   : > { %v3173_v8 = vmul.f32 %v3157_v19, %v3109_v21  ;;  %4421 = verf.f32 %v3130_v16  ;;  %v3132_v43 = vmul.f32 0.70710677, %v3098_v31  ;;  %v3114_v29 = vmul.f32 0.5, %v3094_v63  ;;  %v3651_v63 = vld [vmem:[%s5822_s10] ss:$0 sm:$0xff] }
 0x97a   : > { %4423 = verf.f32 %v3131_v17  ;;  %v3184_v18 = vpack.c.bf16 %v3172_v40, %v3170_v49  ;;  %v3133_v32 = vmul.f32 0.70710677, %v3100_v30  ;;  %v3116_v61 = vmul.f32 0.5, %v3098_v31 }
 0x97b   : > { %v4414_v0 = vpop.eup %4413  ;;  %v3185_v34 = vpack.c.bf16 %v3173_v8, %v3171_v20  ;;  %4425 = verf.f32 %v3132_v43  ;;  %v3115_v23 = vmul.f32 0.5, %v3096_v4  ;;  %v3117_v56 = vmul.f32 0.5, %v3100_v30 }
 0x97c   : > { %v4416_v13 = vpop.eup %4415  ;;  %v3158_v22 = vadd.f32 1.0, %v4414_v0  ;;  %4427 = verf.f32 %v3133_v32 }
 0x97d   : > { %3365 = vmatprep.mubr.bf16.mxu1 %v3185_v34  ;;  %v4418_v12 = vpop.eup %4417  ;;  %v3159_v14 = vadd.f32 1.0, %v4416_v13 }
 0x97e   : > { %3366 = vmatmul.mubr.bf16.gmra.mrb[64].mxu1 %v3184_v18  ;;  %v4420_v62 = vpop.eup %4419  ;;  %v3160_v24 = vadd.f32 1.0, %v4418_v12  ;;  %v3174_v42 = vmul.f32 %v3158_v22, %v3110_v36 }
 0x97f   : > { %v3161_v53 = vadd.f32 1.0, %v4420_v62  ;;  %v3175_v50 = vmul.f32 %v3159_v14, %v3111_v5 }
 0x980   : > { %v3176_v10 = vmul.f32 %v3160_v24, %v3112_v7 }
 0x981   : > { %v3177_v6 = vmul.f32 %v3161_v53, %v3113_v11 }
 0x982   : > { %v3186_v35 = vpack.c.bf16 %v3176_v10, %v3174_v42 }
 0x983   : > { %v4422_v48 = vpop.eup %4421  ;;  %v3187_v54 = vpack.c.bf16 %v3177_v6, %v3175_v50 }
 0x984   : > { %v4424_v37 = vpop.eup %4423  ;;  %v3162_v46 = vadd.f32 1.0, %v4422_v48 }
 0x985   : > { %v4426_v55 = vpop.eup %4425  ;;  %v3163_v52 = vadd.f32 1.0, %v4424_v37  ;;  %3373 = vmatprep.mubr.bf16.mxu1 %v3187_v54 }
 0x986   : > { %v4428_v25 = vpop.eup %4427  ;;  %v3164_v47 = vadd.f32 1.0, %v4426_v55  ;;  %3374 = vmatmul.mubr.bf16.gmra.mrb[68].mxu1 %v3186_v35  ;;  %v3178_v38 = vmul.f32 %v3162_v46, %v3114_v29 }
 0x987   : > { %v3165_v41 = vadd.f32 1.0, %v4428_v25  ;;  %v3179_v15 = vmul.f32 %v3163_v52, %v3115_v23 }
 0x988   : > { %v3180_v44 = vmul.f32 %v3164_v47, %v3116_v61 }
 0x989   : > { %v3181_v60 = vmul.f32 %v3165_v41, %v3117_v56 }
 0x98a   : > { %v3188_v33 = vpack.c.bf16 %v3180_v44, %v3178_v38 }
 0x98b   : > { %v3189_v2 = vpack.c.bf16 %v3181_v60, %v3179_v15 }
 0x98d   : > { %3381 = vmatprep.mubr.bf16.mxu1 %v3189_v2 }
 0x98e   : > { %3382 = vmatmul.mubr.bf16.gmra.mrb[72].mxu1 %v3188_v33 }
 0xa49   : > { %v3794_v1 = vpop.f32.mrb[60].mxu1 }
 0xa4a   : > { %v3795_v3 = vpop.f32.mrb[61].mxu1 }
 0xa4b   : > { %v3796_v27 = vadd.f32 %v3795_v3, %v3794_v1  ;;  %v3797_v21 = vpop.f32.mrb[62].mxu1 }
 0xa4c   : > { %v3798_v4 = vpop.f32.mrb[63].mxu1 }
 0xa4d   : > { %v3360_v19 = vadd.f32 %v3796_v27, %v3651_v63  ;;  %v3799_v16 = vadd.f32 %v3798_v4, %v3797_v21 }
 0xa4f   : > { %v3390_v39 = vadd.f32 %v3360_v19, %v5577_v58  ;;  %v3363_v49 = vadd.f32 %v3799_v16, %v3651_v63 }
 0xa51   : > { %3398 = vst [vmem:[%s5706_s23] sm:$0xff] %v3390_v39  ;;  %v3391_v40 = vadd.f32 %v3363_v49, %v5581_v28  ;;  %v3800_v17 = vpop.f32.mrb[64].mxu1 }
 0xa52   : > { %v3801_v31 = vpop.f32.mrb[65].mxu1 }
 0xa53   : > { %3399 = vst [vmem:[%s5706_s23 + $0x8] sm:$0xff] %v3391_v40  ;;  %v3802_v20 = vadd.f32 %v3801_v31, %v3800_v17  ;;  %v3803_v8 = vpop.f32.mrb[66].mxu1 }
 0xa54   : > { %v3804_v30 = vpop.f32.mrb[67].mxu1 }
 0xa55   : > { %v3368_v43 = vadd.f32 %v3802_v20, %v3651_v63  ;;  %v3805_v58 = vadd.f32 %v3804_v30, %v3803_v8 }
 0xa57   : > { %v3392_v18 = vadd.f32 %v3368_v43, %v5585_v45  ;;  %v3371_v0 = vadd.f32 %v3805_v58, %v3651_v63 }
 0xa59   : > { %3400 = vst [vmem:[%s5706_s23 + $0x10] sm:$0xff] %v3392_v18  ;;  %v3393_v32 = vadd.f32 %v3371_v0, %v5589_v9  ;;  %v3806_v34 = vpop.f32.mrb[68].mxu1 }
 0xa5a   : > { %v3807_v13 = vpop.f32.mrb[69].mxu1 }
 0xa5b   : > { %3401 = vst [vmem:[%s5706_s23 + $0x18] sm:$0xff] %v3393_v32  ;;  %v3808_v28 = vadd.f32 %v3807_v13, %v3806_v34  ;;  %v3809_v22 = vpop.f32.mrb[70].mxu1 }
 0xa5c   : > { %v3810_v12 = vpop.f32.mrb[71].mxu1 }
 0xa5d   : > { %v3376_v14 = vadd.f32 %v3808_v28, %v3651_v63  ;;  %v3811_v62 = vadd.f32 %v3810_v12, %v3809_v22 }
 0xa5f   : > { %v3394_v36 = vadd.f32 %v3376_v14, %v5597_v26  ;;  %v3379_v7 = vadd.f32 %v3811_v62, %v3651_v63 }
 0xa61   : > { %3402 = vst [vmem:[%s5706_s23 + $0x20] sm:$0xff] %v3394_v36  ;;  %v3395_v45 = vadd.f32 %v3379_v7, %v5593_v59  ;;  %v3812_v24 = vpop.f32.mrb[72].mxu1 }
 0xa62   : > { %v3813_v9 = vpop.f32.mrb[73].mxu1 }
 0xa63   : > { %3403 = vst [vmem:[%s5706_s23 + $0x28] sm:$0xff] %v3395_v45  ;;  %v3814_v5 = vadd.f32 %v3813_v9, %v3812_v24  ;;  %v3815_v11 = vpop.f32.mrb[74].mxu1 }
 0xa64   : > { %v3816_v53 = vpop.f32.mrb[75].mxu1 }
 0xa65   : > { %v3384_v42 = vadd.f32 %v3814_v5, %v3651_v63  ;;  %v3817_v10 = vadd.f32 %v3816_v53, %v3815_v11 }
 0xa67   : > { %v3396_v26 = vadd.f32 %v3384_v42, %v5605_v57  ;;  %v3387_v50 = vadd.f32 %v3817_v10, %v3651_v63 }
 0xa69   : > { %3404 = vst [vmem:[%s5706_s23 + $0x30] sm:$0xff] %v3396_v26  ;;  %v3397_v59 = vadd.f32 %v3387_v50, %v5601_v51 }
 0xa6b   : > { %3405 = vst [vmem:[%s5706_s23 + $0x38] sm:$0xff] %v3397_v59 }
 0xa6c   : > { %4592 = shalt.err (!%p4589_p13)
}
 0xa6d   : > { %s4593_s30 = scalar_lea.hbm %s5725_s16, 1024  ;;  %s4597_s23 = scalar_lea.hbm %s5823_s14, 2048 }
 0xa6e   : > { %p4594_p9 = scmp.ne.s32.totalorder %s5725_s16, %s4593_s30  ;;  %p4598_p4 = scmp.lt.u32.totalorder %s5725_s16, %s5823_s14 }
 0xa6f   : > { %p4599_p8 = scmp.lt.u32.totalorder %s4597_s23, %s4593_s30  ;;  %p4601_p3 = scmp.lt.u32.totalorder %s4593_s30, %s5725_s16 }
 0xa70   : > { %p4595_p0 = pnand %p4594_p9, %p4902_p10 }
 0xa71   : > { %p4600_p6 = por %p4599_p8, %p4598_p4 }
 0xa72   : > { %p4596_p11 = pneg %p4595_p0 }
 0xa73   : > { %p4602_p5 = por %p4601_p3, %p4600_p6 }
 0xa75   : > { %p4603_p7 = pnand %p4602_p5, %p4596_p11 }
 0xa77   : > { %4606 = shalt.err (!%p4603_p7)
}
 0xa78   : > { %s4671_s25 = smov 128   ;;  %s4672_s29 = smov 8  }
 0xa79   : > { %4076 = dma.vmem_to_hbm [thread:$0]  (%p4902_p10), %s5727_s19, 1024, %s5725_s16, %s3407_s22, %s4671_s25, %s4671_s25, %s4672_s29  }
 0xa7a PF: > { %s5824_s21 = sld [smem:[#allocation16_spill]]  ;;  %s5825_s3 = sld [smem:[#allocation17_spill]] }
 0xa7b   : > { %p5827_p2 = scmp.ge.s32.totalorder %s4653_s28, 2 }
 0xa80   : > { %s3436_s17 = sand.u32 1, %s5824_s21   ;;  %p5826_p12 = scmp.ne.s32.totalorder %s5825_s3, 0 }
 0xa81   : > { %s3437_s30 = scalar_lea.sflag [#allocation4], %s3436_s17 }
 0xa82   : > { %p4096_p1 = pnand %p5827_p2, %p5826_p12 }
 0xa84   : > { %4636 = dma.done.wait (!%p4096_p1), %s3437_s30, 1024  }
 0xa85   : > { %4638 = vsyncadd (!%p4096_p1), %s3437_s30, 4294966272  ;;  %p28_p13 = scmp.ge.s32.totalorder %s4892_s15, 4   ;;  %s5828_s25 = smov %s4645_s26 }
 0xa86   : > { %s5829_s26 = smov %s4649_s27  ;;  %s5830_s27 = smov %s4908_s24 }
 0xa87   : > { %s5831_s28 = smov %s4892_s15  ;;  %30 = sbr.rel (!%p28_p13) target bundleno = 13 (0xd), region = 133 }
 0xa8e   :  { %3442 = vsyncpa [#allocation3], 1 }
 0xa8f   :  { %3444 = vsyncpa [#allocation3 + $0x1], 1 }
 0xa90   :  { %3445 = vsyncpa [#allocation6], 1 }
 0xa91   :  { %3446 = vsyncpa [#allocation9], 1 }
 0xa92   :  { %3447 = vsyncpa [#allocation4], 1 }
 0xa93   :  { %3449 = vsyncpa [#allocation4 + $0x1], 1 }

</bundles_post_ra>
